<compile_context>
chip_gen: v7x
topology: tpu7x:2x2x1
jax: 0.10.0
libtpu: 0.0.40
codegen_flags: <defaults>
</compile_context>

<pallas_src>
import math

import jax
import jax.numpy as jnp
import numpy as np
from jax import lax
from jax.experimental import pallas as pl
from jax.experimental.pallas import tpu as pltpu


def _round_up(x, m):
    return (x + m - 1) // m * m


def _bigru_kernel(emb_ref, wih_ref, whh_ref, bih_ref, bhh_ref,
                  wout_ref, bout_ref, out_ref):
    """Bidirectional GRU + output linear, single invocation (whole arrays in VMEM).

    emb_ref:  (S, E)   f32   embedded (dropout'ed) inputs
    wih_ref:  (E, 6*Hp) bf16  input->gate weights, cols [rf|zf|nf|rb|zb|nb], 128-padded
    whh_ref:  (2*Hp, 6*Hp) bf16  block-diag(whh_fwd, whh_bwd), same gate-padded cols
    bih_ref:  (1, 6*Hp) f32   input gate biases (padded lanes zero)
    bhh_ref:  (1, 6*Hp) f32   hidden gate biases (padded lanes zero)
    wout_ref: (2*Hp, Lp) bf16  stacked [wout_fwd; wout_bwd], zero-padded rows/cols
    bout_ref: (1, Lp)  f32
    out_ref:  (S, Lp)  f32   lane-dense padded logits
    """
    S = emb_ref.shape[0]
    Hp = whh_ref.shape[0] // 2        # lane-padded hidden size (multiple of 128)
    G = 3 * Hp                        # per-direction fused gate width

    # Hoisted input projection for BOTH directions in one MXU matmul (bih folded in).
    emb = emb_ref[...].astype(jnp.bfloat16)
    gx = (jnp.dot(emb, wih_ref[...], preferred_element_type=jnp.float32)
          + bih_ref[...])                                     # (S, 6*Hp) f32

    whh = whh_ref[...]                # (2*Hp, 6*Hp) bf16, block-diagonal
    bhh = bhh_ref[...]                # (1, 6*Hp) f32

    def gru_gates(gx_t, gh_t, h_prev):
        # PyTorch GRU equations, gate order [r, z, n].  All slices below start at
        # multiples of 128 lanes (gate blocks are lane-padded), so no XLU rotates.
        # Padded lanes stay exactly 0: sigmoid(0)=0.5, tanh(0)=0 -> 0.5*0+0.5*0=0.
        r = jax.nn.sigmoid(gx_t[:, 0:Hp] + gh_t[:, 0:Hp])
        z = jax.nn.sigmoid(gx_t[:, Hp:2 * Hp] + gh_t[:, Hp:2 * Hp])
        n = jnp.tanh(gx_t[:, 2 * Hp:3 * Hp] + r * gh_t[:, 2 * Hp:3 * Hp])
        return (1.0 - z) * n + z * h_prev                     # (1, Hp) f32

    h_f = jnp.zeros((1, Hp), jnp.float32)
    h_b = jnp.zeros((1, Hp), jnp.float32)
    hf_rows = [None] * S
    hb_rows = [None] * S

    # Both directions share one fused block-diagonal hidden matmul per step;
    # hidden states live in vregs (no per-step masked stores).  S is small here,
    # so the loop is fully (statically) unrolled.
    # TODO(synk): for large S, cap the unroll (chunks of 8 steps) and flush each
    # (8, 2*Hp) chunk to a VMEM scratch as a full tile instead of keeping all
    # rows live; also tile the input projection / epilogue over S (v7x 64 MiB VMEM).
    # TODO(synk): on v7x the two directions could be split across the two
    # TensorCores (grid=(2,) parallel + a tiny second pallas_call for the epilogue).
    for i in range(S):
        tb = S - 1 - i
        h_cat = jnp.concatenate([h_f, h_b], axis=1)           # (1, 2*Hp)
        gh = (jnp.dot(h_cat.astype(jnp.bfloat16), whh,
                      preferred_element_type=jnp.float32)
              + bhh)                                          # (1, 6*Hp) f32
        h_f = gru_gates(gx[i:i + 1, 0:G], gh[:, 0:G], h_f)            # fwd @ pos i
        h_b = gru_gates(gx[tb:tb + 1, G:2 * G], gh[:, G:2 * G], h_b)  # bwd @ pos tb
        hf_rows[i] = h_f
        hb_rows[tb] = h_b

    # Assemble (S, 2*Hp) once from vreg values and run a single epilogue matmul.
    hs = jnp.concatenate([jnp.concatenate(hf_rows, axis=0),
                          jnp.concatenate(hb_rows, axis=0)], axis=1)  # (S, 2*Hp)
    out_ref[...] = (jnp.dot(hs.astype(jnp.bfloat16), wout_ref[...],
                            preferred_element_type=jnp.float32)
                    + bout_ref[...]).astype(out_ref.dtype)


def _pack_params(params):
    """Pack PyTorch-layout GRU/Linear params into the fused, lane-padded layout
    the kernel consumes (gate order [r, z, n]; each gate block padded to Hp=128k
    lanes; both directions fused; bf16 MXU operands, f32 biases)."""
    H = params["whh_f"].shape[0]
    L = params["bout"].shape[-1]
    Hp = _round_up(H, 128)
    Lp = _round_up(L, 128)

    def pad_gate_cols(w):  # (K, 3H) -> (K, 3*Hp): pad each gate block to Hp lanes
        blocks = [jnp.pad(w[:, g * H:(g + 1) * H], ((0, 0), (0, Hp - H)))
                  for g in range(3)]
        return jnp.concatenate(blocks, axis=1)

    def pad_rows(w):       # (H, N) -> (Hp, N)
        return jnp.pad(w, ((0, Hp - H), (0, 0)))

    wih = jnp.concatenate([pad_gate_cols(params["wih_f"]),
                           pad_gate_cols(params["wih_b"])], axis=1)       # (E, 6Hp)
    bih = jnp.concatenate([pad_gate_cols(params["bih_f"]),
                           pad_gate_cols(params["bih_b"])], axis=1)       # (1, 6Hp)
    bhh = jnp.concatenate([pad_gate_cols(params["bhh_f"]),
                           pad_gate_cols(params["bhh_b"])], axis=1)       # (1, 6Hp)

    whh_f = pad_rows(pad_gate_cols(params["whh_f"]))                      # (Hp, 3Hp)
    whh_b = pad_rows(pad_gate_cols(params["whh_b"]))                      # (Hp, 3Hp)
    zeros = jnp.zeros_like(whh_f)
    whh = jnp.concatenate(
        [jnp.concatenate([whh_f, zeros], axis=1),
         jnp.concatenate([zeros, whh_b], axis=1)], axis=0)                # (2Hp, 6Hp)

    wout = jnp.concatenate(
        [pad_rows(jnp.pad(params["wout_f"], ((0, 0), (0, Lp - L)))),
         pad_rows(jnp.pad(params["wout_b"], ((0, 0), (0, Lp - L))))],
        axis=0)                                                           # (2Hp, Lp)
    bout = jnp.pad(params["bout"], ((0, 0), (0, Lp - L)))                 # (1, Lp)

    return {
        "wih": wih.astype(jnp.bfloat16),
        "whh": whh.astype(jnp.bfloat16),
        "wout": wout.astype(jnp.bfloat16),
        "bih": bih, "bhh": bhh, "bout": bout,
        "H": H, "L": L, "Hp": Hp, "Lp": Lp,
    }


def classic_gru_forward(tokens, params):
    """tokens: (S,) int32.  Returns logits (S, numlabels) float32."""
    # Embedding lookup (XLA glue gather).  Dropout is identity in eval mode.
    # TODO(synk): training-mode dropout (pltpu PRNG mask + 1/(1-p) scaling) not implemented.
    # TODO(synk): pull the embedding gather into the kernel (scalar-prefetched token
    # ids + manual row DMAs from HBM) to drop the extra HBM write+read of emb.
    emb = jnp.take(params["embedding"], tokens, axis=0)                   # (S, E) f32

    packed = _pack_params(params)
    S = emb.shape[0]
    L, Lp = packed["L"], packed["Lp"]

    vmem = pl.BlockSpec(memory_space=pltpu.MemorySpace.VMEM)
    out = pl.pallas_call(
        _bigru_kernel,
        out_shape=jax.ShapeDtypeStruct((S, Lp), jnp.float32),
        in_specs=[vmem] * 7,
        out_specs=vmem,
        compiler_params=pltpu.CompilerParams(vmem_limit_bytes=32 * 1024 * 1024),
    )(emb, packed["wih"], packed["whh"], packed["bih"], packed["bhh"],
      packed["wout"], packed["bout"])
    return out[:, :L]


def init_params(key, vocab, E, H, L):
    """Deterministic synthetic parameters (same shapes as the PyTorch module),
    stored pre-transposed for x @ W, gate order [r, z, n]."""
    keys = jax.random.split(key, 12)
    k = 1.0 / math.sqrt(H)

    def u(kk, shape):
        return jax.random.uniform(kk, shape, jnp.float32, -k, k)

    return {
        "embedding": jax.random.normal(keys[0], (vocab, E), jnp.float32),
        "wih_f": u(keys[1], (E, 3 * H)),
        "whh_f": u(keys[2], (H, 3 * H)),
        "bih_f": u(keys[3], (1, 3 * H)),
        "bhh_f": u(keys[4], (1, 3 * H)),
        "wih_b": u(keys[5], (E, 3 * H)),
        "whh_b": u(keys[6], (H, 3 * H)),
        "bih_b": u(keys[7], (1, 3 * H)),
        "bhh_b": u(keys[8], (1, 3 * H)),
        "wout_f": u(keys[9], (H, L)),   # Linear columns acting on fwd hidden half
        "wout_b": u(keys[10], (H, L)),  # Linear columns acting on bwd hidden half
        "bout": u(keys[11], (1, L)),
    }


def reference_forward(tokens, params, mxu_dtype=jnp.float32):
    """Pure-JAX reference (PyTorch GRU equations).  With mxu_dtype=bf16 it
    emulates the kernel's bf16-operand / f32-accumulate matmuls exactly."""
    cast = lambda x: x.astype(mxu_dtype)
    emb = jnp.take(params["embedding"], tokens, axis=0)
    H = params["whh_f"].shape[0]

    def run_dir(wih, whh, bih, bhh, reverse):
        xs = emb[::-1] if reverse else emb
        gx = jnp.dot(cast(xs), cast(wih), preferred_element_type=jnp.float32) + bih

        def cell(h, gx_t):
            gx_t = gx_t[None, :]
            gh = jnp.dot(cast(h), cast(whh), preferred_element_type=jnp.float32) + bhh
            r = jax.nn.sigmoid(gx_t[:, 0:H] + gh[:, 0:H])
            z = jax.nn.sigmoid(gx_t[:, H:2 * H] + gh[:, H:2 * H])
            n = jnp.tanh(gx_t[:, 2 * H:] + r * gh[:, 2 * H:])
            h_new = (1.0 - z) * n + z * h
            return h_new, h_new[0]

        _, hs = lax.scan(cell, jnp.zeros((1, H), jnp.float32), gx)
        return hs[::-1] if reverse else hs

    hf = run_dir(params["wih_f"], params["whh_f"], params["bih_f"], params["bhh_f"], False)
    hb = run_dir(params["wih_b"], params["whh_b"], params["bih_b"], params["bhh_b"], True)
    return (jnp.dot(cast(hf), cast(params["wout_f"]), preferred_element_type=jnp.float32)
            + jnp.dot(cast(hb), cast(params["wout_b"]), preferred_element_type=jnp.float32)
            + params["bout"])


if __name__ == "__main__":
    VOCAB, EMB, HID, LABELS, SEQ = 50, 32, 32, 16, 8

    key = jax.random.PRNGKey(0)
    pkey, tkey = jax.random.split(key)
    params = init_params(pkey, VOCAB, EMB, HID, LABELS)
    tokens = jax.random.randint(tkey, (SEQ,), 0, VOCAB, dtype=jnp.int32)

    out = classic_gru_forward(tokens, params)
    out = jax.block_until_ready(out)
    assert out.shape == (SEQ, LABELS)

    out_np = np.asarray(out)
    # Tight check against a reference that emulates the kernel's bf16 MXU operands.
    ref_bf16 = np.asarray(reference_forward(tokens, params, mxu_dtype=jnp.bfloat16))
    np.testing.assert_allclose(out_np, ref_bf16, atol=2e-3, rtol=2e-3)
    # Sanity check against the full-f32 reference (slack covers bf16 quantization).
    ref_f32 = np.asarray(reference_forward(tokens, params, mxu_dtype=jnp.float32))
    np.testing.assert_allclose(out_np, ref_f32, atol=5e-2, rtol=5e-2)

    print("KERNEL_OK")
</pallas_src>

<mosaic_0001>
module attributes {stable_mosaic.version = 11 : i64} {
  func.func @_bigru_kernel(%arg0: memref<8x32xf32, #tpu.memory_space<vmem>>, %arg1: memref<32x768xbf16, #tpu.memory_space<vmem>>, %arg2: memref<256x768xbf16, #tpu.memory_space<vmem>>, %arg3: memref<1x768xf32, #tpu.memory_space<vmem>>, %arg4: memref<1x768xf32, #tpu.memory_space<vmem>>, %arg5: memref<256x128xbf16, #tpu.memory_space<vmem>>, %arg6: memref<1x128xf32, #tpu.memory_space<vmem>>, %arg7: memref<8x128xf32, #tpu.memory_space<vmem>>) attributes {dimension_semantics = [], scalar_prefetch = 0 : i64, scratch_operands = 0 : i64, tpu.core_type = #tpu.core_type<tc>} {
    %c0 = arith.constant 0 : index
    %c0_0 = arith.constant 0 : index
    %0 = vector.load %arg0[%c0, %c0_0] : memref<8x32xf32, #tpu.memory_space<vmem>>, vector<8x32xf32>
    %1 = arith.truncf %0 : vector<8x32xf32> to vector<8x32xbf16>
    %c0_1 = arith.constant 0 : index
    %c0_2 = arith.constant 0 : index
    %2 = vector.load %arg1[%c0_1, %c0_2] : memref<32x768xbf16, #tpu.memory_space<vmem>>, vector<32x768xbf16>
    %cst = arith.constant dense<0.000000e+00> : vector<8x768xf32>
    %3 = tpu.matmul %1, %2, %cst {dimension_numbers = #tpu.dot_dimension_numbers<[1], [0], [0], [1], [0, 0, 1, 1], [], []>} : vector<8x32xbf16>, vector<32x768xbf16>, vector<8x768xf32> -> vector<8x768xf32>
    %c0_3 = arith.constant 0 : index
    %c0_4 = arith.constant 0 : index
    %4 = vector.load %arg3[%c0_3, %c0_4] : memref<1x768xf32, #tpu.memory_space<vmem>>, vector<1x768xf32>
    %5 = vector.broadcast %4 : vector<1x768xf32> to vector<8x768xf32>
    %6 = arith.addf %3, %5 : vector<8x768xf32>
    %c0_5 = arith.constant 0 : index
    %c0_6 = arith.constant 0 : index
    %7 = vector.load %arg2[%c0_5, %c0_6] : memref<256x768xbf16, #tpu.memory_space<vmem>>, vector<256x768xbf16>
    %c0_7 = arith.constant 0 : index
    %c0_8 = arith.constant 0 : index
    %8 = vector.load %arg4[%c0_7, %c0_8] : memref<1x768xf32, #tpu.memory_space<vmem>>, vector<1x768xf32>
    %cst_9 = arith.constant 0.000000e+00 : f32
    %9 = vector.broadcast %cst_9 : f32 to vector<1x128xf32>
    %cst_10 = arith.constant 0.000000e+00 : f32
    %10 = vector.broadcast %cst_10 : f32 to vector<1x128xf32>
    %11 = tpu.concatenate %9, %10 in 1 : vector<1x128xf32>, vector<1x128xf32> -> vector<1x256xf32>
    %12 = arith.truncf %11 : vector<1x256xf32> to vector<1x256xbf16>
    %cst_11 = arith.constant dense<0.000000e+00> : vector<1x768xf32>
    %13 = tpu.matmul %12, %7, %cst_11 {dimension_numbers = #tpu.dot_dimension_numbers<[1], [0], [0], [1], [0, 0, 1, 1], [], []>} : vector<1x256xbf16>, vector<256x768xbf16>, vector<1x768xf32> -> vector<1x768xf32>
    %14 = arith.addf %13, %8 : vector<1x768xf32>
    %15 = vector.extract_strided_slice %6 {offsets = [0, 0], sizes = [1, 384], strides = [1, 1]} : vector<8x768xf32> to vector<1x384xf32>
    %16 = vector.extract_strided_slice %14 {offsets = [0, 0], sizes = [1, 384], strides = [1, 1]} : vector<1x768xf32> to vector<1x384xf32>
    %17 = vector.extract_strided_slice %15 {offsets = [0, 0], sizes = [1, 128], strides = [1, 1]} : vector<1x384xf32> to vector<1x128xf32>
    %18 = vector.extract_strided_slice %16 {offsets = [0, 0], sizes = [1, 128], strides = [1, 1]} : vector<1x384xf32> to vector<1x128xf32>
    %19 = arith.addf %17, %18 : vector<1x128xf32>
    %20 = arith.negf %19 : vector<1x128xf32>
    %21 = math.exp %20 : vector<1x128xf32>
    %cst_12 = arith.constant 1.000000e+00 : f32
    %22 = vector.broadcast %cst_12 : f32 to vector<1x128xf32>
    %23 = arith.addf %22, %21 : vector<1x128xf32>
    %24 = arith.divf %22, %23 : vector<1x128xf32>
    %25 = vector.extract_strided_slice %15 {offsets = [0, 128], sizes = [1, 128], strides = [1, 1]} : vector<1x384xf32> to vector<1x128xf32>
    %26 = vector.extract_strided_slice %16 {offsets = [0, 128], sizes = [1, 128], strides = [1, 1]} : vector<1x384xf32> to vector<1x128xf32>
    %27 = arith.addf %25, %26 : vector<1x128xf32>
    %28 = arith.negf %27 : vector<1x128xf32>
    %29 = math.exp %28 : vector<1x128xf32>
    %cst_13 = arith.constant 1.000000e+00 : f32
    %30 = vector.broadcast %cst_13 : f32 to vector<1x128xf32>
    %31 = arith.addf %30, %29 : vector<1x128xf32>
    %32 = arith.divf %30, %31 : vector<1x128xf32>
    %33 = vector.extract_strided_slice %15 {offsets = [0, 256], sizes = [1, 128], strides = [1, 1]} : vector<1x384xf32> to vector<1x128xf32>
    %34 = vector.extract_strided_slice %16 {offsets = [0, 256], sizes = [1, 128], strides = [1, 1]} : vector<1x384xf32> to vector<1x128xf32>
    %35 = arith.mulf %24, %34 : vector<1x128xf32>
    %36 = arith.addf %33, %35 : vector<1x128xf32>
    %37 = math.tanh %36 : vector<1x128xf32>
    %cst_14 = arith.constant 1.000000e+00 : f32
    %38 = vector.broadcast %cst_14 : f32 to vector<1x128xf32>
    %39 = arith.subf %38, %32 : vector<1x128xf32>
    %40 = arith.mulf %39, %37 : vector<1x128xf32>
    %41 = arith.mulf %32, %9 : vector<1x128xf32>
    %42 = arith.addf %40, %41 : vector<1x128xf32>
    %43 = vector.extract_strided_slice %6 {offsets = [7, 384], sizes = [1, 384], strides = [1, 1]} : vector<8x768xf32> to vector<1x384xf32>
    %44 = vector.extract_strided_slice %14 {offsets = [0, 384], sizes = [1, 384], strides = [1, 1]} : vector<1x768xf32> to vector<1x384xf32>
    %45 = vector.extract_strided_slice %43 {offsets = [0, 0], sizes = [1, 128], strides = [1, 1]} : vector<1x384xf32> to vector<1x128xf32>
    %46 = vector.extract_strided_slice %44 {offsets = [0, 0], sizes = [1, 128], strides = [1, 1]} : vector<1x384xf32> to vector<1x128xf32>
    %47 = arith.addf %45, %46 : vector<1x128xf32>
    %48 = arith.negf %47 : vector<1x128xf32>
    %49 = math.exp %48 : vector<1x128xf32>
    %cst_15 = arith.constant 1.000000e+00 : f32
    %50 = vector.broadcast %cst_15 : f32 to vector<1x128xf32>
    %51 = arith.addf %50, %49 : vector<1x128xf32>
    %52 = arith.divf %50, %51 : vector<1x128xf32>
    %53 = vector.extract_strided_slice %43 {offsets = [0, 128], sizes = [1, 128], strides = [1, 1]} : vector<1x384xf32> to vector<1x128xf32>
    %54 = vector.extract_strided_slice %44 {offsets = [0, 128], sizes = [1, 128], strides = [1, 1]} : vector<1x384xf32> to vector<1x128xf32>
    %55 = arith.addf %53, %54 : vector<1x128xf32>
    %56 = arith.negf %55 : vector<1x128xf32>
    %57 = math.exp %56 : vector<1x128xf32>
    %cst_16 = arith.constant 1.000000e+00 : f32
    %58 = vector.broadcast %cst_16 : f32 to vector<1x128xf32>
    %59 = arith.addf %58, %57 : vector<1x128xf32>
    %60 = arith.divf %58, %59 : vector<1x128xf32>
    %61 = vector.extract_strided_slice %43 {offsets = [0, 256], sizes = [1, 128], strides = [1, 1]} : vector<1x384xf32> to vector<1x128xf32>
    %62 = vector.extract_strided_slice %44 {offsets = [0, 256], sizes = [1, 128], strides = [1, 1]} : vector<1x384xf32> to vector<1x128xf32>
    %63 = arith.mulf %52, %62 : vector<1x128xf32>
    %64 = arith.addf %61, %63 : vector<1x128xf32>
    %65 = math.tanh %64 : vector<1x128xf32>
    %cst_17 = arith.constant 1.000000e+00 : f32
    %66 = vector.broadcast %cst_17 : f32 to vector<1x128xf32>
    %67 = arith.subf %66, %60 : vector<1x128xf32>
    %68 = arith.mulf %67, %65 : vector<1x128xf32>
    %69 = arith.mulf %60, %10 : vector<1x128xf32>
    %70 = arith.addf %68, %69 : vector<1x128xf32>
    %71 = tpu.concatenate %42, %70 in 1 : vector<1x128xf32>, vector<1x128xf32> -> vector<1x256xf32>
    %72 = arith.truncf %71 : vector<1x256xf32> to vector<1x256xbf16>
    %cst_18 = arith.constant dense<0.000000e+00> : vector<1x768xf32>
    %73 = tpu.matmul %72, %7, %cst_18 {dimension_numbers = #tpu.dot_dimension_numbers<[1], [0], [0], [1], [0, 0, 1, 1], [], []>} : vector<1x256xbf16>, vector<256x768xbf16>, vector<1x768xf32> -> vector<1x768xf32>
    %74 = arith.addf %73, %8 : vector<1x768xf32>
    %75 = vector.extract_strided_slice %6 {offsets = [1, 0], sizes = [1, 384], strides = [1, 1]} : vector<8x768xf32> to vector<1x384xf32>
    %76 = vector.extract_strided_slice %74 {offsets = [0, 0], sizes = [1, 384], strides = [1, 1]} : vector<1x768xf32> to vector<1x384xf32>
    %77 = vector.extract_strided_slice %75 {offsets = [0, 0], sizes = [1, 128], strides = [1, 1]} : vector<1x384xf32> to vector<1x128xf32>
    %78 = vector.extract_strided_slice %76 {offsets = [0, 0], sizes = [1, 128], strides = [1, 1]} : vector<1x384xf32> to vector<1x128xf32>
    %79 = arith.addf %77, %78 : vector<1x128xf32>
    %80 = arith.negf %79 : vector<1x128xf32>
    %81 = math.exp %80 : vector<1x128xf32>
    %cst_19 = arith.constant 1.000000e+00 : f32
    %82 = vector.broadcast %cst_19 : f32 to vector<1x128xf32>
    %83 = arith.addf %82, %81 : vector<1x128xf32>
    %84 = arith.divf %82, %83 : vector<1x128xf32>
    %85 = vector.extract_strided_slice %75 {offsets = [0, 128], sizes = [1, 128], strides = [1, 1]} : vector<1x384xf32> to vector<1x128xf32>
    %86 = vector.extract_strided_slice %76 {offsets = [0, 128], sizes = [1, 128], strides = [1, 1]} : vector<1x384xf32> to vector<1x128xf32>
    %87 = arith.addf %85, %86 : vector<1x128xf32>
    %88 = arith.negf %87 : vector<1x128xf32>
    %89 = math.exp %88 : vector<1x128xf32>
    %cst_20 = arith.constant 1.000000e+00 : f32
    %90 = vector.broadcast %cst_20 : f32 to vector<1x128xf32>
    %91 = arith.addf %90, %89 : vector<1x128xf32>
    %92 = arith.divf %90, %91 : vector<1x128xf32>
    %93 = vector.extract_strided_slice %75 {offsets = [0, 256], sizes = [1, 128], strides = [1, 1]} : vector<1x384xf32> to vector<1x128xf32>
    %94 = vector.extract_strided_slice %76 {offsets = [0, 256], sizes = [1, 128], strides = [1, 1]} : vector<1x384xf32> to vector<1x128xf32>
    %95 = arith.mulf %84, %94 : vector<1x128xf32>
    %96 = arith.addf %93, %95 : vector<1x128xf32>
    %97 = math.tanh %96 : vector<1x128xf32>
    %cst_21 = arith.constant 1.000000e+00 : f32
    %98 = vector.broadcast %cst_21 : f32 to vector<1x128xf32>
    %99 = arith.subf %98, %92 : vector<1x128xf32>
    %100 = arith.mulf %99, %97 : vector<1x128xf32>
    %101 = arith.mulf %92, %42 : vector<1x128xf32>
    %102 = arith.addf %100, %101 : vector<1x128xf32>
    %103 = vector.extract_strided_slice %6 {offsets = [6, 384], sizes = [1, 384], strides = [1, 1]} : vector<8x768xf32> to vector<1x384xf32>
    %104 = vector.extract_strided_slice %74 {offsets = [0, 384], sizes = [1, 384], strides = [1, 1]} : vector<1x768xf32> to vector<1x384xf32>
    %105 = vector.extract_strided_slice %103 {offsets = [0, 0], sizes = [1, 128], strides = [1, 1]} : vector<1x384xf32> to vector<1x128xf32>
    %106 = vector.extract_strided_slice %104 {offsets = [0, 0], sizes = [1, 128], strides = [1, 1]} : vector<1x384xf32> to vector<1x128xf32>
    %107 = arith.addf %105, %106 : vector<1x128xf32>
    %108 = arith.negf %107 : vector<1x128xf32>
    %109 = math.exp %108 : vector<1x128xf32>
    %cst_22 = arith.constant 1.000000e+00 : f32
    %110 = vector.broadcast %cst_22 : f32 to vector<1x128xf32>
    %111 = arith.addf %110, %109 : vector<1x128xf32>
    %112 = arith.divf %110, %111 : vector<1x128xf32>
    %113 = vector.extract_strided_slice %103 {offsets = [0, 128], sizes = [1, 128], strides = [1, 1]} : vector<1x384xf32> to vector<1x128xf32>
    %114 = vector.extract_strided_slice %104 {offsets = [0, 128], sizes = [1, 128], strides = [1, 1]} : vector<1x384xf32> to vector<1x128xf32>
    %115 = arith.addf %113, %114 : vector<1x128xf32>
    %116 = arith.negf %115 : vector<1x128xf32>
    %117 = math.exp %116 : vector<1x128xf32>
    %cst_23 = arith.constant 1.000000e+00 : f32
    %118 = vector.broadcast %cst_23 : f32 to vector<1x128xf32>
    %119 = arith.addf %118, %117 : vector<1x128xf32>
    %120 = arith.divf %118, %119 : vector<1x128xf32>
    %121 = vector.extract_strided_slice %103 {offsets = [0, 256], sizes = [1, 128], strides = [1, 1]} : vector<1x384xf32> to vector<1x128xf32>
    %122 = vector.extract_strided_slice %104 {offsets = [0, 256], sizes = [1, 128], strides = [1, 1]} : vector<1x384xf32> to vector<1x128xf32>
    %123 = arith.mulf %112, %122 : vector<1x128xf32>
    %124 = arith.addf %121, %123 : vector<1x128xf32>
    %125 = math.tanh %124 : vector<1x128xf32>
    %cst_24 = arith.constant 1.000000e+00 : f32
    %126 = vector.broadcast %cst_24 : f32 to vector<1x128xf32>
    %127 = arith.subf %126, %120 : vector<1x128xf32>
    %128 = arith.mulf %127, %125 : vector<1x128xf32>
    %129 = arith.mulf %120, %70 : vector<1x128xf32>
    %130 = arith.addf %128, %129 : vector<1x128xf32>
    %131 = tpu.concatenate %102, %130 in 1 : vector<1x128xf32>, vector<1x128xf32> -> vector<1x256xf32>
    %132 = arith.truncf %131 : vector<1x256xf32> to vector<1x256xbf16>
    %cst_25 = arith.constant dense<0.000000e+00> : vector<1x768xf32>
    %133 = tpu.matmul %132, %7, %cst_25 {dimension_numbers = #tpu.dot_dimension_numbers<[1], [0], [0], [1], [0, 0, 1, 1], [], []>} : vector<1x256xbf16>, vector<256x768xbf16>, vector<1x768xf32> -> vector<1x768xf32>
    %134 = arith.addf %133, %8 : vector<1x768xf32>
    %135 = vector.extract_strided_slice %6 {offsets = [2, 0], sizes = [1, 384], strides = [1, 1]} : vector<8x768xf32> to vector<1x384xf32>
    %136 = vector.extract_strided_slice %134 {offsets = [0, 0], sizes = [1, 384], strides = [1, 1]} : vector<1x768xf32> to vector<1x384xf32>
    %137 = vector.extract_strided_slice %135 {offsets = [0, 0], sizes = [1, 128], strides = [1, 1]} : vector<1x384xf32> to vector<1x128xf32>
    %138 = vector.extract_strided_slice %136 {offsets = [0, 0], sizes = [1, 128], strides = [1, 1]} : vector<1x384xf32> to vector<1x128xf32>
    %139 = arith.addf %137, %138 : vector<1x128xf32>
    %140 = arith.negf %139 : vector<1x128xf32>
    %141 = math.exp %140 : vector<1x128xf32>
    %cst_26 = arith.constant 1.000000e+00 : f32
    %142 = vector.broadcast %cst_26 : f32 to vector<1x128xf32>
    %143 = arith.addf %142, %141 : vector<1x128xf32>
    %144 = arith.divf %142, %143 : vector<1x128xf32>
    %145 = vector.extract_strided_slice %135 {offsets = [0, 128], sizes = [1, 128], strides = [1, 1]} : vector<1x384xf32> to vector<1x128xf32>
    %146 = vector.extract_strided_slice %136 {offsets = [0, 128], sizes = [1, 128], strides = [1, 1]} : vector<1x384xf32> to vector<1x128xf32>
    %147 = arith.addf %145, %146 : vector<1x128xf32>
    %148 = arith.negf %147 : vector<1x128xf32>
    %149 = math.exp %148 : vector<1x128xf32>
    %cst_27 = arith.constant 1.000000e+00 : f32
    %150 = vector.broadcast %cst_27 : f32 to vector<1x128xf32>
    %151 = arith.addf %150, %149 : vector<1x128xf32>
    %152 = arith.divf %150, %151 : vector<1x128xf32>
    %153 = vector.extract_strided_slice %135 {offsets = [0, 256], sizes = [1, 128], strides = [1, 1]} : vector<1x384xf32> to vector<1x128xf32>
    %154 = vector.extract_strided_slice %136 {offsets = [0, 256], sizes = [1, 128], strides = [1, 1]} : vector<1x384xf32> to vector<1x128xf32>
    %155 = arith.mulf %144, %154 : vector<1x128xf32>
    %156 = arith.addf %153, %155 : vector<1x128xf32>
    %157 = math.tanh %156 : vector<1x128xf32>
    %cst_28 = arith.constant 1.000000e+00 : f32
    %158 = vector.broadcast %cst_28 : f32 to vector<1x128xf32>
    %159 = arith.subf %158, %152 : vector<1x128xf32>
    %160 = arith.mulf %159, %157 : vector<1x128xf32>
    %161 = arith.mulf %152, %102 : vector<1x128xf32>
    %162 = arith.addf %160, %161 : vector<1x128xf32>
    %163 = vector.extract_strided_slice %6 {offsets = [5, 384], sizes = [1, 384], strides = [1, 1]} : vector<8x768xf32> to vector<1x384xf32>
    %164 = vector.extract_strided_slice %134 {offsets = [0, 384], sizes = [1, 384], strides = [1, 1]} : vector<1x768xf32> to vector<1x384xf32>
    %165 = vector.extract_strided_slice %163 {offsets = [0, 0], sizes = [1, 128], strides = [1, 1]} : vector<1x384xf32> to vector<1x128xf32>
    %166 = vector.extract_strided_slice %164 {offsets = [0, 0], sizes = [1, 128], strides = [1, 1]} : vector<1x384xf32> to vector<1x128xf32>
    %167 = arith.addf %165, %166 : vector<1x128xf32>
    %168 = arith.negf %167 : vector<1x128xf32>
    %169 = math.exp %168 : vector<1x128xf32>
    %cst_29 = arith.constant 1.000000e+00 : f32
    %170 = vector.broadcast %cst_29 : f32 to vector<1x128xf32>
    %171 = arith.addf %170, %169 : vector<1x128xf32>
    %172 = arith.divf %170, %171 : vector<1x128xf32>
    %173 = vector.extract_strided_slice %163 {offsets = [0, 128], sizes = [1, 128], strides = [1, 1]} : vector<1x384xf32> to vector<1x128xf32>
    %174 = vector.extract_strided_slice %164 {offsets = [0, 128], sizes = [1, 128], strides = [1, 1]} : vector<1x384xf32> to vector<1x128xf32>
    %175 = arith.addf %173, %174 : vector<1x128xf32>
    %176 = arith.negf %175 : vector<1x128xf32>
    %177 = math.exp %176 : vector<1x128xf32>
    %cst_30 = arith.constant 1.000000e+00 : f32
    %178 = vector.broadcast %cst_30 : f32 to vector<1x128xf32>
    %179 = arith.addf %178, %177 : vector<1x128xf32>
    %180 = arith.divf %178, %179 : vector<1x128xf32>
    %181 = vector.extract_strided_slice %163 {offsets = [0, 256], sizes = [1, 128], strides = [1, 1]} : vector<1x384xf32> to vector<1x128xf32>
    %182 = vector.extract_strided_slice %164 {offsets = [0, 256], sizes = [1, 128], strides = [1, 1]} : vector<1x384xf32> to vector<1x128xf32>
    %183 = arith.mulf %172, %182 : vector<1x128xf32>
    %184 = arith.addf %181, %183 : vector<1x128xf32>
    %185 = math.tanh %184 : vector<1x128xf32>
    %cst_31 = arith.constant 1.000000e+00 : f32
    %186 = vector.broadcast %cst_31 : f32 to vector<1x128xf32>
    %187 = arith.subf %186, %180 : vector<1x128xf32>
    %188 = arith.mulf %187, %185 : vector<1x128xf32>
    %189 = arith.mulf %180, %130 : vector<1x128xf32>
    %190 = arith.addf %188, %189 : vector<1x128xf32>
    %191 = tpu.concatenate %162, %190 in 1 : vector<1x128xf32>, vector<1x128xf32> -> vector<1x256xf32>
    %192 = arith.truncf %191 : vector<1x256xf32> to vector<1x256xbf16>
    %cst_32 = arith.constant dense<0.000000e+00> : vector<1x768xf32>
    %193 = tpu.matmul %192, %7, %cst_32 {dimension_numbers = #tpu.dot_dimension_numbers<[1], [0], [0], [1], [0, 0, 1, 1], [], []>} : vector<1x256xbf16>, vector<256x768xbf16>, vector<1x768xf32> -> vector<1x768xf32>
    %194 = arith.addf %193, %8 : vector<1x768xf32>
    %195 = vector.extract_strided_slice %6 {offsets = [3, 0], sizes = [1, 384], strides = [1, 1]} : vector<8x768xf32> to vector<1x384xf32>
    %196 = vector.extract_strided_slice %194 {offsets = [0, 0], sizes = [1, 384], strides = [1, 1]} : vector<1x768xf32> to vector<1x384xf32>
    %197 = vector.extract_strided_slice %195 {offsets = [0, 0], sizes = [1, 128], strides = [1, 1]} : vector<1x384xf32> to vector<1x128xf32>
    %198 = vector.extract_strided_slice %196 {offsets = [0, 0], sizes = [1, 128], strides = [1, 1]} : vector<1x384xf32> to vector<1x128xf32>
    %199 = arith.addf %197, %198 : vector<1x128xf32>
    %200 = arith.negf %199 : vector<1x128xf32>
    %201 = math.exp %200 : vector<1x128xf32>
    %cst_33 = arith.constant 1.000000e+00 : f32
    %202 = vector.broadcast %cst_33 : f32 to vector<1x128xf32>
    %203 = arith.addf %202, %201 : vector<1x128xf32>
    %204 = arith.divf %202, %203 : vector<1x128xf32>
    %205 = vector.extract_strided_slice %195 {offsets = [0, 128], sizes = [1, 128], strides = [1, 1]} : vector<1x384xf32> to vector<1x128xf32>
    %206 = vector.extract_strided_slice %196 {offsets = [0, 128], sizes = [1, 128], strides = [1, 1]} : vector<1x384xf32> to vector<1x128xf32>
    %207 = arith.addf %205, %206 : vector<1x128xf32>
    %208 = arith.negf %207 : vector<1x128xf32>
    %209 = math.exp %208 : vector<1x128xf32>
    %cst_34 = arith.constant 1.000000e+00 : f32
    %210 = vector.broadcast %cst_34 : f32 to vector<1x128xf32>
    %211 = arith.addf %210, %209 : vector<1x128xf32>
    %212 = arith.divf %210, %211 : vector<1x128xf32>
    %213 = vector.extract_strided_slice %195 {offsets = [0, 256], sizes = [1, 128], strides = [1, 1]} : vector<1x384xf32> to vector<1x128xf32>
    %214 = vector.extract_strided_slice %196 {offsets = [0, 256], sizes = [1, 128], strides = [1, 1]} : vector<1x384xf32> to vector<1x128xf32>
    %215 = arith.mulf %204, %214 : vector<1x128xf32>
    %216 = arith.addf %213, %215 : vector<1x128xf32>
    %217 = math.tanh %216 : vector<1x128xf32>
    %cst_35 = arith.constant 1.000000e+00 : f32
    %218 = vector.broadcast %cst_35 : f32 to vector<1x128xf32>
    %219 = arith.subf %218, %212 : vector<1x128xf32>
    %220 = arith.mulf %219, %217 : vector<1x128xf32>
    %221 = arith.mulf %212, %162 : vector<1x128xf32>
    %222 = arith.addf %220, %221 : vector<1x128xf32>
    %223 = vector.extract_strided_slice %6 {offsets = [4, 384], sizes = [1, 384], strides = [1, 1]} : vector<8x768xf32> to vector<1x384xf32>
    %224 = vector.extract_strided_slice %194 {offsets = [0, 384], sizes = [1, 384], strides = [1, 1]} : vector<1x768xf32> to vector<1x384xf32>
    %225 = vector.extract_strided_slice %223 {offsets = [0, 0], sizes = [1, 128], strides = [1, 1]} : vector<1x384xf32> to vector<1x128xf32>
    %226 = vector.extract_strided_slice %224 {offsets = [0, 0], sizes = [1, 128], strides = [1, 1]} : vector<1x384xf32> to vector<1x128xf32>
    %227 = arith.addf %225, %226 : vector<1x128xf32>
    %228 = arith.negf %227 : vector<1x128xf32>
    %229 = math.exp %228 : vector<1x128xf32>
    %cst_36 = arith.constant 1.000000e+00 : f32
    %230 = vector.broadcast %cst_36 : f32 to vector<1x128xf32>
    %231 = arith.addf %230, %229 : vector<1x128xf32>
    %232 = arith.divf %230, %231 : vector<1x128xf32>
    %233 = vector.extract_strided_slice %223 {offsets = [0, 128], sizes = [1, 128], strides = [1, 1]} : vector<1x384xf32> to vector<1x128xf32>
    %234 = vector.extract_strided_slice %224 {offsets = [0, 128], sizes = [1, 128], strides = [1, 1]} : vector<1x384xf32> to vector<1x128xf32>
    %235 = arith.addf %233, %234 : vector<1x128xf32>
    %236 = arith.negf %235 : vector<1x128xf32>
    %237 = math.exp %236 : vector<1x128xf32>
    %cst_37 = arith.constant 1.000000e+00 : f32
    %238 = vector.broadcast %cst_37 : f32 to vector<1x128xf32>
    %239 = arith.addf %238, %237 : vector<1x128xf32>
    %240 = arith.divf %238, %239 : vector<1x128xf32>
    %241 = vector.extract_strided_slice %223 {offsets = [0, 256], sizes = [1, 128], strides = [1, 1]} : vector<1x384xf32> to vector<1x128xf32>
    %242 = vector.extract_strided_slice %224 {offsets = [0, 256], sizes = [1, 128], strides = [1, 1]} : vector<1x384xf32> to vector<1x128xf32>
    %243 = arith.mulf %232, %242 : vector<1x128xf32>
    %244 = arith.addf %241, %243 : vector<1x128xf32>
    %245 = math.tanh %244 : vector<1x128xf32>
    %cst_38 = arith.constant 1.000000e+00 : f32
    %246 = vector.broadcast %cst_38 : f32 to vector<1x128xf32>
    %247 = arith.subf %246, %240 : vector<1x128xf32>
    %248 = arith.mulf %247, %245 : vector<1x128xf32>
    %249 = arith.mulf %240, %190 : vector<1x128xf32>
    %250 = arith.addf %248, %249 : vector<1x128xf32>
    %251 = tpu.concatenate %222, %250 in 1 : vector<1x128xf32>, vector<1x128xf32> -> vector<1x256xf32>
    %252 = arith.truncf %251 : vector<1x256xf32> to vector<1x256xbf16>
    %cst_39 = arith.constant dense<0.000000e+00> : vector<1x768xf32>
    %253 = tpu.matmul %252, %7, %cst_39 {dimension_numbers = #tpu.dot_dimension_numbers<[1], [0], [0], [1], [0, 0, 1, 1], [], []>} : vector<1x256xbf16>, vector<256x768xbf16>, vector<1x768xf32> -> vector<1x768xf32>
    %254 = arith.addf %253, %8 : vector<1x768xf32>
    %255 = vector.extract_strided_slice %6 {offsets = [4, 0], sizes = [1, 384], strides = [1, 1]} : vector<8x768xf32> to vector<1x384xf32>
    %256 = vector.extract_strided_slice %254 {offsets = [0, 0], sizes = [1, 384], strides = [1, 1]} : vector<1x768xf32> to vector<1x384xf32>
    %257 = vector.extract_strided_slice %255 {offsets = [0, 0], sizes = [1, 128], strides = [1, 1]} : vector<1x384xf32> to vector<1x128xf32>
    %258 = vector.extract_strided_slice %256 {offsets = [0, 0], sizes = [1, 128], strides = [1, 1]} : vector<1x384xf32> to vector<1x128xf32>
    %259 = arith.addf %257, %258 : vector<1x128xf32>
    %260 = arith.negf %259 : vector<1x128xf32>
    %261 = math.exp %260 : vector<1x128xf32>
    %cst_40 = arith.constant 1.000000e+00 : f32
    %262 = vector.broadcast %cst_40 : f32 to vector<1x128xf32>
    %263 = arith.addf %262, %261 : vector<1x128xf32>
    %264 = arith.divf %262, %263 : vector<1x128xf32>
    %265 = vector.extract_strided_slice %255 {offsets = [0, 128], sizes = [1, 128], strides = [1, 1]} : vector<1x384xf32> to vector<1x128xf32>
    %266 = vector.extract_strided_slice %256 {offsets = [0, 128], sizes = [1, 128], strides = [1, 1]} : vector<1x384xf32> to vector<1x128xf32>
    %267 = arith.addf %265, %266 : vector<1x128xf32>
    %268 = arith.negf %267 : vector<1x128xf32>
    %269 = math.exp %268 : vector<1x128xf32>
    %cst_41 = arith.constant 1.000000e+00 : f32
    %270 = vector.broadcast %cst_41 : f32 to vector<1x128xf32>
    %271 = arith.addf %270, %269 : vector<1x128xf32>
    %272 = arith.divf %270, %271 : vector<1x128xf32>
    %273 = vector.extract_strided_slice %255 {offsets = [0, 256], sizes = [1, 128], strides = [1, 1]} : vector<1x384xf32> to vector<1x128xf32>
    %274 = vector.extract_strided_slice %256 {offsets = [0, 256], sizes = [1, 128], strides = [1, 1]} : vector<1x384xf32> to vector<1x128xf32>
    %275 = arith.mulf %264, %274 : vector<1x128xf32>
    %276 = arith.addf %273, %275 : vector<1x128xf32>
    %277 = math.tanh %276 : vector<1x128xf32>
    %cst_42 = arith.constant 1.000000e+00 : f32
    %278 = vector.broadcast %cst_42 : f32 to vector<1x128xf32>
    %279 = arith.subf %278, %272 : vector<1x128xf32>
    %280 = arith.mulf %279, %277 : vector<1x128xf32>
    %281 = arith.mulf %272, %222 : vector<1x128xf32>
    %282 = arith.addf %280, %281 : vector<1x128xf32>
    %283 = vector.extract_strided_slice %6 {offsets = [3, 384], sizes = [1, 384], strides = [1, 1]} : vector<8x768xf32> to vector<1x384xf32>
    %284 = vector.extract_strided_slice %254 {offsets = [0, 384], sizes = [1, 384], strides = [1, 1]} : vector<1x768xf32> to vector<1x384xf32>
    %285 = vector.extract_strided_slice %283 {offsets = [0, 0], sizes = [1, 128], strides = [1, 1]} : vector<1x384xf32> to vector<1x128xf32>
    %286 = vector.extract_strided_slice %284 {offsets = [0, 0], sizes = [1, 128], strides = [1, 1]} : vector<1x384xf32> to vector<1x128xf32>
    %287 = arith.addf %285, %286 : vector<1x128xf32>
    %288 = arith.negf %287 : vector<1x128xf32>
    %289 = math.exp %288 : vector<1x128xf32>
    %cst_43 = arith.constant 1.000000e+00 : f32
    %290 = vector.broadcast %cst_43 : f32 to vector<1x128xf32>
    %291 = arith.addf %290, %289 : vector<1x128xf32>
    %292 = arith.divf %290, %291 : vector<1x128xf32>
    %293 = vector.extract_strided_slice %283 {offsets = [0, 128], sizes = [1, 128], strides = [1, 1]} : vector<1x384xf32> to vector<1x128xf32>
    %294 = vector.extract_strided_slice %284 {offsets = [0, 128], sizes = [1, 128], strides = [1, 1]} : vector<1x384xf32> to vector<1x128xf32>
    %295 = arith.addf %293, %294 : vector<1x128xf32>
    %296 = arith.negf %295 : vector<1x128xf32>
    %297 = math.exp %296 : vector<1x128xf32>
    %cst_44 = arith.constant 1.000000e+00 : f32
    %298 = vector.broadcast %cst_44 : f32 to vector<1x128xf32>
    %299 = arith.addf %298, %297 : vector<1x128xf32>
    %300 = arith.divf %298, %299 : vector<1x128xf32>
    %301 = vector.extract_strided_slice %283 {offsets = [0, 256], sizes = [1, 128], strides = [1, 1]} : vector<1x384xf32> to vector<1x128xf32>
    %302 = vector.extract_strided_slice %284 {offsets = [0, 256], sizes = [1, 128], strides = [1, 1]} : vector<1x384xf32> to vector<1x128xf32>
    %303 = arith.mulf %292, %302 : vector<1x128xf32>
    %304 = arith.addf %301, %303 : vector<1x128xf32>
    %305 = math.tanh %304 : vector<1x128xf32>
    %cst_45 = arith.constant 1.000000e+00 : f32
    %306 = vector.broadcast %cst_45 : f32 to vector<1x128xf32>
    %307 = arith.subf %306, %300 : vector<1x128xf32>
    %308 = arith.mulf %307, %305 : vector<1x128xf32>
    %309 = arith.mulf %300, %250 : vector<1x128xf32>
    %310 = arith.addf %308, %309 : vector<1x128xf32>
    %311 = tpu.concatenate %282, %310 in 1 : vector<1x128xf32>, vector<1x128xf32> -> vector<1x256xf32>
    %312 = arith.truncf %311 : vector<1x256xf32> to vector<1x256xbf16>
    %cst_46 = arith.constant dense<0.000000e+00> : vector<1x768xf32>
    %313 = tpu.matmul %312, %7, %cst_46 {dimension_numbers = #tpu.dot_dimension_numbers<[1], [0], [0], [1], [0, 0, 1, 1], [], []>} : vector<1x256xbf16>, vector<256x768xbf16>, vector<1x768xf32> -> vector<1x768xf32>
    %314 = arith.addf %313, %8 : vector<1x768xf32>
    %315 = vector.extract_strided_slice %6 {offsets = [5, 0], sizes = [1, 384], strides = [1, 1]} : vector<8x768xf32> to vector<1x384xf32>
    %316 = vector.extract_strided_slice %314 {offsets = [0, 0], sizes = [1, 384], strides = [1, 1]} : vector<1x768xf32> to vector<1x384xf32>
    %317 = vector.extract_strided_slice %315 {offsets = [0, 0], sizes = [1, 128], strides = [1, 1]} : vector<1x384xf32> to vector<1x128xf32>
    %318 = vector.extract_strided_slice %316 {offsets = [0, 0], sizes = [1, 128], strides = [1, 1]} : vector<1x384xf32> to vector<1x128xf32>
    %319 = arith.addf %317, %318 : vector<1x128xf32>
    %320 = arith.negf %319 : vector<1x128xf32>
    %321 = math.exp %320 : vector<1x128xf32>
    %cst_47 = arith.constant 1.000000e+00 : f32
    %322 = vector.broadcast %cst_47 : f32 to vector<1x128xf32>
    %323 = arith.addf %322, %321 : vector<1x128xf32>
    %324 = arith.divf %322, %323 : vector<1x128xf32>
    %325 = vector.extract_strided_slice %315 {offsets = [0, 128], sizes = [1, 128], strides = [1, 1]} : vector<1x384xf32> to vector<1x128xf32>
    %326 = vector.extract_strided_slice %316 {offsets = [0, 128], sizes = [1, 128], strides = [1, 1]} : vector<1x384xf32> to vector<1x128xf32>
    %327 = arith.addf %325, %326 : vector<1x128xf32>
    %328 = arith.negf %327 : vector<1x128xf32>
    %329 = math.exp %328 : vector<1x128xf32>
    %cst_48 = arith.constant 1.000000e+00 : f32
    %330 = vector.broadcast %cst_48 : f32 to vector<1x128xf32>
    %331 = arith.addf %330, %329 : vector<1x128xf32>
    %332 = arith.divf %330, %331 : vector<1x128xf32>
    %333 = vector.extract_strided_slice %315 {offsets = [0, 256], sizes = [1, 128], strides = [1, 1]} : vector<1x384xf32> to vector<1x128xf32>
    %334 = vector.extract_strided_slice %316 {offsets = [0, 256], sizes = [1, 128], strides = [1, 1]} : vector<1x384xf32> to vector<1x128xf32>
    %335 = arith.mulf %324, %334 : vector<1x128xf32>
    %336 = arith.addf %333, %335 : vector<1x128xf32>
    %337 = math.tanh %336 : vector<1x128xf32>
    %cst_49 = arith.constant 1.000000e+00 : f32
    %338 = vector.broadcast %cst_49 : f32 to vector<1x128xf32>
    %339 = arith.subf %338, %332 : vector<1x128xf32>
    %340 = arith.mulf %339, %337 : vector<1x128xf32>
    %341 = arith.mulf %332, %282 : vector<1x128xf32>
    %342 = arith.addf %340, %341 : vector<1x128xf32>
    %343 = vector.extract_strided_slice %6 {offsets = [2, 384], sizes = [1, 384], strides = [1, 1]} : vector<8x768xf32> to vector<1x384xf32>
    %344 = vector.extract_strided_slice %314 {offsets = [0, 384], sizes = [1, 384], strides = [1, 1]} : vector<1x768xf32> to vector<1x384xf32>
    %345 = vector.extract_strided_slice %343 {offsets = [0, 0], sizes = [1, 128], strides = [1, 1]} : vector<1x384xf32> to vector<1x128xf32>
    %346 = vector.extract_strided_slice %344 {offsets = [0, 0], sizes = [1, 128], strides = [1, 1]} : vector<1x384xf32> to vector<1x128xf32>
    %347 = arith.addf %345, %346 : vector<1x128xf32>
    %348 = arith.negf %347 : vector<1x128xf32>
    %349 = math.exp %348 : vector<1x128xf32>
    %cst_50 = arith.constant 1.000000e+00 : f32
    %350 = vector.broadcast %cst_50 : f32 to vector<1x128xf32>
    %351 = arith.addf %350, %349 : vector<1x128xf32>
    %352 = arith.divf %350, %351 : vector<1x128xf32>
    %353 = vector.extract_strided_slice %343 {offsets = [0, 128], sizes = [1, 128], strides = [1, 1]} : vector<1x384xf32> to vector<1x128xf32>
    %354 = vector.extract_strided_slice %344 {offsets = [0, 128], sizes = [1, 128], strides = [1, 1]} : vector<1x384xf32> to vector<1x128xf32>
    %355 = arith.addf %353, %354 : vector<1x128xf32>
    %356 = arith.negf %355 : vector<1x128xf32>
    %357 = math.exp %356 : vector<1x128xf32>
    %cst_51 = arith.constant 1.000000e+00 : f32
    %358 = vector.broadcast %cst_51 : f32 to vector<1x128xf32>
    %359 = arith.addf %358, %357 : vector<1x128xf32>
    %360 = arith.divf %358, %359 : vector<1x128xf32>
    %361 = vector.extract_strided_slice %343 {offsets = [0, 256], sizes = [1, 128], strides = [1, 1]} : vector<1x384xf32> to vector<1x128xf32>
    %362 = vector.extract_strided_slice %344 {offsets = [0, 256], sizes = [1, 128], strides = [1, 1]} : vector<1x384xf32> to vector<1x128xf32>
    %363 = arith.mulf %352, %362 : vector<1x128xf32>
    %364 = arith.addf %361, %363 : vector<1x128xf32>
    %365 = math.tanh %364 : vector<1x128xf32>
    %cst_52 = arith.constant 1.000000e+00 : f32
    %366 = vector.broadcast %cst_52 : f32 to vector<1x128xf32>
    %367 = arith.subf %366, %360 : vector<1x128xf32>
    %368 = arith.mulf %367, %365 : vector<1x128xf32>
    %369 = arith.mulf %360, %310 : vector<1x128xf32>
    %370 = arith.addf %368, %369 : vector<1x128xf32>
    %371 = tpu.concatenate %342, %370 in 1 : vector<1x128xf32>, vector<1x128xf32> -> vector<1x256xf32>
    %372 = arith.truncf %371 : vector<1x256xf32> to vector<1x256xbf16>
    %cst_53 = arith.constant dense<0.000000e+00> : vector<1x768xf32>
    %373 = tpu.matmul %372, %7, %cst_53 {dimension_numbers = #tpu.dot_dimension_numbers<[1], [0], [0], [1], [0, 0, 1, 1], [], []>} : vector<1x256xbf16>, vector<256x768xbf16>, vector<1x768xf32> -> vector<1x768xf32>
    %374 = arith.addf %373, %8 : vector<1x768xf32>
    %375 = vector.extract_strided_slice %6 {offsets = [6, 0], sizes = [1, 384], strides = [1, 1]} : vector<8x768xf32> to vector<1x384xf32>
    %376 = vector.extract_strided_slice %374 {offsets = [0, 0], sizes = [1, 384], strides = [1, 1]} : vector<1x768xf32> to vector<1x384xf32>
    %377 = vector.extract_strided_slice %375 {offsets = [0, 0], sizes = [1, 128], strides = [1, 1]} : vector<1x384xf32> to vector<1x128xf32>
    %378 = vector.extract_strided_slice %376 {offsets = [0, 0], sizes = [1, 128], strides = [1, 1]} : vector<1x384xf32> to vector<1x128xf32>
    %379 = arith.addf %377, %378 : vector<1x128xf32>
    %380 = arith.negf %379 : vector<1x128xf32>
    %381 = math.exp %380 : vector<1x128xf32>
    %cst_54 = arith.constant 1.000000e+00 : f32
    %382 = vector.broadcast %cst_54 : f32 to vector<1x128xf32>
    %383 = arith.addf %382, %381 : vector<1x128xf32>
    %384 = arith.divf %382, %383 : vector<1x128xf32>
    %385 = vector.extract_strided_slice %375 {offsets = [0, 128], sizes = [1, 128], strides = [1, 1]} : vector<1x384xf32> to vector<1x128xf32>
    %386 = vector.extract_strided_slice %376 {offsets = [0, 128], sizes = [1, 128], strides = [1, 1]} : vector<1x384xf32> to vector<1x128xf32>
    %387 = arith.addf %385, %386 : vector<1x128xf32>
    %388 = arith.negf %387 : vector<1x128xf32>
    %389 = math.exp %388 : vector<1x128xf32>
    %cst_55 = arith.constant 1.000000e+00 : f32
    %390 = vector.broadcast %cst_55 : f32 to vector<1x128xf32>
    %391 = arith.addf %390, %389 : vector<1x128xf32>
    %392 = arith.divf %390, %391 : vector<1x128xf32>
    %393 = vector.extract_strided_slice %375 {offsets = [0, 256], sizes = [1, 128], strides = [1, 1]} : vector<1x384xf32> to vector<1x128xf32>
    %394 = vector.extract_strided_slice %376 {offsets = [0, 256], sizes = [1, 128], strides = [1, 1]} : vector<1x384xf32> to vector<1x128xf32>
    %395 = arith.mulf %384, %394 : vector<1x128xf32>
    %396 = arith.addf %393, %395 : vector<1x128xf32>
    %397 = math.tanh %396 : vector<1x128xf32>
    %cst_56 = arith.constant 1.000000e+00 : f32
    %398 = vector.broadcast %cst_56 : f32 to vector<1x128xf32>
    %399 = arith.subf %398, %392 : vector<1x128xf32>
    %400 = arith.mulf %399, %397 : vector<1x128xf32>
    %401 = arith.mulf %392, %342 : vector<1x128xf32>
    %402 = arith.addf %400, %401 : vector<1x128xf32>
    %403 = vector.extract_strided_slice %6 {offsets = [1, 384], sizes = [1, 384], strides = [1, 1]} : vector<8x768xf32> to vector<1x384xf32>
    %404 = vector.extract_strided_slice %374 {offsets = [0, 384], sizes = [1, 384], strides = [1, 1]} : vector<1x768xf32> to vector<1x384xf32>
    %405 = vector.extract_strided_slice %403 {offsets = [0, 0], sizes = [1, 128], strides = [1, 1]} : vector<1x384xf32> to vector<1x128xf32>
    %406 = vector.extract_strided_slice %404 {offsets = [0, 0], sizes = [1, 128], strides = [1, 1]} : vector<1x384xf32> to vector<1x128xf32>
    %407 = arith.addf %405, %406 : vector<1x128xf32>
    %408 = arith.negf %407 : vector<1x128xf32>
    %409 = math.exp %408 : vector<1x128xf32>
    %cst_57 = arith.constant 1.000000e+00 : f32
    %410 = vector.broadcast %cst_57 : f32 to vector<1x128xf32>
    %411 = arith.addf %410, %409 : vector<1x128xf32>
    %412 = arith.divf %410, %411 : vector<1x128xf32>
    %413 = vector.extract_strided_slice %403 {offsets = [0, 128], sizes = [1, 128], strides = [1, 1]} : vector<1x384xf32> to vector<1x128xf32>
    %414 = vector.extract_strided_slice %404 {offsets = [0, 128], sizes = [1, 128], strides = [1, 1]} : vector<1x384xf32> to vector<1x128xf32>
    %415 = arith.addf %413, %414 : vector<1x128xf32>
    %416 = arith.negf %415 : vector<1x128xf32>
    %417 = math.exp %416 : vector<1x128xf32>
    %cst_58 = arith.constant 1.000000e+00 : f32
    %418 = vector.broadcast %cst_58 : f32 to vector<1x128xf32>
    %419 = arith.addf %418, %417 : vector<1x128xf32>
    %420 = arith.divf %418, %419 : vector<1x128xf32>
    %421 = vector.extract_strided_slice %403 {offsets = [0, 256], sizes = [1, 128], strides = [1, 1]} : vector<1x384xf32> to vector<1x128xf32>
    %422 = vector.extract_strided_slice %404 {offsets = [0, 256], sizes = [1, 128], strides = [1, 1]} : vector<1x384xf32> to vector<1x128xf32>
    %423 = arith.mulf %412, %422 : vector<1x128xf32>
    %424 = arith.addf %421, %423 : vector<1x128xf32>
    %425 = math.tanh %424 : vector<1x128xf32>
    %cst_59 = arith.constant 1.000000e+00 : f32
    %426 = vector.broadcast %cst_59 : f32 to vector<1x128xf32>
    %427 = arith.subf %426, %420 : vector<1x128xf32>
    %428 = arith.mulf %427, %425 : vector<1x128xf32>
    %429 = arith.mulf %420, %370 : vector<1x128xf32>
    %430 = arith.addf %428, %429 : vector<1x128xf32>
    %431 = tpu.concatenate %402, %430 in 1 : vector<1x128xf32>, vector<1x128xf32> -> vector<1x256xf32>
    %432 = arith.truncf %431 : vector<1x256xf32> to vector<1x256xbf16>
    %cst_60 = arith.constant dense<0.000000e+00> : vector<1x768xf32>
    %433 = tpu.matmul %432, %7, %cst_60 {dimension_numbers = #tpu.dot_dimension_numbers<[1], [0], [0], [1], [0, 0, 1, 1], [], []>} : vector<1x256xbf16>, vector<256x768xbf16>, vector<1x768xf32> -> vector<1x768xf32>
    %434 = arith.addf %433, %8 : vector<1x768xf32>
    %435 = vector.extract_strided_slice %6 {offsets = [7, 0], sizes = [1, 384], strides = [1, 1]} : vector<8x768xf32> to vector<1x384xf32>
    %436 = vector.extract_strided_slice %434 {offsets = [0, 0], sizes = [1, 384], strides = [1, 1]} : vector<1x768xf32> to vector<1x384xf32>
    %437 = vector.extract_strided_slice %435 {offsets = [0, 0], sizes = [1, 128], strides = [1, 1]} : vector<1x384xf32> to vector<1x128xf32>
    %438 = vector.extract_strided_slice %436 {offsets = [0, 0], sizes = [1, 128], strides = [1, 1]} : vector<1x384xf32> to vector<1x128xf32>
    %439 = arith.addf %437, %438 : vector<1x128xf32>
    %440 = arith.negf %439 : vector<1x128xf32>
    %441 = math.exp %440 : vector<1x128xf32>
    %cst_61 = arith.constant 1.000000e+00 : f32
    %442 = vector.broadcast %cst_61 : f32 to vector<1x128xf32>
    %443 = arith.addf %442, %441 : vector<1x128xf32>
    %444 = arith.divf %442, %443 : vector<1x128xf32>
    %445 = vector.extract_strided_slice %435 {offsets = [0, 128], sizes = [1, 128], strides = [1, 1]} : vector<1x384xf32> to vector<1x128xf32>
    %446 = vector.extract_strided_slice %436 {offsets = [0, 128], sizes = [1, 128], strides = [1, 1]} : vector<1x384xf32> to vector<1x128xf32>
    %447 = arith.addf %445, %446 : vector<1x128xf32>
    %448 = arith.negf %447 : vector<1x128xf32>
    %449 = math.exp %448 : vector<1x128xf32>
    %cst_62 = arith.constant 1.000000e+00 : f32
    %450 = vector.broadcast %cst_62 : f32 to vector<1x128xf32>
    %451 = arith.addf %450, %449 : vector<1x128xf32>
    %452 = arith.divf %450, %451 : vector<1x128xf32>
    %453 = vector.extract_strided_slice %435 {offsets = [0, 256], sizes = [1, 128], strides = [1, 1]} : vector<1x384xf32> to vector<1x128xf32>
    %454 = vector.extract_strided_slice %436 {offsets = [0, 256], sizes = [1, 128], strides = [1, 1]} : vector<1x384xf32> to vector<1x128xf32>
    %455 = arith.mulf %444, %454 : vector<1x128xf32>
    %456 = arith.addf %453, %455 : vector<1x128xf32>
    %457 = math.tanh %456 : vector<1x128xf32>
    %cst_63 = arith.constant 1.000000e+00 : f32
    %458 = vector.broadcast %cst_63 : f32 to vector<1x128xf32>
    %459 = arith.subf %458, %452 : vector<1x128xf32>
    %460 = arith.mulf %459, %457 : vector<1x128xf32>
    %461 = arith.mulf %452, %402 : vector<1x128xf32>
    %462 = arith.addf %460, %461 : vector<1x128xf32>
    %463 = vector.extract_strided_slice %6 {offsets = [0, 384], sizes = [1, 384], strides = [1, 1]} : vector<8x768xf32> to vector<1x384xf32>
    %464 = vector.extract_strided_slice %434 {offsets = [0, 384], sizes = [1, 384], strides = [1, 1]} : vector<1x768xf32> to vector<1x384xf32>
    %465 = vector.extract_strided_slice %463 {offsets = [0, 0], sizes = [1, 128], strides = [1, 1]} : vector<1x384xf32> to vector<1x128xf32>
    %466 = vector.extract_strided_slice %464 {offsets = [0, 0], sizes = [1, 128], strides = [1, 1]} : vector<1x384xf32> to vector<1x128xf32>
    %467 = arith.addf %465, %466 : vector<1x128xf32>
    %468 = arith.negf %467 : vector<1x128xf32>
    %469 = math.exp %468 : vector<1x128xf32>
    %cst_64 = arith.constant 1.000000e+00 : f32
    %470 = vector.broadcast %cst_64 : f32 to vector<1x128xf32>
    %471 = arith.addf %470, %469 : vector<1x128xf32>
    %472 = arith.divf %470, %471 : vector<1x128xf32>
    %473 = vector.extract_strided_slice %463 {offsets = [0, 128], sizes = [1, 128], strides = [1, 1]} : vector<1x384xf32> to vector<1x128xf32>
    %474 = vector.extract_strided_slice %464 {offsets = [0, 128], sizes = [1, 128], strides = [1, 1]} : vector<1x384xf32> to vector<1x128xf32>
    %475 = arith.addf %473, %474 : vector<1x128xf32>
    %476 = arith.negf %475 : vector<1x128xf32>
    %477 = math.exp %476 : vector<1x128xf32>
    %cst_65 = arith.constant 1.000000e+00 : f32
    %478 = vector.broadcast %cst_65 : f32 to vector<1x128xf32>
    %479 = arith.addf %478, %477 : vector<1x128xf32>
    %480 = arith.divf %478, %479 : vector<1x128xf32>
    %481 = vector.extract_strided_slice %463 {offsets = [0, 256], sizes = [1, 128], strides = [1, 1]} : vector<1x384xf32> to vector<1x128xf32>
    %482 = vector.extract_strided_slice %464 {offsets = [0, 256], sizes = [1, 128], strides = [1, 1]} : vector<1x384xf32> to vector<1x128xf32>
    %483 = arith.mulf %472, %482 : vector<1x128xf32>
    %484 = arith.addf %481, %483 : vector<1x128xf32>
    %485 = math.tanh %484 : vector<1x128xf32>
    %cst_66 = arith.constant 1.000000e+00 : f32
    %486 = vector.broadcast %cst_66 : f32 to vector<1x128xf32>
    %487 = arith.subf %486, %480 : vector<1x128xf32>
    %488 = arith.mulf %487, %485 : vector<1x128xf32>
    %489 = arith.mulf %480, %430 : vector<1x128xf32>
    %490 = arith.addf %488, %489 : vector<1x128xf32>
    %491 = tpu.concatenate %42, %102, %162, %222, %282, %342, %402, %462 in 0 : vector<1x128xf32>, vector<1x128xf32>, vector<1x128xf32>, vector<1x128xf32>, vector<1x128xf32>, vector<1x128xf32>, vector<1x128xf32>, vector<1x128xf32> -> vector<8x128xf32>
    %492 = tpu.concatenate %490, %430, %370, %310, %250, %190, %130, %70 in 0 : vector<1x128xf32>, vector<1x128xf32>, vector<1x128xf32>, vector<1x128xf32>, vector<1x128xf32>, vector<1x128xf32>, vector<1x128xf32>, vector<1x128xf32> -> vector<8x128xf32>
    %493 = tpu.concatenate %491, %492 in 1 : vector<8x128xf32>, vector<8x128xf32> -> vector<8x256xf32>
    %494 = arith.truncf %493 : vector<8x256xf32> to vector<8x256xbf16>
    %c0_67 = arith.constant 0 : index
    %c0_68 = arith.constant 0 : index
    %495 = vector.load %arg5[%c0_67, %c0_68] : memref<256x128xbf16, #tpu.memory_space<vmem>>, vector<256x128xbf16>
    %cst_69 = arith.constant dense<0.000000e+00> : vector<8x128xf32>
    %496 = tpu.matmul %494, %495, %cst_69 {dimension_numbers = #tpu.dot_dimension_numbers<[1], [0], [0], [1], [0, 0, 1, 1], [], []>} : vector<8x256xbf16>, vector<256x128xbf16>, vector<8x128xf32> -> vector<8x128xf32>
    %c0_70 = arith.constant 0 : index
    %c0_71 = arith.constant 0 : index
    %497 = vector.load %arg6[%c0_70, %c0_71] : memref<1x128xf32, #tpu.memory_space<vmem>>, vector<1x128xf32>
    %498 = vector.broadcast %497 : vector<1x128xf32> to vector<8x128xf32>
    %499 = arith.addf %496, %498 : vector<8x128xf32>
    %c0_72 = arith.constant 0 : index
    %c0_73 = arith.constant 0 : index
    %500 = vector.load %arg7[%c0_72, %c0_73] : memref<8x128xf32, #tpu.memory_space<vmem>>, vector<8x128xf32>
    tpu.vector_store %arg7[%c0_72, %c0_73], %499 {strides = array<i32>} : memref<8x128xf32, #tpu.memory_space<vmem>>, vector<8x128xf32>,
    return
  }
}

</mosaic_0001>

<bundles_post_ra>
// kernel: tpu_custom_call.1
= control target key start
LH: loop header
LB: loop body
LE: loop exit
PB: predicated region body
PF: predicated region fallthrough
CT: control target
= control target key end

     0   :  { %12 = vsyncpa [#allocation3], 0  ;;  %s5298_s0 = inlined_call_operand.hbm [shape: f32[8,32], index: 0, kind: input, shape index: {}]   ;;  %s5299_s1 = inlined_call_operand.hbm [shape: bf16[32,768], index: 1, kind: input, shape index: {}]   ;;  %s5300_s2 = inlined_call_operand.hbm [shape: bf16[256,768], index: 2, kind: input, shape index: {}]   ;;  %s5301_s3 = inlined_call_operand.vmem [shape: f32[1,768], index: 3, kind: input, shape index: {}]   ;;  %s5302_s4 = inlined_call_operand.vmem [shape: f32[1,768], index: 4, kind: input, shape index: {}]   ;;  %s5303_s5 = inlined_call_operand.hbm [shape: bf16[256,128], index: 5, kind: input, shape index: {}]   ;;  %s5304_s6 = inlined_call_operand.vmem [shape: f32[1,128], index: 6, kind: input, shape index: {}]   ;;  %s5305_s7 = inlined_call_operand.hbm [shape: f32[8,128], index: 7, kind: output, shape index: {}]  }
   0x1   :  { %13 = vsyncpa [#allocation6], 0 }
   0x2   :  { %14 = vsyncpa [#allocation9], 0 }
   0x3   :  { %15 = vsyncpa [#allocation4], 0  ;;  %s3540_s24 = smov [#allocation5]   ;;  %s3422_s28 = scalar_lea.hbm %s5299_s1, 1536 }
   0x4   :  { %s31_s25 = sshll.u32 %s3540_s24, 4  ;;  %p3423_p0 = scmp.ne.s32.totalorder %s5299_s1, %s3422_s28  ;;  %s32_s25 = int_to_ptr.vmem [resolvable:$true] %s31_s25 }
   0x5   :  { %p3426_p1 = scmp.lt.u32.totalorder %s3422_s28, %s5299_s1 }
   0x7   :  { %p3428_p2 = pnand %p3426_p1, %p3423_p0 }
   0x9   :  { %3431 = shalt.err (!%p3428_p2)
}
   0xa   :  { %s3432_s10 = scalar_lea.vmem %s32_s25, 1536  ;;  %p3437_p4 = scmp.lt.s32.totalorder %s32_s25, %s32_s25 }
   0xb   :  { %p3433_p3 = scmp.ne.s32.totalorder %s32_s25, %s3432_s10  ;;  %p3438_p5 = scmp.lt.s32.totalorder %s3432_s10, %s3432_s10 }
   0xd   :  { %p3439_p6 = por %p3438_p5, %p3437_p4 }
   0xf   :  { %p3440_p7 = pnand %p3439_p6, %p3433_p3 }
  0x11   :  { %3443 = shalt.err (!%p3440_p7)
}
  0x12   :  { %s3541_s11 = smov 384   ;;  %s3542_s12 = smov 24  }
  0x13   :  { %37 = dma.hbm_to_vmem [thread:$0]  %s5299_s1, 1536, %s32_s25, [#allocation6], %s3541_s11, %s3541_s11, %s3542_s12  }
  0x14   :  { %s3543_s15 = smov [#allocation2]   ;;  %s3544_s17 = smov [#allocation7]  }
  0x15   :  { %s22_s16 = sshll.u32 %s3543_s15, 4  ;;  %s43_s18 = sshll.u32 %s3544_s17, 4  ;;  %s23_s16 = int_to_ptr.vmem [resolvable:$true] %s22_s16  ;;  %s44_s18 = int_to_ptr.vmem [resolvable:$true] %s43_s18 }
  0x16   :  { %s3444_s21 = scalar_lea.hbm %s5298_s0, 128 }
  0x17   :  { %p3445_p8 = scmp.ne.s32.totalorder %s5298_s0, %s3444_s21  ;;  %p3448_p9 = scmp.lt.u32.totalorder %s3444_s21, %s5298_s0 }
  0x19   :  { %p3450_p10 = pnand %p3448_p9, %p3445_p8 }
  0x1b   :  { %3453 = shalt.err (!%p3450_p10)
}
  0x1c   :  { %s3454_s1 = scalar_lea.vmem %s23_s16, 128  ;;  %p3459_p12 = scmp.lt.s32.totalorder %s23_s16, %s23_s16 }
  0x1d   :  { %p3455_p11 = scmp.ne.s32.totalorder %s23_s16, %s3454_s1  ;;  %p3460_p13 = scmp.lt.s32.totalorder %s3454_s1, %s3454_s1 }
  0x1f   :  { %p3461_p0 = por %p3460_p13, %p3459_p12 }
  0x21   :  { %p3462_p1 = pnand %p3461_p0, %p3455_p11 }
  0x23   :  { %3465 = shalt.err (!%p3462_p1)
}
  0x24   :  { %25 = dma.hbm_to_vmem [thread:$0]  %s5298_s0, 128, %s23_s16, [#allocation3]  }
  0x25   :  { %s3466_s30 = scalar_lea.hbm %s5300_s2, 12288 }
  0x26   :  { %p3467_p2 = scmp.ne.s32.totalorder %s5300_s2, %s3466_s30  ;;  %p3470_p3 = scmp.lt.u32.totalorder %s3466_s30, %s5300_s2 }
  0x28   :  { %p3472_p4 = pnand %p3470_p3, %p3467_p2 }
  0x2a   :  { %3475 = shalt.err (!%p3472_p4)
}
  0x2b   :  { %s3476_s14 = scalar_lea.vmem %s44_s18, 12288  ;;  %p3481_p6 = scmp.lt.s32.totalorder %s44_s18, %s44_s18 }
  0x2c   :  { %p3477_p5 = scmp.ne.s32.totalorder %s44_s18, %s3476_s14  ;;  %p3482_p7 = scmp.lt.s32.totalorder %s3476_s14, %s3476_s14 }
  0x2e   :  { %p3483_p8 = por %p3482_p7, %p3481_p6 }
  0x30   :  { %p3484_p9 = pnand %p3483_p8, %p3477_p5 }
  0x32   :  { %3487 = shalt.err (!%p3484_p9)
}
  0x33   :  { %49 = dma.hbm_to_vmem [thread:$0]  %s5300_s2, 12288, %s44_s18, [#allocation6], %s3541_s11, %s3541_s11, %s3542_s12  }
  0x34   :  { %s3545_s16 = smov [#allocation8]   ;;  %s3488_s21 = scalar_lea.hbm %s5303_s5, 2048 }
  0x35   :  { %s59_s17 = sshll.u32 %s3545_s16, 4  ;;  %p3489_p10 = scmp.ne.s32.totalorder %s5303_s5, %s3488_s21  ;;  %s60_s17 = int_to_ptr.vmem [resolvable:$true] %s59_s17 }
  0x36   :  { %p3492_p11 = scmp.lt.u32.totalorder %s3488_s21, %s5303_s5 }
  0x38   :  { %p3494_p12 = pnand %p3492_p11, %p3489_p10 }
  0x3a   :  { %3497 = shalt.err (!%p3494_p12)
}
  0x3b   :  { %s3498_s1 = scalar_lea.vmem %s60_s17, 2048  ;;  %p3503_p0 = scmp.lt.s32.totalorder %s60_s17, %s60_s17 }
  0x3c   :  { %p3499_p13 = scmp.ne.s32.totalorder %s60_s17, %s3498_s1  ;;  %p3504_p1 = scmp.lt.s32.totalorder %s3498_s1, %s3498_s1 }
  0x3e   :  { %p3505_p2 = por %p3504_p1, %p3503_p0 }
  0x40   :  { %p3506_p3 = pnand %p3505_p2, %p3499_p13 }
  0x42   :  { %3509 = shalt.err (!%p3506_p3)
}
  0x43   :  { %s3546_s2 = smov 64   ;;  %s3547_s11 = smov 4  }
  0x44   :  { %65 = dma.hbm_to_vmem [thread:$0]  %s5303_s5, 2048, %s60_s17, [#allocation9], %s3546_s2, %s3546_s2, %s3547_s11  }
  0x45   :  { %3532 = dma.done.wait [#allocation3], 128  }
  0x46   :  { %3533 = vsyncadd [#allocation3], 4294967168 }
  0x47   :  { %3534 = dma.done.wait [#allocation6], 13824  }
  0x48   :  { %3535 = vsyncadd [#allocation6], 4294953472 }
  0x49   :  { %3536 = dma.done.wait [#allocation9], 2048  }
  0x4a   :  { %3537 = vsyncadd [#allocation9], 4294965248  ;;  %v3548_v0 = vmov 0   ;;  %v5318_v1 = vmov 0.0|0.0   ;;  %v2892_v2 = vld [vmem:[#allocation5 + $0x4] ss:$24 sps:$4 sm:$0xff]  }
  0x4b   :  { %223 = vmatprep.mubr.bf16.mxu0 %v3548_v0  ;;  %955 = vmatprep.mubr.bf16.mxu1 %v5318_v1  ;;  %v3646_v3 = vld [vmem:[#allocation7 + $0x4] ss:$24 sps:$4 sm:$0xff]   ;;  %v2896_v4 = vld [vmem:[#allocation5] ss:$24 sps:$4 sm:$0xff]   ;;  %v2898_v6 = vld [vmem:[#allocation5 + $0x34] ss:$24 sps:$4 sm:$0xff]  }
  0x4c   :  { %191 = vmatprep.subr.bf16.mxu0 %v2892_v2  ;;  %v3648_v5 = vld [vmem:[#allocation7] ss:$24 sps:$4 sm:$0xff]   ;;  %923 = vmatprep.subr.bf16.mxu1 %v3646_v3  ;;  %v3652_v7 = vld [vmem:[#allocation7 + $0x34] ss:$24 sps:$4 sm:$0xff]   ;;  %v2902_v8 = vld [vmem:[#allocation5 + $0x30] ss:$24 sps:$4 sm:$0xff]  }
  0x4d   :  { %192 = vmatpush1.bf16.msra.mxu0 %v2896_v4  ;;  %924 = vmatpush1.bf16.msra.mxu1 %v3648_v5  ;;  %v3654_v9 = vld [vmem:[#allocation7 + $0x30] ss:$24 sps:$4 sm:$0xff]   ;;  %v2906_v11 = vld [vmem:[#allocation5 + $0xc] ss:$24 sps:$4 sm:$0xff]   ;;  %v81_v13 = vld [vmem:[#allocation2] sm:$0xff]  ;;  %vm187_vm0 = vcmask 261120  }
  0x4e   :  { %193 = vmatprep.subr.bf16.mxu0 %v2898_v6  ;;  %925 = vmatprep.subr.bf16.mxu1 %v3652_v7  ;;  %v2904_v10 = vld [vmem:[#allocation5 + $0x8] ss:$24 sps:$4 sm:$0xff]   ;;  %v3657_v12 = vld [vmem:[#allocation7 + $0x64] ss:$24 sps:$4 sm:$0xff]   ;;  %v82_v14 = vpack.c.bf16 %v81_v13, %v81_v13  ;;  %v3663_v17 = vld [vmem:[#allocation7 + $0x94] ss:$24 sps:$4 sm:$0xff]  }
  0x4f   :  { %v3660_v15 = vld [vmem:[#allocation7 + $0x60] ss:$24 sps:$4 sm:$0xff]   ;;  %v2912_v16 = vld [vmem:[#allocation5 + $0x3c] ss:$24 sps:$4 sm:$0xff]   ;;  %v3667_v19 = vld [vmem:[#allocation7 + $0x90] ss:$24 sps:$4 sm:$0xff]  }
  0x50   :  { %v2910_v18 = vld [vmem:[#allocation5 + $0x38] ss:$24 sps:$4 sm:$0xff]   ;;  %v2918_v20 = vld [vmem:[#allocation5 + $0x14] ss:$24 sps:$4 sm:$0xff]   ;;  %v3670_v21 = vld [vmem:[#allocation7 + $0xc4] ss:$24 sps:$4 sm:$0xff]  }
  0x51   :  { %194 = vmatpush1.bf16.msra.mxu0 %v2902_v8  ;;  %926 = vmatpush1.bf16.msra.mxu1 %v3654_v9  ;;  %v2916_v22 = vld [vmem:[#allocation5 + $0x10] ss:$24 sps:$4 sm:$0xff]   ;;  %v3672_v23 = vld [vmem:[#allocation7 + $0xc0] ss:$24 sps:$4 sm:$0xff]   ;;  %v2924_v24 = vld [vmem:[#allocation5 + $0x44] ss:$24 sps:$4 sm:$0xff]  }
  0x52   :  { %232 = vmatprep.subr.bf16.mxu0 %v2906_v11  ;;  %927 = vmatprep.subr.bf16.mxu1 %v3657_v12  ;;  %v3676_v25 = vld [vmem:[#allocation7 + $0xf4] ss:$24 sps:$4 sm:$0xff]   ;;  %v2922_v26 = vld [vmem:[#allocation5 + $0x40] ss:$24 sps:$4 sm:$0xff]   ;;  %v3680_v27 = vld [vmem:[#allocation7 + $0xf0] ss:$24 sps:$4 sm:$0xff]  }
  0x53   :  { %v3683_v28 = vld [vmem:[#allocation7 + $0x124] ss:$24 sps:$4 sm:$0xff]   ;;  %v3687_v30 = vld [vmem:[#allocation7 + $0x120] ss:$24 sps:$4 sm:$0xff]   ;;  %v3692_v32 = vld [vmem:[#allocation7 + $0x154] ss:$24 sps:$4 sm:$0xff]  }
  0x54   :  { %2711 = vmatmul.mubr.msk.bf16.vlgmr.msra.gmra.mrb[0].mxu0 %vm187_vm0, %v82_v14  ;;  %v3685_v29 = vld [vmem:[#allocation7 + $0xc] ss:$24 sps:$4 sm:$0xff]   ;;  %v3689_v31 = vld [vmem:[#allocation7 + $0x8] ss:$24 sps:$4 sm:$0xff]   ;;  %v3696_v33 = vld [vmem:[#allocation7 + $0x3c] ss:$24 sps:$4 sm:$0xff]  }
  0x55   :  { %233 = vmatpush1.bf16.msra.mxu0 %v2904_v10  ;;  %928 = vmatpush1.bf16.msra.mxu1 %v3660_v15  ;;  %v3699_v34 = vld [vmem:[#allocation7 + $0x150] ss:$24 sps:$4 sm:$0xff]   ;;  %v3707_v36 = vld [vmem:[#allocation7 + $0x184] ss:$24 sps:$4 sm:$0xff]   ;;  %v3712_v38 = vld [vmem:[#allocation7 + $0x180] ss:$24 sps:$4 sm:$0xff]  }
  0x56   :  { %234 = vmatprep.subr.bf16.mxu0 %v2912_v16  ;;  %929 = vmatprep.subr.bf16.mxu1 %v3663_v17  ;;  %v3703_v35 = vld [vmem:[#allocation7 + $0x38] ss:$24 sps:$4 sm:$0xff]   ;;  %v3709_v37 = vld [vmem:[#allocation7 + $0x6c] ss:$24 sps:$4 sm:$0xff]   ;;  %v3714_v39 = vld [vmem:[#allocation7 + $0x68] ss:$24 sps:$4 sm:$0xff]  }
  0x57   :  { %264 = vmatprep.mubr.bf16.mxu0 %v3548_v0  ;;  %5545 = vst [vmem:[#allocation15_spill] sm:$0xff] %v3703_v35  ;;  %5546 = vst [vmem:[#allocation16_spill] sm:$0xff] %v3709_v37  ;;  %v3718_v40 = vld [vmem:[#allocation7 + $0x1b4] ss:$24 sps:$4 sm:$0xff]   ;;  %v3724_v42 = vld [vmem:[#allocation7 + $0x1b0] ss:$24 sps:$4 sm:$0xff]  }
  0x58   :  { %5547 = vst [vmem:[#allocation17_spill] sm:$0xff] %v3714_v39  ;;  %v3722_v41 = vld [vmem:[#allocation7 + $0x9c] ss:$24 sps:$4 sm:$0xff]   ;;  %v3728_v43 = vld [vmem:[#allocation7 + $0x98] ss:$24 sps:$4 sm:$0xff]   ;;  %vm2483_vm1 = vcmask 1040384  }
  0x59   :  { %235 = vmatpush1.bf16.msra.mxu0 %v2910_v18  ;;  %930 = vmatpush1.bf16.msra.mxu1 %v3667_v19  ;;  %5548 = vst [vmem:[#allocation18_spill] sm:$0xff] %v3722_v41  ;;  %5549 = vst [vmem:[#allocation19_spill] sm:$0xff] %v3728_v43  ;;  %v3732_v44 = vld [vmem:[#allocation7 + $0x1e4] ss:$24 sps:$4 sm:$0xff]   ;;  %v3736_v46 = vld [vmem:[#allocation7 + $0x1e0] ss:$24 sps:$4 sm:$0xff]  }
  0x5a   :  { %273 = vmatprep.subr.bf16.mxu0 %v2918_v20  ;;  %931 = vmatprep.subr.bf16.mxu1 %v3670_v21  ;;  %v3734_v45 = vld [vmem:[#allocation7 + $0xcc] ss:$24 sps:$4 sm:$0xff]   ;;  %v3738_v47 = vld [vmem:[#allocation7 + $0xc8] ss:$24 sps:$4 sm:$0xff]   ;;  %v3746_v49 = vld [vmem:[#allocation7 + $0xfc] ss:$24 sps:$4 sm:$0xff]  }
  0x5b   :  { %5550 = vst [vmem:[#allocation20_spill] sm:$0xff] %v3734_v45  ;;  %5551 = vst [vmem:[#allocation21_spill] sm:$0xff] %v3738_v47  ;;  %v3742_v48 = vld [vmem:[#allocation7 + $0x214] ss:$24 sps:$4 sm:$0xff]   ;;  %v3748_v50 = vld [vmem:[#allocation7 + $0x210] ss:$24 sps:$4 sm:$0xff]  }
  0x5c   :  { %2712 = vmatmul.mubr.msk.bf16.vlgmr.msra.gmra.mrb[4].mxu0 %vm187_vm0, %v82_v14  ;;  %5552 = vst [vmem:[#allocation22_spill] sm:$0xff] %v3746_v49  ;;  %v3752_v51 = vld [vmem:[#allocation7 + $0xf8] ss:$24 sps:$4 sm:$0xff]   ;;  %v3756_v52 = vld [vmem:[#allocation7 + $0x244] ss:$24 sps:$4 sm:$0xff]   ;;  %vm2485_vm2 = vcmask 1041408  }
  0x5d   :  { %274 = vmatpush1.bf16.msra.mxu0 %v2916_v22  ;;  %932 = vmatpush1.bf16.msra.mxu1 %v3672_v23  ;;  %5553 = vst [vmem:[#allocation23_spill] sm:$0xff] %v3752_v51  ;;  %v3758_v53 = vld [vmem:[#allocation7 + $0x12c] ss:$24 sps:$4 sm:$0xff]   ;;  %v3760_v54 = vld [vmem:[#allocation7 + $0x240] ss:$24 sps:$4 sm:$0xff]   ;;  %vm2487_vm3 = vcmask 1042432  }
  0x5e   :  { %275 = vmatprep.subr.bf16.mxu0 %v2924_v24  ;;  %933 = vmatprep.subr.bf16.mxu1 %v3676_v25  ;;  %5554 = vst [vmem:[#allocation24_spill] sm:$0xff] %v3758_v53  ;;  %v3762_v55 = vld [vmem:[#allocation7 + $0x128] ss:$24 sps:$4 sm:$0xff]   ;;  %v3766_v56 = vld [vmem:[#allocation7 + $0x274] ss:$24 sps:$4 sm:$0xff]   ;;  %vm2489_vm4 = vcmask 1043456  }
  0x5f   :  { %305 = vmatprep.mubr.bf16.mxu0 %v3548_v0  ;;  %5555 = vst [vmem:[#allocation25_spill] sm:$0xff] %v3762_v55  ;;  %v3770_v57 = vld [vmem:[#allocation7 + $0x15c] ss:$24 sps:$4 sm:$0xff]   ;;  %v3772_v58 = vld [vmem:[#allocation7 + $0x270] ss:$24 sps:$4 sm:$0xff]   ;;  %vm2491_vm5 = vcmask 1044480  }
  0x60   :  { %5556 = vst [vmem:[#allocation26_spill] sm:$0xff] %v3770_v57  ;;  %v3776_v59 = vld [vmem:[#allocation7 + $0x158] ss:$24 sps:$4 sm:$0xff]   ;;  %v3780_v60 = vld [vmem:[#allocation7 + $0x2a4] ss:$24 sps:$4 sm:$0xff]   ;;  %vm2493_vm6 = vcmask 1045504  }
  0x61   :  { %276 = vmatpush1.bf16.msra.mxu0 %v2922_v26  ;;  %934 = vmatpush1.bf16.msra.mxu1 %v3680_v27  ;;  %5557 = vst [vmem:[#allocation27_spill] sm:$0xff] %v3776_v59  ;;  %v3782_v61 = vld [vmem:[#allocation7 + $0x18c] ss:$24 sps:$4 sm:$0xff]   ;;  %v3784_v62 = vld [vmem:[#allocation7 + $0x2a0] ss:$24 sps:$4 sm:$0xff]   ;;  %vm2495_vm7 = vcmask 1046528  }
  0x62   :  { %935 = vmatprep.subr.bf16.mxu1 %v3683_v28  ;;  %964 = vmatprep.subr.bf16.mxu0 %v3685_v29  ;;  %5558 = vst [vmem:[#allocation28_spill] sm:$0xff] %v3782_v61  ;;  %v3786_v63 = vld [vmem:[#allocation7 + $0x188] ss:$24 sps:$4 sm:$0xff]   ;;  %v3790_v0 = vld [vmem:[#allocation7 + $0x2d4] ss:$24 sps:$4 sm:$0xff]   ;;  %s3550_s29 = smov [#allocation10]  }
  0x63   :  { %5559 = vst [vmem:[#allocation29_spill] sm:$0xff] %v3786_v63  ;;  %v3794_v2 = vld [vmem:[#allocation7 + $0x1bc] ss:$24 sps:$4 sm:$0xff]   ;;  %v3796_v4 = vld [vmem:[#allocation7 + $0x2d0] ss:$24 sps:$4 sm:$0xff]   ;;  %s2688_s30 = sshll.u32 %s3550_s29, 4  ;;  %s2689_s30 = int_to_ptr.vmem [resolvable:$true] %s2688_s30 }
  0x64   :  { %2713 = vmatmul.mubr.msk.bf16.vlgmr.msra.gmra.mrb[8].mxu0 %vm187_vm0, %v82_v14  ;;  %5560 = vst [vmem:[#allocation30_spill] sm:$0xff] %v3794_v2  ;;  %v3800_v6 = vld [vmem:[#allocation7 + $0x1b8] ss:$24 sps:$4 sm:$0xff]   ;;  %v3804_v8 = vld [vmem:[#allocation7 + $0x1ec] ss:$24 sps:$4 sm:$0xff]   ;;  %s3510_s8 = scalar_lea.vmem %s2689_s30, 128  ;;  %p3515_p5 = scmp.lt.s32.totalorder %s2689_s30, %s2689_s30 }
  0x65   :  { %936 = vmatpush1.bf16.msra.mxu1 %v3687_v30  ;;  %965 = vmatpush1.bf16.msra.mxu0 %v3689_v31  ;;  %5561 = vst [vmem:[#allocation31_spill] sm:$0xff] %v3800_v6  ;;  %5562 = vst [vmem:[#allocation32_spill] sm:$0xff] %v3804_v8  ;;  %v3806_v10 = vld [vmem:[#allocation7 + $0x14] ss:$24 sps:$4 sm:$0xff]   ;;  %v3808_v11 = vld [vmem:[#allocation7 + $0x1e8] ss:$24 sps:$4 sm:$0xff]   ;;  %p3511_p4 = scmp.ne.s32.totalorder %s2689_s30, %s3510_s8  ;;  %p3516_p6 = scmp.lt.s32.totalorder %s3510_s8, %s3510_s8 }
  0x66   :  { %937 = vmatprep.subr.bf16.mxu1 %v3692_v32  ;;  %966 = vmatprep.subr.bf16.mxu0 %v3696_v33  ;;  %5563 = vst [vmem:[#allocation33_spill] sm:$0xff] %v3806_v10  ;;  %5564 = vst [vmem:[#allocation34_spill] sm:$0xff] %v3808_v11  ;;  %v3812_v13 = vld [vmem:[#allocation7 + $0x10] ss:$24 sps:$4 sm:$0xff]   ;;  %v3816_v14 = vld [vmem:[#allocation7 + $0x21c] ss:$24 sps:$4 sm:$0xff]  }
  0x67   :  { %996 = vmatprep.mubr.bf16.mxu0 %v5318_v1  ;;  %5565 = vst [vmem:[#allocation35_spill] sm:$0xff] %v3812_v13  ;;  %5566 = vst [vmem:[#allocation36_spill] sm:$0xff] %v3816_v14  ;;  %v3818_v16 = vld [vmem:[#allocation7 + $0x44] ss:$24 sps:$4 sm:$0xff]   ;;  %v3821_v18 = vld [vmem:[#allocation7 + $0x218] ss:$24 sps:$4 sm:$0xff]   ;;  %p3517_p7 = por %p3516_p6, %p3515_p5 }
  0x68   :  { %5567 = vst [vmem:[#allocation37_spill] sm:$0xff] %v3818_v16  ;;  %5568 = vst [vmem:[#allocation38_spill] sm:$0xff] %v3821_v18  ;;  %v3825_v20 = vld [vmem:[#allocation7 + $0x40] ss:$24 sps:$4 sm:$0xff]   ;;  %v3829_v22 = vld [vmem:[#allocation7 + $0x24c] ss:$24 sps:$4 sm:$0xff]  }
  0x69   :  { %938 = vmatpush1.bf16.msra.mxu1 %v3699_v34  ;;  %967 = vmatpush1.bf16.msra.mxu0 %v3703_v35  ;;  %5569 = vst [vmem:[#allocation39_spill] sm:$0xff] %v3825_v20  ;;  %5570 = vst [vmem:[#allocation40_spill] sm:$0xff] %v3829_v22  ;;  %v3831_v24 = vld [vmem:[#allocation7 + $0x74] ss:$24 sps:$4 sm:$0xff]   ;;  %v3833_v26 = vld [vmem:[#allocation7 + $0x248] ss:$24 sps:$4 sm:$0xff]   ;;  %p3518_p8 = pnand %p3517_p7, %p3511_p4 }
  0x6a   :  { %939 = vmatprep.subr.bf16.mxu1 %v3707_v36  ;;  %968 = vmatprep.subr.bf16.mxu0 %v3709_v37  ;;  %5571 = vst [vmem:[#allocation41_spill] sm:$0xff] %v3831_v24  ;;  %5572 = vst [vmem:[#allocation42_spill] sm:$0xff] %v3833_v26 }
  0x6d   :  { %940 = vmatpush1.bf16.msra.mxu1 %v3712_v38  ;;  %969 = vmatpush1.bf16.msra.mxu0 %v3714_v39 }
  0x6e   :  { %941 = vmatprep.subr.bf16.mxu1 %v3718_v40  ;;  %970 = vmatprep.subr.bf16.mxu0 %v3722_v41 }
  0x71   :  { %942 = vmatpush1.bf16.msra.mxu1 %v3724_v42  ;;  %971 = vmatpush1.bf16.msra.mxu0 %v3728_v43 }
  0x72   :  { %943 = vmatprep.subr.bf16.mxu1 %v3732_v44  ;;  %972 = vmatprep.subr.bf16.mxu0 %v3734_v45 }
  0x75   :  { %944 = vmatpush1.bf16.msra.mxu1 %v3736_v46  ;;  %973 = vmatpush1.bf16.msra.mxu0 %v3738_v47 }
  0x76   :  { %945 = vmatprep.subr.bf16.mxu1 %v3742_v48  ;;  %974 = vmatprep.subr.bf16.mxu0 %v3746_v49 }
  0x79   :  { %946 = vmatpush1.bf16.msra.mxu1 %v3748_v50  ;;  %975 = vmatpush1.bf16.msra.mxu0 %v3752_v51 }
  0x7a   :  { %947 = vmatprep.subr.bf16.mxu1 %v3756_v52  ;;  %976 = vmatprep.subr.bf16.mxu0 %v3758_v53 }
  0x7d   :  { %948 = vmatpush1.bf16.msra.mxu1 %v3760_v54  ;;  %977 = vmatpush1.bf16.msra.mxu0 %v3762_v55 }
  0x7e   :  { %949 = vmatprep.subr.bf16.mxu1 %v3766_v56  ;;  %978 = vmatprep.subr.bf16.mxu0 %v3770_v57 }
  0x81   :  { %950 = vmatpush1.bf16.msra.mxu1 %v3772_v58  ;;  %979 = vmatpush1.bf16.msra.mxu0 %v3776_v59 }
  0x82   :  { %951 = vmatprep.subr.bf16.mxu1 %v3780_v60  ;;  %980 = vmatprep.subr.bf16.mxu0 %v3782_v61 }
  0x85   :  { %952 = vmatpush1.bf16.msra.mxu1 %v3784_v62  ;;  %981 = vmatpush1.bf16.msra.mxu0 %v3786_v63 }
  0x86   :  { %953 = vmatprep.subr.bf16.mxu1 %v3790_v0  ;;  %982 = vmatprep.subr.bf16.mxu0 %v3794_v2 }
  0x89   :  { %954 = vmatpush1.bf16.msra.mxu1 %v3796_v4  ;;  %983 = vmatpush1.bf16.msra.mxu0 %v3800_v6  ;;  %v3850_v6 = vld [vmem:[#allocation7 + $0x2ac] ss:$24 sps:$4 sm:$0xff]  }
  0x8a   :  { %984 = vmatprep.subr.bf16.mxu0 %v3804_v8  ;;  %1005 = vmatprep.subr.bf16.mxu1 %v3806_v10  ;;  %v3836_v8 = vld [vmem:[#allocation7 + $0x70] ss:$24 sps:$4 sm:$0xff]   ;;  %5578 = vst [vmem:[#allocation48_spill] sm:$0xff] %v3850_v6 }
  0x8b   :  { %5573 = vst [vmem:[#allocation43_spill] sm:$0xff] %v3836_v8 }
  0x8c   :  { %956 = vmatmul.mubr.bf16.vlgmr.msra.gmra.mrb[0].mxu1 %v5318_v1 }
  0x8d   :  { %985 = vmatpush1.bf16.msra.mxu0 %v3808_v11  ;;  %1006 = vmatpush1.bf16.msra.mxu1 %v3812_v13  ;;  %v3840_v13 = vld [vmem:[#allocation7 + $0x27c] ss:$24 sps:$4 sm:$0xff]  }
  0x8e   :  { %986 = vmatprep.subr.bf16.mxu0 %v3816_v14  ;;  %1007 = vmatprep.subr.bf16.mxu1 %v3818_v16  ;;  %5574 = vst [vmem:[#allocation44_spill] sm:$0xff] %v3840_v13  ;;  %v3842_v11 = vld [vmem:[#allocation7 + $0xa4] ss:$24 sps:$4 sm:$0xff]   ;;  %v3846_v16 = vld [vmem:[#allocation7 + $0x278] ss:$24 sps:$4 sm:$0xff]  }
  0x8f   :  { %1037 = vmatprep.mubr.bf16.mxu1 %v5318_v1  ;;  %5575 = vst [vmem:[#allocation45_spill] sm:$0xff] %v3842_v11  ;;  %5576 = vst [vmem:[#allocation46_spill] sm:$0xff] %v3846_v16  ;;  %v3848_v14 = vld [vmem:[#allocation7 + $0xa0] ss:$24 sps:$4 sm:$0xff]   ;;  %v3852_v1 = vld [vmem:[#allocation7 + $0xd4] ss:$24 sps:$4 sm:$0xff]  }
  0x90   :  { %5577 = vst [vmem:[#allocation47_spill] sm:$0xff] %v3848_v14  ;;  %5579 = vst [vmem:[#allocation49_spill] sm:$0xff] %v3852_v1 }
  0x91   :  { %987 = vmatpush1.bf16.msra.mxu0 %v3821_v18  ;;  %1008 = vmatpush1.bf16.msra.mxu1 %v3825_v20  ;;  %v3858_v20 = vld [vmem:[#allocation7 + $0x2a8] ss:$24 sps:$4 sm:$0xff]   ;;  %v3864_v18 = vld [vmem:[#allocation7 + $0x104] ss:$24 sps:$4 sm:$0xff]  }
  0x92   :  { %988 = vmatprep.subr.bf16.mxu0 %v3829_v22  ;;  %1009 = vmatprep.subr.bf16.mxu1 %v3831_v24  ;;  %5580 = vst [vmem:[#allocation50_spill] sm:$0xff] %v3858_v20  ;;  %v3860_v22 = vld [vmem:[#allocation7 + $0xd0] ss:$24 sps:$4 sm:$0xff]   ;;  %v3862_v24 = vld [vmem:[#allocation7 + $0x2dc] ss:$24 sps:$4 sm:$0xff]   ;;  %5583 = vst [vmem:[#allocation53_spill] sm:$0xff] %v3864_v18 }
  0x93   :  { %5581 = vst [vmem:[#allocation51_spill] sm:$0xff] %v3860_v22  ;;  %5582 = vst [vmem:[#allocation52_spill] sm:$0xff] %v3862_v24 }
  0x95   :  { %989 = vmatpush1.bf16.msra.mxu0 %v3833_v26  ;;  %1010 = vmatpush1.bf16.msra.mxu1 %v3836_v8  ;;  %v3874_v8 = vld [vmem:[#allocation7 + $0x100] ss:$24 sps:$4 sm:$0xff]  }
  0x96   :  { %990 = vmatprep.subr.bf16.mxu0 %v3840_v13  ;;  %1011 = vmatprep.subr.bf16.mxu1 %v3842_v11  ;;  %v3872_v11 = vld [vmem:[#allocation7 + $0x2d8] ss:$24 sps:$4 sm:$0xff]   ;;  %5585 = vst [vmem:[#allocation55_spill] sm:$0xff] %v3874_v8  ;;  %v3878_v13 = vld [vmem:[#allocation7 + $0x134] ss:$24 sps:$4 sm:$0xff]  }
  0x97   :  { %5584 = vst [vmem:[#allocation54_spill] sm:$0xff] %v3872_v11  ;;  %5586 = vst [vmem:[#allocation56_spill] sm:$0xff] %v3878_v13 }
  0x99   :  { %991 = vmatpush1.bf16.msra.mxu0 %v3846_v16  ;;  %1012 = vmatpush1.bf16.msra.mxu1 %v3848_v14  ;;  %v3882_v14 = vld [vmem:[#allocation7 + $0x130] ss:$24 sps:$4 sm:$0xff]  }
  0x9a   :  { %992 = vmatprep.subr.bf16.mxu0 %v3850_v6  ;;  %1013 = vmatprep.subr.bf16.mxu1 %v3852_v1  ;;  %v3885_v1 = vld [vmem:[#allocation7 + $0x164] ss:$24 sps:$4 sm:$0xff]  }
  0x9d   :  { %993 = vmatpush1.bf16.msra.mxu0 %v3858_v20  ;;  %1014 = vmatpush1.bf16.msra.mxu1 %v3860_v22  ;;  %v5587_v22 = vmov 0.0|0.0  }
  0x9e   :  { %994 = vmatprep.subr.bf16.mxu0 %v3862_v24  ;;  %1015 = vmatprep.subr.bf16.mxu1 %v3864_v18  ;;  %v3890_v24 = vld [vmem:[#allocation7 + $0x160] ss:$24 sps:$4 sm:$0xff]   ;;  %v3894_v18 = vld [vmem:[#allocation7 + $0x194] ss:$24 sps:$4 sm:$0xff]  }
  0xa1   :  { %995 = vmatpush1.bf16.msra.mxu0 %v3872_v11  ;;  %1016 = vmatpush1.bf16.msra.mxu1 %v3874_v8  ;;  %v3902_v8 = vld [vmem:[#allocation7 + $0x1c4] ss:$24 sps:$4 sm:$0xff]  }
  0xa2   :  { %1017 = vmatprep.subr.bf16.mxu1 %v3878_v13  ;;  %1102 = vmatprep.subr.bf16.mxu0 %v3646_v3  ;;  %v3898_v13 = vld [vmem:[#allocation7 + $0x190] ss:$24 sps:$4 sm:$0xff]  }
  0xa4   :  { %997 = vmatmul.mubr.bf16.vlgmr.msra.gmra.mrb[12].mxu0 %v5587_v22 }
  0xa5   :  { %1018 = vmatpush1.bf16.msra.mxu1 %v3882_v14  ;;  %1103 = vmatpush1.bf16.msra.mxu0 %v3648_v5  ;;  %v3906_v5 = vld [vmem:[#allocation7 + $0x1c0] ss:$24 sps:$4 sm:$0xff]  }
  0xa6   :  { %1019 = vmatprep.subr.bf16.mxu1 %v3885_v1  ;;  %1104 = vmatprep.subr.bf16.mxu0 %v3652_v7  ;;  %v3910_v7 = vld [vmem:[#allocation7 + $0x1f4] ss:$24 sps:$4 sm:$0xff]  }
  0xa7   :  { %5588 = vst [vmem:[#allocation57_spill] sm:$0xff] %v3910_v7 }
  0xa9   :  { %1020 = vmatpush1.bf16.msra.mxu1 %v3890_v24  ;;  %1105 = vmatpush1.bf16.msra.mxu0 %v3654_v9  ;;  %v3914_v9 = vld [vmem:[#allocation7 + $0x1f0] ss:$24 sps:$4 sm:$0xff]  }
  0xaa   :  { %1021 = vmatprep.subr.bf16.mxu1 %v3894_v18  ;;  %1106 = vmatprep.subr.bf16.mxu0 %v3657_v12  ;;  %5589 = vst [vmem:[#allocation58_spill] sm:$0xff] %v3914_v9  ;;  %v3918_v12 = vld [vmem:[#allocation7 + $0x224] ss:$24 sps:$4 sm:$0xff]  }
  0xab   :  { %5590 = vst [vmem:[#allocation59_spill] sm:$0xff] %v3918_v12 }
  0xad   :  { %1022 = vmatpush1.bf16.msra.mxu1 %v3898_v13  ;;  %1107 = vmatpush1.bf16.msra.mxu0 %v3660_v15  ;;  %v3922_v15 = vld [vmem:[#allocation7 + $0x220] ss:$24 sps:$4 sm:$0xff]  }
  0xae   :  { %1023 = vmatprep.subr.bf16.mxu1 %v3902_v8  ;;  %1108 = vmatprep.subr.bf16.mxu0 %v3663_v17  ;;  %5591 = vst [vmem:[#allocation60_spill] sm:$0xff] %v3922_v15  ;;  %v3926_v17 = vld [vmem:[#allocation7 + $0x254] ss:$24 sps:$4 sm:$0xff]  }
  0xaf   :  { %5592 = vst [vmem:[#allocation61_spill] sm:$0xff] %v3926_v17 }
  0xb1   :  { %1024 = vmatpush1.bf16.msra.mxu1 %v3906_v5  ;;  %1109 = vmatpush1.bf16.msra.mxu0 %v3667_v19  ;;  %v3930_v19 = vld [vmem:[#allocation7 + $0x250] ss:$24 sps:$4 sm:$0xff]  }
  0xb2   :  { %1025 = vmatprep.subr.bf16.mxu1 %v3910_v7  ;;  %1110 = vmatprep.subr.bf16.mxu0 %v3670_v21  ;;  %5593 = vst [vmem:[#allocation62_spill] sm:$0xff] %v3930_v19  ;;  %v3934_v7 = vld [vmem:[#allocation7 + $0x284] ss:$24 sps:$4 sm:$0xff]  }
  0xb5   :  { %1026 = vmatpush1.bf16.msra.mxu1 %v3914_v9  ;;  %1111 = vmatpush1.bf16.msra.mxu0 %v3672_v23  ;;  %v3938_v9 = vld [vmem:[#allocation7 + $0x280] ss:$24 sps:$4 sm:$0xff]  }
  0xb6   :  { %1027 = vmatprep.subr.bf16.mxu1 %v3918_v12  ;;  %1112 = vmatprep.subr.bf16.mxu0 %v3676_v25  ;;  %v3942_v12 = vld [vmem:[#allocation7 + $0x2b4] ss:$24 sps:$4 sm:$0xff]  }
  0xb9   :  { %1028 = vmatpush1.bf16.msra.mxu1 %v3922_v15  ;;  %1113 = vmatpush1.bf16.msra.mxu0 %v3680_v27  ;;  %v3946_v15 = vld [vmem:[#allocation7 + $0x2b0] ss:$24 sps:$4 sm:$0xff]  }
  0xba   :  { %1029 = vmatprep.subr.bf16.mxu1 %v3926_v17  ;;  %1114 = vmatprep.subr.bf16.mxu0 %v3683_v28  ;;  %v3950_v17 = vld [vmem:[#allocation7 + $0x2e4] ss:$24 sps:$4 sm:$0xff]  }
  0xbb   :  { %5594 = vst [vmem:[#allocation63_spill] sm:$0xff] %v3950_v17 }
  0xbd   :  { %1030 = vmatpush1.bf16.msra.mxu1 %v3930_v19  ;;  %1115 = vmatpush1.bf16.msra.mxu0 %v3687_v30  ;;  %v3954_v19 = vld [vmem:[#allocation7 + $0x2e0] ss:$24 sps:$4 sm:$0xff]  }
  0xbe   :  { %1031 = vmatprep.subr.bf16.mxu1 %v3934_v7  ;;  %1116 = vmatprep.subr.bf16.mxu0 %v3692_v32  ;;  %5595 = vst [vmem:[#allocation64_spill] sm:$0xff] %v3954_v19 }
  0xc1   :  { %1032 = vmatpush1.bf16.msra.mxu1 %v3938_v9  ;;  %1117 = vmatpush1.bf16.msra.mxu0 %v3699_v34 }
  0xc2   :  { %1033 = vmatprep.subr.bf16.mxu1 %v3942_v12  ;;  %1118 = vmatprep.subr.bf16.mxu0 %v3707_v36 }
  0xc5   :  { %1034 = vmatpush1.bf16.msra.mxu1 %v3946_v15  ;;  %1119 = vmatpush1.bf16.msra.mxu0 %v3712_v38 }
  0xc6   :  { %1035 = vmatprep.subr.bf16.mxu1 %v3950_v17  ;;  %1120 = vmatprep.subr.bf16.mxu0 %v3718_v40 }
  0xc9   :  { %1036 = vmatpush1.bf16.msra.mxu1 %v3954_v19  ;;  %1121 = vmatpush1.bf16.msra.mxu0 %v3724_v42 }
  0xca   :  { %1143 = vmatprep.subr.bf16.mxu1 %v3685_v29  ;;  %1122 = vmatprep.subr.bf16.mxu0 %v3732_v44  ;;  %v5596_v29 = vld [vmem:[#allocation31_spill] sm:$0xff] }
  0xcc   :  { %1038 = vmatmul.mubr.bf16.vlgmr.msra.gmra.mrb[4].mxu1 %v5587_v22  ;;  %v5599_v22 = vld [vmem:[#allocation36_spill] sm:$0xff] }
  0xcd   :  { %1144 = vmatpush1.bf16.msra.mxu1 %v3689_v31  ;;  %1123 = vmatpush1.bf16.msra.mxu0 %v3736_v46  ;;  %v5597_v31 = vld [vmem:[#allocation32_spill] sm:$0xff] }
  0xce   :  { %1145 = vmatprep.subr.bf16.mxu1 %v3696_v33  ;;  %1124 = vmatprep.subr.bf16.mxu0 %v3742_v48  ;;  %v5598_v33 = vld [vmem:[#allocation34_spill] sm:$0xff] }
  0xd1   :  { %1146 = vmatpush1.bf16.msra.mxu1 %v3703_v35  ;;  %1125 = vmatpush1.bf16.msra.mxu0 %v3748_v50 }
  0xd2   :  { %1147 = vmatprep.subr.bf16.mxu1 %v3709_v37  ;;  %1126 = vmatprep.subr.bf16.mxu0 %v3756_v52 }
  0xd5   :  { %1148 = vmatpush1.bf16.msra.mxu1 %v3714_v39  ;;  %1127 = vmatpush1.bf16.msra.mxu0 %v3760_v54 }
  0xd6   :  { %1149 = vmatprep.subr.bf16.mxu1 %v3722_v41  ;;  %1128 = vmatprep.subr.bf16.mxu0 %v3766_v56 }
  0xd9   :  { %1150 = vmatpush1.bf16.msra.mxu1 %v3728_v43  ;;  %1129 = vmatpush1.bf16.msra.mxu0 %v3772_v58 }
  0xda   :  { %1151 = vmatprep.subr.bf16.mxu1 %v3734_v45  ;;  %1130 = vmatprep.subr.bf16.mxu0 %v3780_v60 }
  0xdd   :  { %1152 = vmatpush1.bf16.msra.mxu1 %v3738_v47  ;;  %1131 = vmatpush1.bf16.msra.mxu0 %v3784_v62 }
  0xde   :  { %1153 = vmatprep.subr.bf16.mxu1 %v3746_v49  ;;  %1132 = vmatprep.subr.bf16.mxu0 %v3790_v0 }
  0xe1   :  { %1154 = vmatpush1.bf16.msra.mxu1 %v3752_v51  ;;  %1133 = vmatpush1.bf16.msra.mxu0 %v3796_v4 }
  0xe2   :  { %1155 = vmatprep.subr.bf16.mxu1 %v3758_v53  ;;  %1184 = vmatprep.subr.bf16.mxu0 %v3806_v10  ;;  %v5600_v53 = vld [vmem:[#allocation38_spill] sm:$0xff] }
  0xe5   :  { %1156 = vmatpush1.bf16.msra.mxu1 %v3762_v55  ;;  %v5601_v55 = vld [vmem:[#allocation40_spill] sm:$0xff] }
  0xe6   :  { %1157 = vmatprep.subr.bf16.mxu1 %v3770_v57 }
  0xe9   :  { %1158 = vmatpush1.bf16.msra.mxu1 %v3776_v59  ;;  %v5602_v59 = vld [vmem:[#allocation44_spill] sm:$0xff] }
  0xea   :  { %1159 = vmatprep.subr.bf16.mxu1 %v3782_v61  ;;  %v97_v61 = vlaneseq }
  0xed   :  { %1160 = vmatpush1.bf16.msra.mxu1 %v3786_v63 }
  0xee   :  { %1161 = vmatprep.subr.bf16.mxu1 %v3794_v2 }
  0xf1   :  { %1162 = vmatpush1.bf16.msra.mxu1 %v5596_v29  ;;  %v5603_v29 = vld [vmem:[#allocation52_spill] sm:$0xff] }
  0xf2   :  { %1163 = vmatprep.subr.bf16.mxu1 %v5597_v31 }
  0xf5   :  { %1164 = vmatpush1.bf16.msra.mxu1 %v5598_v33 }
  0xf6   :  { %1165 = vmatprep.subr.bf16.mxu1 %v5599_v22 }
  0xf9   :  { %1166 = vmatpush1.bf16.msra.mxu1 %v5600_v53 }
  0xfa   :  { %1167 = vmatprep.subr.bf16.mxu1 %v5601_v55 }
  0xfd   :  { %1168 = vmatpush1.bf16.msra.mxu1 %v3833_v26 }
  0xfe   :  { %1169 = vmatprep.subr.bf16.mxu1 %v5602_v59 }
 0x101   :  { %1170 = vmatpush1.bf16.msra.mxu1 %v3846_v16 }
 0x102   :  { %1171 = vmatprep.subr.bf16.mxu1 %v3850_v6 }
 0x105   :  { %1172 = vmatpush1.bf16.msra.mxu1 %v3858_v20 }
 0x106   :  { %1173 = vmatprep.subr.bf16.mxu1 %v5603_v29  ;;  %v4012_v29 = vshrl.u32 %v97_v61, 7 }
 0x109   :  { %1174 = vmatpush1.bf16.msra.mxu1 %v3872_v11  ;;  %v99_v11 = vsub.s32 0, %v4012_v29 }
 0x10a   :  { %1303 = vmatprep.subr.bf16.mxu1 %v3646_v3  ;;  %v4018_v3 = vld [vmem:[%s5301_s3] sm:$0x3f] }
 0x127   :  { %v225_v22 = vpop.f32.mrb[0].mxu0 }
 0x128   :  { %v227_v53 = vpop.f32.mrb[1].mxu0 }
 0x129   :  { %v229_v33 = vpop.f32.mrb[2].mxu0 }
 0x12a   :  { %v230_v55 = vpop.f32.mrb[3].mxu0 }
 0x12b   :  { %v410_v55 = vld [vmem:[%s5302_s4] sm:$0x3f] }
 0x12f   :  { %v266_v31 = vpop.f32.mrb[4].mxu0 }
 0x130   :  { %v268_v26 = vpop.f32.mrb[5].mxu0 }
 0x131   :  { %v270_v2 = vpop.f32.mrb[6].mxu0 }
 0x132   :  { %v271_v59 = vpop.f32.mrb[7].mxu0  ;;  %v100_v2 = vrot.slane %v4018_v3, %v99_v11 }
 0x133   :  { %v103_v59 = vsub.s32 1, %v4012_v29 }
 0x134   :  { %v4030_v57 = vadd.f32 %v225_v22, %v100_v2  ;;  %v111_v2 = vsub.s32 3, %v4012_v29 }
 0x135   :  { %v104_v61 = vrot.slane %v4018_v3, %v103_v59 }
 0x136   :  { %5606 = vst [vmem:[#allocation67_spill] sm:$0xff] %v4030_v57 }
 0x137   :  { %v4008_v63 = vpop.f32.mrb[8].mxu0  ;;  %v4035_v39 = vadd.f32 %v227_v53, %v104_v61 }
 0x138   :  { %v4010_v16 = vpop.f32.mrb[9].mxu0 }
 0x139   :  { %v311_v6 = vpop.f32.mrb[10].mxu0  ;;  %5607 = vst [vmem:[#allocation68_spill] sm:$0xff] %v4035_v39 }
 0x13a   :  { %v312_v20 = vpop.f32.mrb[11].mxu0  ;;  %v4025_v6 = vrot.slane %v410_v55, %v99_v11 }
 0x13b   :  { %v4027_v20 = vrot.slane %v410_v55, %v103_v59 }
 0x13c   :  { %5604 = vst [vmem:[#allocation65_spill] sm:$0xff] %v4025_v6 }
 0x13d   :  { %5605 = vst [vmem:[#allocation66_spill] sm:$0xff] %v4027_v20 }
 0x15f   :  { %v957_v33 = vpop.f32.mrb[0].mxu1 }
 0x160   :  { %v958_v51 = vadd.f32 %v957_v33, %v4025_v6  ;;  %v959_v49 = vpop.f32.mrb[1].mxu1  ;;  %v107_v33 = vsub.s32 2, %v4012_v29 }
 0x161   :  { %v960_v47 = vadd.f32 %v959_v49, %v4027_v20  ;;  %v961_v45 = vpop.f32.mrb[2].mxu1  ;;  %v4040_v49 = vrot.slane %v410_v55, %v111_v2 }
 0x162   :  { %v1046_v43 = vadd.f32 %v958_v51, %v4030_v57  ;;  %v962_v41 = vpop.f32.mrb[3].mxu1  ;;  %v4042_v45 = vrot.slane %v410_v55, %v107_v33 }
 0x163   :  { %v1053_v37 = vadd.f32 %v960_v47, %v4035_v39 }
 0x164   :  { %v2810_v11 = vmul.f32 -1.442695, %v1046_v43  ;;  %5608 = vst [vmem:[#allocation69_spill] sm:$0xff] %v4042_v45 }
 0x165   :  { %v2811_v35 = vmul.f32 -1.442695, %v1053_v37  ;;  %v108_v37 = vrot.slane %v4018_v3, %v107_v33 }
 0x166   :  { %3070 = vpow2.f32 %v2810_v11 }
 0x167   :  { %3072 = vpow2.f32 %v2811_v35  ;;  %v4048_v57 = vadd.f32 %v266_v31, %v108_v37  ;;  %v115_v37 = vsub.s32 4, %v4012_v29 }
 0x170   :  { %v3071_v59 = vpop.eup %3070 }
 0x171   :  { %v1050_v22 = vadd.f32 1.0, %v3071_v59  ;;  %v3073_v41 = vpop.eup %3072  ;;  %v112_v59 = vrot.slane %v4018_v3, %v111_v2 }
 0x172   :  { %v1057_v35 = vadd.f32 1.0, %v3073_v41 }
 0x173   :  { %3074 = vrcp.f32 %v1050_v22  ;;  %v4050_v6 = vadd.f32 %v268_v26, %v112_v59  ;;  %v119_v26 = vsub.s32 5, %v4012_v29 }
 0x174   :  { %3076 = vrcp.f32 %v1057_v35 }
 0x177   :  { %v998_v51 = vpop.f32.mrb[12].mxu0 }
 0x178   :  { %v1000_v53 = vpop.f32.mrb[13].mxu0  ;;  %v999_v61 = vadd.f32 %v998_v51, %v4042_v45 }
 0x179   :  { %v1001_v43 = vadd.f32 %v1000_v53, %v4040_v49  ;;  %v1002_v47 = vpop.f32.mrb[14].mxu0 }
 0x17a   :  { %v1003_v11 = vpop.f32.mrb[15].mxu0 }
 0x17b   :  { %v1068_v39 = vrot.slane %v1001_v43, 1 }
 0x17d   :  { %v3075_v22 = vpop.eup %3074  ;;  %v1070_v53 = vadd.f32 %v1068_v39, %v4050_v6  ;;  %v4060_v39 = vrot.slane %v410_v55, %v119_v26 }
 0x17e   :  { %v1060_v20 = vmul.f32 %v3075_v22, %v999_v61  ;;  %v3077_v41 = vpop.eup %3076 }
 0x17f   :  { %v2812_v33 = vmul.f32 -1.442695, %v1070_v53  ;;  %v1063_v51 = vsub.f32 1.0, %v3077_v41  ;;  %v1065_v2 = vmul.f32 0.0, %v3077_v41 }
 0x180   :  { %v1061_v10 = vadd.f32 %v1060_v20, %v4048_v57  ;;  %v4058_v20 = vrot.slane %v410_v55, %v115_v37 }
 0x182   :  { %3078 = vtanh.f32 %v1061_v10  ;;  %v116_v10 = vrot.slane %v4018_v3, %v115_v37 }
 0x183   :  { %3080 = vpow2.f32 %v2812_v33 }
 0x184   :  { %v4066_v33 = vadd.f32 %v4008_v63, %v116_v10 }
 0x18c   :  { %v3079_v47 = vpop.eup %3078 }
 0x18d   :  { %v1064_v11 = vmul.f32 %v3079_v47, %v1063_v51  ;;  %v3081_v31 = vpop.eup %3080 }
 0x18e   :  { %v1074_v43 = vadd.f32 1.0, %v3081_v31  ;;  %v120_v31 = vrot.slane %v4018_v3, %v119_v26  ;;  %v5611_v3 = vld [vmem:[#allocation35_spill] sm:$0xff]  ;;  %v5612_v26 = vld [vmem:[#allocation37_spill] sm:$0xff] }
 0x18f   :  { %v4054_v45 = vadd.f32 %v1065_v2, %v1064_v11 }
 0x190   :  { %3082 = vrcp.f32 %v1074_v43  ;;  %v4071_v43 = vadd.f32 %v4010_v16, %v120_v31  ;;  %v4093_v31 = vld [vmem:[#allocation7 + $0x30] ss:$24 sps:$4 sm:$0xff]  }
 0x191   :  { %5609 = vst [vmem:[#allocation70_spill] sm:$0xff] %v4054_v45  ;;  %v4079_v16 = vpack.c.bf16 %v4054_v45, %v4054_v45 }
 0x19a   :  { %v3083_v29 = vpop.eup %3082 }
 0x19f   :  { %v1039_v35 = vpop.f32.mrb[4].mxu1 }
 0x1a0   :  { %v1040_v61 = vadd.f32 %v1039_v35, %v4058_v20  ;;  %v1041_v59 = vpop.f32.mrb[5].mxu1 }
 0x1a1   :  { %v1042_v22 = vadd.f32 %v1041_v59, %v4060_v39  ;;  %v1043_v53 = vpop.f32.mrb[6].mxu1 }
 0x1a2   :  { %v1078_v41 = vrot.slane %v1040_v61, 1  ;;  %v1044_v51 = vpop.f32.mrb[7].mxu1 }
 0x1a3   :  { %v1088_v47 = vrot.slane %v1042_v22, 1 }
 0x1a4   :  { %v1080_v11 = vadd.f32 %v1078_v41, %v4066_v33 }
 0x1a5   :  { %v1090_v55 = vmul.f32 %v3083_v29, %v1088_v47  ;;  %v4085_v29 = vld [vmem:[#allocation7] ss:$24 sps:$4 sm:$0xff]  }
 0x1a6   :  { %v2813_v2 = vmul.f32 -1.442695, %v1080_v11  ;;  %v4088_v11 = vld [vmem:[#allocation7 + $0x34] ss:$24 sps:$4 sm:$0xff]  }
 0x1a7   :  { %v1091_v59 = vadd.f32 %v1090_v55, %v4071_v43  ;;  %v5613_v55 = vld [vmem:[#allocation39_spill] sm:$0xff] }
 0x1a8   :  { %3084 = vpow2.f32 %v2813_v2  ;;  %v5614_v2 = vld [vmem:[#allocation41_spill] sm:$0xff] }
 0x1b2   :  { %v3085_v37 = vpop.eup %3084 }
 0x1b3   :  { %v1084_v35 = vadd.f32 1.0, %v3085_v37  ;;  %v4096_v37 = vld [vmem:[#allocation7 + $0x64] ss:$24 sps:$4 sm:$0xff]  }
 0x1b5   :  { %3086 = vrcp.f32 %v1084_v35  ;;  %v5615_v35 = vld [vmem:[#allocation43_spill] sm:$0xff] }
 0x1b6   :  { %3088 = vtanh.f32 %v1091_v59  ;;  %v5616_v59 = vld [vmem:[#allocation45_spill] sm:$0xff] }
 0x1bf   :  { %v3087_v63 = vpop.eup %3086 }
 0x1c0   :  { %v1093_v10 = vsub.f32 1.0, %v3087_v63  ;;  %v3089_v61 = vpop.eup %3088  ;;  %v1095_v53 = vmul.f32 0.0, %v3087_v63  ;;  %v4101_v63 = vld [vmem:[#allocation7 + $0x60] ss:$24 sps:$4 sm:$0xff]  }
 0x1c1   :  { %5617 = vst [vmem:[#allocation35_spill] sm:$0xff] %v4101_v63 }
 0x1c2   :  { %v1094_v22 = vmul.f32 %v3089_v61, %v1093_v10  ;;  %v4104_v10 = vld [vmem:[#allocation7 + $0x94] ss:$24 sps:$4 sm:$0xff]  }
 0x1c3   :  { %5618 = vst [vmem:[#allocation37_spill] sm:$0xff] %v4104_v10  ;;  %v5619_v61 = vld [vmem:[#allocation47_spill] sm:$0xff] }
 0x1c4   :  { %v4074_v41 = vadd.f32 %v1095_v53, %v1094_v22  ;;  %v5620_v22 = vld [vmem:[#allocation49_spill] sm:$0xff]  ;;  %v4109_v53 = vld [vmem:[#allocation7 + $0x90] ss:$24 sps:$4 sm:$0xff]  }
 0x1c6   :  { %5610 = vst [vmem:[#allocation71_spill] sm:$0xff] %v4074_v41  ;;  %v1098_v51 = vrot.slane %v4074_v41, 7 }
 0x1c8   :  { %v1101_v47 = vpack.c.bf16 %v1098_v51, %v1098_v51  ;;  %v5621_v51 = vld [vmem:[#allocation51_spill] sm:$0xff] }
 0x1ca   :  { %1134 = vmatprep.mubr.bf16.mxu0 %v1101_v47  ;;  %1175 = vmatprep.mubr.bf16.mxu1 %v1101_v47 }
 0x1cb   :  { %1135 = vmatmul.mubr.bf16.vlgmr.msra.gmra.mrb[16].mxu0 %v4079_v16  ;;  %1176 = vmatmul.mubr.bf16.vlgmr.msra.gmra.mrb[8].mxu1 %v4079_v16 }
 0x1cc   :  { %1185 = vmatpush1.bf16.msra.mxu0 %v5611_v3  ;;  %1216 = vmatprep.mubr.bf16.mxu0 %v1101_v47  ;;  %v5622_v47 = vld [vmem:[#allocation53_spill] sm:$0xff] }
 0x1cd   :  { %1186 = vmatprep.subr.bf16.mxu0 %v5612_v26  ;;  %1304 = vmatpush1.bf16.msra.mxu1 %v4085_v29 }
 0x1ce   :  { %1305 = vmatprep.subr.bf16.mxu1 %v4088_v11 }
 0x1d0   :  { %1187 = vmatpush1.bf16.msra.mxu0 %v5613_v55 }
 0x1d1   :  { %1188 = vmatprep.subr.bf16.mxu0 %v5614_v2  ;;  %1306 = vmatpush1.bf16.msra.mxu1 %v4093_v31 }
 0x1d2   :  { %1307 = vmatprep.subr.bf16.mxu1 %v4096_v37 }
 0x1d4   :  { %1189 = vmatpush1.bf16.msra.mxu0 %v5615_v35 }
 0x1d5   :  { %1190 = vmatprep.subr.bf16.mxu0 %v5616_v59  ;;  %1308 = vmatpush1.bf16.msra.mxu1 %v4101_v63  ;;  %v5623_v63 = vld [vmem:[#allocation55_spill] sm:$0xff] }
 0x1d6   :  { %1309 = vmatprep.subr.bf16.mxu1 %v4104_v10  ;;  %v5624_v10 = vld [vmem:[#allocation56_spill] sm:$0xff] }
 0x1d8   :  { %1191 = vmatpush1.bf16.msra.mxu0 %v5619_v61 }
 0x1d9   :  { %1192 = vmatprep.subr.bf16.mxu0 %v5620_v22  ;;  %1310 = vmatpush1.bf16.msra.mxu1 %v4109_v53 }
 0x1da   :  { %1311 = vmatprep.subr.bf16.mxu1 %v3670_v21  ;;  %v5625_v21 = vld [vmem:[#allocation57_spill] sm:$0xff] }
 0x1dc   :  { %1193 = vmatpush1.bf16.msra.mxu0 %v5621_v51 }
 0x1dd   :  { %1194 = vmatprep.subr.bf16.mxu0 %v5622_v47  ;;  %1312 = vmatpush1.bf16.msra.mxu1 %v3672_v23  ;;  %v5626_v23 = vld [vmem:[#allocation58_spill] sm:$0xff] }
 0x1de   :  { %1313 = vmatprep.subr.bf16.mxu1 %v3676_v25  ;;  %v5627_v25 = vld [vmem:[#allocation59_spill] sm:$0xff] }
 0x1e0   :  { %1195 = vmatpush1.bf16.msra.mxu0 %v5623_v63 }
 0x1e1   :  { %1196 = vmatprep.subr.bf16.mxu0 %v5624_v10  ;;  %1314 = vmatpush1.bf16.msra.mxu1 %v3680_v27  ;;  %v5628_v27 = vld [vmem:[#allocation60_spill] sm:$0xff] }
 0x1e2   :  { %1315 = vmatprep.subr.bf16.mxu1 %v3683_v28  ;;  %v5629_v28 = vld [vmem:[#allocation61_spill] sm:$0xff] }
 0x1e4   :  { %1197 = vmatpush1.bf16.msra.mxu0 %v3882_v14 }
 0x1e5   :  { %1198 = vmatprep.subr.bf16.mxu0 %v3885_v1  ;;  %1316 = vmatpush1.bf16.msra.mxu1 %v3687_v30  ;;  %v5630_v30 = vld [vmem:[#allocation62_spill] sm:$0xff] }
 0x1e6   :  { %1317 = vmatprep.subr.bf16.mxu1 %v3692_v32  ;;  %v4158_v32 = vld [vmem:[#allocation7 + $0xc] ss:$24 sps:$4 sm:$0xff]  }
 0x1e7   :  { %5631 = vst [vmem:[#allocation39_spill] sm:$0xff] %v4158_v32 }
 0x1e8   :  { %1199 = vmatpush1.bf16.msra.mxu0 %v3890_v24 }
 0x1e9   :  { %1200 = vmatprep.subr.bf16.mxu0 %v3894_v18  ;;  %1318 = vmatpush1.bf16.msra.mxu1 %v3699_v34  ;;  %v5632_v34 = vld [vmem:[#allocation33_spill] sm:$0xff] }
 0x1ea   :  { %1319 = vmatprep.subr.bf16.mxu1 %v3707_v36  ;;  %v4164_v36 = vld [vmem:[#allocation7 + $0x8] ss:$24 sps:$4 sm:$0xff]  }
 0x1eb   :  { %5633 = vst [vmem:[#allocation41_spill] sm:$0xff] %v4164_v36 }
 0x1ec   :  { %1201 = vmatpush1.bf16.msra.mxu0 %v3898_v13 }
 0x1ed   :  { %1202 = vmatprep.subr.bf16.mxu0 %v3902_v8  ;;  %1320 = vmatpush1.bf16.msra.mxu1 %v3712_v38  ;;  %v4167_v38 = vld [vmem:[#allocation7 + $0x3c] ss:$24 sps:$4 sm:$0xff]  }
 0x1ee   :  { %1321 = vmatprep.subr.bf16.mxu1 %v3718_v40  ;;  %5634 = vst [vmem:[#allocation43_spill] sm:$0xff] %v4167_v38  ;;  %v5635_v40 = vld [vmem:[#allocation15_spill] sm:$0xff] }
 0x1f0   :  { %1203 = vmatpush1.bf16.msra.mxu0 %v3906_v5 }
 0x1f1   :  { %1204 = vmatprep.subr.bf16.mxu0 %v5625_v21  ;;  %1322 = vmatpush1.bf16.msra.mxu1 %v3724_v42  ;;  %v5636_v42 = vld [vmem:[#allocation16_spill] sm:$0xff] }
 0x1f2   :  { %1323 = vmatprep.subr.bf16.mxu1 %v3732_v44  ;;  %v5637_v44 = vld [vmem:[#allocation17_spill] sm:$0xff] }
 0x1f4   :  { %1205 = vmatpush1.bf16.msra.mxu0 %v5626_v23 }
 0x1f5   :  { %1206 = vmatprep.subr.bf16.mxu0 %v5627_v25  ;;  %1324 = vmatpush1.bf16.msra.mxu1 %v3736_v46  ;;  %v5638_v46 = vld [vmem:[#allocation18_spill] sm:$0xff] }
 0x1f6   :  { %1325 = vmatprep.subr.bf16.mxu1 %v3742_v48  ;;  %v5639_v48 = vld [vmem:[#allocation19_spill] sm:$0xff] }
 0x1f8   :  { %1207 = vmatpush1.bf16.msra.mxu0 %v5628_v27 }
 0x1f9   :  { %1208 = vmatprep.subr.bf16.mxu0 %v5629_v28  ;;  %1326 = vmatpush1.bf16.msra.mxu1 %v3748_v50  ;;  %v5640_v50 = vld [vmem:[#allocation20_spill] sm:$0xff] }
 0x1fa   :  { %1327 = vmatprep.subr.bf16.mxu1 %v3756_v52  ;;  %v5641_v52 = vld [vmem:[#allocation21_spill] sm:$0xff] }
 0x1fc   :  { %1209 = vmatpush1.bf16.msra.mxu0 %v5630_v30 }
 0x1fd   :  { %1210 = vmatprep.subr.bf16.mxu0 %v3934_v7  ;;  %1328 = vmatpush1.bf16.msra.mxu1 %v3760_v54  ;;  %v5642_v54 = vld [vmem:[#allocation22_spill] sm:$0xff] }
 0x1fe   :  { %1329 = vmatprep.subr.bf16.mxu1 %v3766_v56  ;;  %v5643_v56 = vld [vmem:[#allocation23_spill] sm:$0xff] }
 0x200   :  { %1211 = vmatpush1.bf16.msra.mxu0 %v3938_v9 }
 0x201   :  { %1212 = vmatprep.subr.bf16.mxu0 %v3942_v12  ;;  %1330 = vmatpush1.bf16.msra.mxu1 %v3772_v58  ;;  %v5644_v58 = vld [vmem:[#allocation24_spill] sm:$0xff] }
 0x202   :  { %1331 = vmatprep.subr.bf16.mxu1 %v3780_v60  ;;  %v5645_v60 = vld [vmem:[#allocation25_spill] sm:$0xff] }
 0x204   :  { %1213 = vmatpush1.bf16.msra.mxu0 %v3946_v15 }
 0x205   :  { %1214 = vmatprep.subr.bf16.mxu0 %v3950_v17  ;;  %1332 = vmatpush1.bf16.msra.mxu1 %v3784_v62  ;;  %v5646_v62 = vld [vmem:[#allocation26_spill] sm:$0xff] }
 0x206   :  { %1333 = vmatprep.subr.bf16.mxu1 %v3790_v0  ;;  %v5647_v0 = vld [vmem:[#allocation27_spill] sm:$0xff] }
 0x208   :  { %1215 = vmatpush1.bf16.msra.mxu0 %v3954_v19 }
 0x209   :  { %1344 = vmatprep.subr.bf16.mxu0 %v4158_v32  ;;  %1334 = vmatpush1.bf16.msra.mxu1 %v3796_v4  ;;  %v5648_v4 = vld [vmem:[#allocation28_spill] sm:$0xff] }
 0x20a   :  { %1385 = vmatprep.subr.bf16.mxu1 %v5632_v34  ;;  %v5650_v34 = vld [vmem:[#allocation30_spill] sm:$0xff]  ;;  %v5668_v32 = vld [vmem:[#allocation68_spill] sm:$0xff] }
 0x20b   :  { %1217 = vmatmul.mubr.bf16.vlgmr.msra.gmra.mrb[20].mxu0 %v4079_v16  ;;  %v5649_v16 = vld [vmem:[#allocation29_spill] sm:$0xff] }
 0x20c   :  { %1345 = vmatpush1.bf16.msra.mxu0 %v4164_v36 }
 0x20d   :  { %1346 = vmatprep.subr.bf16.mxu0 %v4167_v38  ;;  %v5667_v38 = vld [vmem:[#allocation67_spill] sm:$0xff] }
 0x210   :  { %1347 = vmatpush1.bf16.msra.mxu0 %v5635_v40  ;;  %v5651_v40 = vld [vmem:[#allocation31_spill] sm:$0xff] }
 0x211   :  { %1348 = vmatprep.subr.bf16.mxu0 %v5636_v42  ;;  %v5652_v42 = vld [vmem:[#allocation32_spill] sm:$0xff] }
 0x214   :  { %1349 = vmatpush1.bf16.msra.mxu0 %v5637_v44  ;;  %v5653_v44 = vld [vmem:[#allocation34_spill] sm:$0xff] }
 0x215   :  { %1350 = vmatprep.subr.bf16.mxu0 %v5638_v46  ;;  %v5654_v46 = vld [vmem:[#allocation36_spill] sm:$0xff] }
 0x218   :  { %1351 = vmatpush1.bf16.msra.mxu0 %v5639_v48  ;;  %v5655_v48 = vld [vmem:[#allocation38_spill] sm:$0xff] }
 0x219   :  { %1352 = vmatprep.subr.bf16.mxu0 %v5640_v50  ;;  %v5656_v50 = vld [vmem:[#allocation40_spill] sm:$0xff] }
 0x21c   :  { %1353 = vmatpush1.bf16.msra.mxu0 %v5641_v52  ;;  %v5657_v52 = vld [vmem:[#allocation42_spill] sm:$0xff] }
 0x21d   :  { %1354 = vmatprep.subr.bf16.mxu0 %v5642_v54  ;;  %v5658_v54 = vld [vmem:[#allocation44_spill] sm:$0xff] }
 0x220   :  { %1355 = vmatpush1.bf16.msra.mxu0 %v5643_v56  ;;  %v5659_v56 = vld [vmem:[#allocation46_spill] sm:$0xff] }
 0x221   :  { %1356 = vmatprep.subr.bf16.mxu0 %v5644_v58  ;;  %v5660_v58 = vld [vmem:[#allocation48_spill] sm:$0xff] }
 0x224   :  { %1357 = vmatpush1.bf16.msra.mxu0 %v5645_v60  ;;  %v5661_v60 = vld [vmem:[#allocation50_spill] sm:$0xff] }
 0x225   :  { %1358 = vmatprep.subr.bf16.mxu0 %v5646_v62  ;;  %v5662_v62 = vld [vmem:[#allocation52_spill] sm:$0xff] }
 0x228   :  { %1359 = vmatpush1.bf16.msra.mxu0 %v5647_v0  ;;  %v5663_v0 = vld [vmem:[#allocation54_spill] sm:$0xff] }
 0x229   :  { %1360 = vmatprep.subr.bf16.mxu0 %v5648_v4  ;;  %v4199_v4 = vld [vmem:[#allocation7 + $0x4] ss:$24 sps:$4 sm:$0xff]  }
 0x22a   :  { %5664 = vst [vmem:[#allocation45_spill] sm:$0xff] %v4199_v4 }
 0x22c   :  { %1361 = vmatpush1.bf16.msra.mxu0 %v5649_v16 }
 0x22d   :  { %1362 = vmatprep.subr.bf16.mxu0 %v5650_v34 }
 0x230   :  { %1363 = vmatpush1.bf16.msra.mxu0 %v5651_v40  ;;  %v5665_v40 = vld [vmem:[#allocation65_spill] sm:$0xff] }
 0x231   :  { %1364 = vmatprep.subr.bf16.mxu0 %v5652_v42 }
 0x234   :  { %1365 = vmatpush1.bf16.msra.mxu0 %v5653_v44 }
 0x235   :  { %1366 = vmatprep.subr.bf16.mxu0 %v5654_v46 }
 0x238   :  { %1367 = vmatpush1.bf16.msra.mxu0 %v5655_v48  ;;  %v5666_v48 = vld [vmem:[#allocation66_spill] sm:$0xff] }
 0x239   :  { %1368 = vmatprep.subr.bf16.mxu0 %v5656_v50 }
 0x23c   :  { %1369 = vmatpush1.bf16.msra.mxu0 %v5657_v52 }
 0x23d   :  { %1370 = vmatprep.subr.bf16.mxu0 %v5658_v54 }
 0x240   :  { %1371 = vmatpush1.bf16.msra.mxu0 %v5659_v56 }
 0x241   :  { %1372 = vmatprep.subr.bf16.mxu0 %v5660_v58 }
 0x244   :  { %1373 = vmatpush1.bf16.msra.mxu0 %v5661_v60 }
 0x245   :  { %1374 = vmatprep.subr.bf16.mxu0 %v5662_v62 }
 0x248   :  { %1375 = vmatpush1.bf16.msra.mxu0 %v5663_v0 }
 0x249   :  { %1502 = vmatprep.subr.bf16.mxu0 %v4199_v4 }
 0x29e   :  { %v1136_v16 = vpop.f32.mrb[16].mxu0  ;;  %v1177_v34 = vpop.f32.mrb[8].mxu1 }
 0x29f   :  { %v1137_v42 = vadd.f32 %v1136_v16, %v5665_v40  ;;  %v1138_v44 = vpop.f32.mrb[17].mxu0  ;;  %v1179_v46 = vpop.f32.mrb[9].mxu1 }
 0x2a0   :  { %v1139_v50 = vadd.f32 %v1138_v44, %v5666_v48  ;;  %v1140_v52 = vpop.f32.mrb[18].mxu0  ;;  %v1181_v54 = vpop.f32.mrb[10].mxu1  ;;  %v1180_v44 = vadd.f32 %v1179_v46, %v4040_v49 }
 0x2a1   :  { %v1226_v56 = vrot.slane %v1137_v42, 7  ;;  %v1141_v58 = vpop.f32.mrb[19].mxu0  ;;  %v1182_v60 = vpop.f32.mrb[11].mxu1  ;;  %v5669_v52 = vld [vmem:[#allocation69_spill] sm:$0xff] }
 0x2a2   :  { %v1236_v62 = vrot.slane %v1139_v50, 7  ;;  %v1178_v54 = vadd.f32 %v1177_v34, %v5669_v52  ;;  %v1259_v58 = vrot.slane %v1180_v44, 2 }
 0x2a3   :  { %v1228_v0 = vadd.f32 %v1226_v56, %v5667_v38  ;;  %v1254_v56 = vrot.slane %v4054_v45, 7 }
 0x2a4   :  { %v1238_v19 = vadd.f32 %v1236_v62, %v5668_v32  ;;  %v1246_v60 = vrot.slane %v1178_v54, 7 }
 0x2a5   :  { %v2814_v36 = vmul.f32 -1.442695, %v1228_v0  ;;  %v1261_v0 = vadd.f32 %v1259_v58, %v4050_v6 }
 0x2a6   :  { %v2815_v4 = vmul.f32 -1.442695, %v1238_v19 }
 0x2a7   :  { %3090 = vpow2.f32 %v2814_v36  ;;  %v2816_v19 = vmul.f32 -1.442695, %v1261_v0 }
 0x2a8   :  { %3092 = vpow2.f32 %v2815_v4 }
 0x2b1   :  { %v3091_v17 = vpop.eup %3090 }
 0x2b2   :  { %v1232_v16 = vadd.f32 1.0, %v3091_v17  ;;  %v3093_v40 = vpop.eup %3092 }
 0x2b3   :  { %v1242_v42 = vadd.f32 1.0, %v3093_v40 }
 0x2b4   :  { %3094 = vrcp.f32 %v1232_v16 }
 0x2b5   :  { %3096 = vrcp.f32 %v1242_v42 }
 0x2be   :  { %v3095_v50 = vpop.eup %3094 }
 0x2bf   :  { %v1248_v48 = vmul.f32 %v3095_v50, %v1246_v60  ;;  %v3097_v17 = vpop.eup %3096 }
 0x2c0   :  { %v1251_v4 = vsub.f32 1.0, %v3097_v17  ;;  %v1256_v34 = vmul.f32 %v3097_v17, %v1254_v56 }
 0x2c1   :  { %v1249_v36 = vadd.f32 %v1248_v48, %v4048_v57 }
 0x2c3   :  { %3098 = vtanh.f32 %v1249_v36 }
 0x2c4   :  { %3100 = vpow2.f32 %v2816_v19 }
 0x2cd   :  { %v3099_v46 = vpop.eup %3098 }
 0x2ce   :  { %v1252_v62 = vmul.f32 %v3099_v46, %v1251_v4  ;;  %v3101_v16 = vpop.eup %3100 }
 0x2cf   :  { %v1265_v44 = vadd.f32 1.0, %v3101_v16 }
 0x2d0   :  { %v4211_v40 = vadd.f32 %v1256_v34, %v1252_v62 }
 0x2d1   :  { %3102 = vrcp.f32 %v1265_v44  ;;  %v1286_v44 = vrot.slane %v4074_v41, 1  ;;  %v4392_v41 = vld [vmem:[#allocation7 + $0x1b8] ss:$24 sps:$4 sm:$0xff]  }
 0x2d2   :  { %5708 = vst [vmem:[#allocation34_spill] sm:$0xff] %v4392_v41 }
 0x2db   :  { %v3103_v19 = vpop.eup %3102 }
 0x2de   :  { %v1218_v54 = vpop.f32.mrb[20].mxu0 }
 0x2df   :  { %v1219_v42 = vadd.f32 %v1218_v54, %v4058_v20  ;;  %v1220_v58 = vpop.f32.mrb[21].mxu0 }
 0x2e0   :  { %v1221_v48 = vadd.f32 %v1220_v58, %v4060_v39  ;;  %v1222_v60 = vpop.f32.mrb[22].mxu0 }
 0x2e1   :  { %v1269_v50 = vrot.slane %v1219_v42, 2  ;;  %v1223_v0 = vpop.f32.mrb[23].mxu0 }
 0x2e2   :  { %v1279_v36 = vrot.slane %v1221_v48, 2 }
 0x2e3   :  { %v1271_v45 = vadd.f32 %v1269_v50, %v4066_v33 }
 0x2e4   :  { %v1281_v4 = vmul.f32 %v3103_v19, %v1279_v36  ;;  %v5672_v19 = vld [vmem:[#allocation37_spill] sm:$0xff] }
 0x2e5   :  { %v2817_v17 = vmul.f32 -1.442695, %v1271_v45  ;;  %v1293_v45 = vpack.c.bf16 %v4211_v40, %v4211_v40 }
 0x2e6   :  { %v1282_v62 = vadd.f32 %v1281_v4, %v4071_v43  ;;  %v4338_v4 = vld [vmem:[#allocation7 + $0x14] ss:$24 sps:$4 sm:$0xff]  }
 0x2e7   :  { %3104 = vpow2.f32 %v2817_v17  ;;  %v4223_v36 = vshrl.u32 %v1293_v45, 16  ;;  %5689 = vst [vmem:[#allocation16_spill] sm:$0xff] %v4338_v4  ;;  %v5691_v17 = vld [vmem:[#allocation43_spill] sm:$0xff] }
 0x2e8   :  { %v4374_v45 = vld [vmem:[#allocation7 + $0x128] ss:$24 sps:$4 sm:$0xff]  }
 0x2e9   :  { %5702 = vst [vmem:[#allocation27_spill] sm:$0xff] %v4374_v45 }
 0x2f1   :  { %v3105_v56 = vpop.eup %3104 }
 0x2f2   :  { %v1275_v46 = vadd.f32 1.0, %v3105_v56  ;;  %v4344_v56 = vld [vmem:[#allocation7 + $0x38] ss:$24 sps:$4 sm:$0xff]  }
 0x2f3   :  { %5692 = vst [vmem:[#allocation17_spill] sm:$0xff] %v4344_v56 }
 0x2f4   :  { %3106 = vrcp.f32 %v1275_v46  ;;  %v4347_v46 = vld [vmem:[#allocation7 + $0x6c] ss:$24 sps:$4 sm:$0xff]  }
 0x2f5   :  { %3108 = vtanh.f32 %v1282_v62  ;;  %5693 = vst [vmem:[#allocation18_spill] sm:$0xff] %v4347_v46  ;;  %v4350_v62 = vld [vmem:[#allocation7 + $0x68] ss:$24 sps:$4 sm:$0xff]  }
 0x2f6   :  { %5694 = vst [vmem:[#allocation19_spill] sm:$0xff] %v4350_v62 }
 0x2fe   :  { %v3107_v34 = vpop.eup %3106 }
 0x2ff   :  { %v1284_v16 = vsub.f32 1.0, %v3107_v34  ;;  %v3109_v54 = vpop.eup %3108  ;;  %v1288_v58 = vmul.f32 %v3107_v34, %v1286_v44  ;;  %v4353_v34 = vld [vmem:[#allocation7 + $0x9c] ss:$24 sps:$4 sm:$0xff]   ;;  %v4359_v44 = vld [vmem:[#allocation7 + $0xcc] ss:$24 sps:$4 sm:$0xff]  }
 0x300   :  { %5695 = vst [vmem:[#allocation20_spill] sm:$0xff] %v4353_v34  ;;  %5697 = vst [vmem:[#allocation22_spill] sm:$0xff] %v4359_v44 }
 0x301   :  { %v1285_v42 = vmul.f32 %v3109_v54, %v1284_v16  ;;  %v4356_v16 = vld [vmem:[#allocation7 + $0x98] ss:$24 sps:$4 sm:$0xff]   ;;  %v4362_v54 = vld [vmem:[#allocation7 + $0xc8] ss:$24 sps:$4 sm:$0xff]  }
 0x302   :  { %5696 = vst [vmem:[#allocation21_spill] sm:$0xff] %v4356_v16  ;;  %5698 = vst [vmem:[#allocation23_spill] sm:$0xff] %v4362_v54 }
 0x303   :  { %v4218_v48 = vadd.f32 %v1288_v58, %v1285_v42  ;;  %v4365_v42 = vld [vmem:[#allocation7 + $0xfc] ss:$24 sps:$4 sm:$0xff]   ;;  %v4368_v58 = vld [vmem:[#allocation7 + $0xf8] ss:$24 sps:$4 sm:$0xff]  }
 0x304   :  { %5699 = vst [vmem:[#allocation24_spill] sm:$0xff] %v4365_v42  ;;  %5700 = vst [vmem:[#allocation25_spill] sm:$0xff] %v4368_v58 }
 0x305   :  { %5670 = vst [vmem:[#allocation47_spill] sm:$0xff] %v4218_v48  ;;  %v1291_v60 = vrot.slane %v4218_v48, 5 }
 0x307   :  { %v1294_v50 = vpack.c.bf16 %v1291_v60, %v1291_v60  ;;  %v4371_v60 = vld [vmem:[#allocation7 + $0x12c] ss:$24 sps:$4 sm:$0xff]  }
 0x308   :  { %5701 = vst [vmem:[#allocation26_spill] sm:$0xff] %v4371_v60 }
 0x309   :  { %v1299_v0 = vshrl.u32 %v1294_v50, 16  ;;  %v4377_v50 = vld [vmem:[#allocation7 + $0x15c] ss:$24 sps:$4 sm:$0xff]  }
 0x30a   :  { %5703 = vst [vmem:[#allocation28_spill] sm:$0xff] %v4377_v50 }
 0x30b   :  { %1335 = vmatprep.mubr.bf16.mxu1 %v1299_v0  ;;  %1376 = vmatprep.mubr.bf16.mxu0 %v1299_v0 }
 0x30c   :  { %1336 = vmatmul.mubr.bf16.vlgmr.msra.gmra.mrb[12].mxu1 %v4223_v36  ;;  %1377 = vmatmul.mubr.bf16.vlgmr.msra.gmra.mrb[24].mxu0 %v4223_v36 }
 0x30d   :  { %1386 = vmatpush1.bf16.msra.mxu1 %v5611_v3  ;;  %1417 = vmatprep.mubr.bf16.mxu1 %v1299_v0  ;;  %v5671_v3 = vld [vmem:[#allocation35_spill] sm:$0xff]  ;;  %v4380_v0 = vld [vmem:[#allocation7 + $0x158] ss:$24 sps:$4 sm:$0xff]  }
 0x30e   :  { %1387 = vmatprep.subr.bf16.mxu1 %v5612_v26  ;;  %1503 = vmatpush1.bf16.msra.mxu0 %v4085_v29  ;;  %v4242_v26 = vld [vmem:[#allocation7 + $0xc4] ss:$24 sps:$4 sm:$0xff]   ;;  %5704 = vst [vmem:[#allocation29_spill] sm:$0xff] %v4380_v0 }
 0x30f   :  { %1504 = vmatprep.subr.bf16.mxu0 %v4088_v11 }
 0x311   :  { %1388 = vmatpush1.bf16.msra.mxu1 %v5613_v55  ;;  %v4247_v55 = vld [vmem:[#allocation7 + $0xc0] ss:$24 sps:$4 sm:$0xff]  }
 0x312   :  { %1389 = vmatprep.subr.bf16.mxu1 %v5614_v2  ;;  %1505 = vmatpush1.bf16.msra.mxu0 %v4093_v31  ;;  %v4250_v2 = vld [vmem:[#allocation7 + $0xf4] ss:$24 sps:$4 sm:$0xff]  }
 0x313   :  { %1506 = vmatprep.subr.bf16.mxu0 %v4096_v37 }
 0x315   :  { %1390 = vmatpush1.bf16.msra.mxu1 %v5615_v35  ;;  %v4255_v35 = vld [vmem:[#allocation7 + $0xf0] ss:$24 sps:$4 sm:$0xff]  }
 0x316   :  { %1391 = vmatprep.subr.bf16.mxu1 %v5616_v59  ;;  %1507 = vmatpush1.bf16.msra.mxu0 %v5671_v3  ;;  %v4258_v59 = vld [vmem:[#allocation7 + $0x124] ss:$24 sps:$4 sm:$0xff]  }
 0x317   :  { %1508 = vmatprep.subr.bf16.mxu0 %v5672_v19 }
 0x319   :  { %1392 = vmatpush1.bf16.msra.mxu1 %v5619_v61  ;;  %v4263_v61 = vld [vmem:[#allocation7 + $0x120] ss:$24 sps:$4 sm:$0xff]  }
 0x31a   :  { %1393 = vmatprep.subr.bf16.mxu1 %v5620_v22  ;;  %1509 = vmatpush1.bf16.msra.mxu0 %v4109_v53  ;;  %v4266_v22 = vld [vmem:[#allocation7 + $0x154] ss:$24 sps:$4 sm:$0xff]  }
 0x31b   :  { %1510 = vmatprep.subr.bf16.mxu0 %v4242_v26 }
 0x31d   :  { %1394 = vmatpush1.bf16.msra.mxu1 %v5621_v51  ;;  %v4306_v51 = vld [vmem:[#allocation7 + $0x244] ss:$24 sps:$4 sm:$0xff]  }
 0x31e   :  { %1395 = vmatprep.subr.bf16.mxu1 %v5622_v47  ;;  %1511 = vmatpush1.bf16.msra.mxu0 %v4247_v55  ;;  %5678 = vst [vmem:[#allocation57_spill] sm:$0xff] %v4306_v51  ;;  %v4311_v47 = vld [vmem:[#allocation7 + $0x240] ss:$24 sps:$4 sm:$0xff]  }
 0x31f   :  { %1512 = vmatprep.subr.bf16.mxu0 %v4250_v2  ;;  %5679 = vst [vmem:[#allocation58_spill] sm:$0xff] %v4311_v47 }
 0x321   :  { %1396 = vmatpush1.bf16.msra.mxu1 %v5623_v63  ;;  %v4271_v63 = vld [vmem:[#allocation7 + $0x150] ss:$24 sps:$4 sm:$0xff]  }
 0x322   :  { %1397 = vmatprep.subr.bf16.mxu1 %v5624_v10  ;;  %1513 = vmatpush1.bf16.msra.mxu0 %v4255_v35  ;;  %v4274_v10 = vld [vmem:[#allocation7 + $0x184] ss:$24 sps:$4 sm:$0xff]  }
 0x323   :  { %1514 = vmatprep.subr.bf16.mxu0 %v4258_v59 }
 0x325   :  { %1398 = vmatpush1.bf16.msra.mxu1 %v3882_v14  ;;  %v4282_v14 = vld [vmem:[#allocation7 + $0x1b4] ss:$24 sps:$4 sm:$0xff]  }
 0x326   :  { %1399 = vmatprep.subr.bf16.mxu1 %v3885_v1  ;;  %1515 = vmatpush1.bf16.msra.mxu0 %v4263_v61  ;;  %v4279_v1 = vld [vmem:[#allocation7 + $0x180] ss:$24 sps:$4 sm:$0xff]  }
 0x327   :  { %1516 = vmatprep.subr.bf16.mxu0 %v4266_v22 }
 0x329   :  { %1400 = vmatpush1.bf16.msra.mxu1 %v3890_v24  ;;  %v4290_v24 = vld [vmem:[#allocation7 + $0x1e4] ss:$24 sps:$4 sm:$0xff]  }
 0x32a   :  { %1401 = vmatprep.subr.bf16.mxu1 %v3894_v18  ;;  %1517 = vmatpush1.bf16.msra.mxu0 %v4271_v63  ;;  %v4287_v18 = vld [vmem:[#allocation7 + $0x1b0] ss:$24 sps:$4 sm:$0xff]   ;;  %5674 = vst [vmem:[#allocation51_spill] sm:$0xff] %v4290_v24 }
 0x32b   :  { %1518 = vmatprep.subr.bf16.mxu0 %v4274_v10  ;;  %5673 = vst [vmem:[#allocation49_spill] sm:$0xff] %v4287_v18 }
 0x32d   :  { %1402 = vmatpush1.bf16.msra.mxu1 %v3898_v13  ;;  %v4298_v13 = vld [vmem:[#allocation7 + $0x214] ss:$24 sps:$4 sm:$0xff]  }
 0x32e   :  { %1403 = vmatprep.subr.bf16.mxu1 %v3902_v8  ;;  %1519 = vmatpush1.bf16.msra.mxu0 %v4279_v1  ;;  %v4295_v8 = vld [vmem:[#allocation7 + $0x1e0] ss:$24 sps:$4 sm:$0xff]   ;;  %5676 = vst [vmem:[#allocation55_spill] sm:$0xff] %v4298_v13 }
 0x32f   :  { %1520 = vmatprep.subr.bf16.mxu0 %v4282_v14  ;;  %5675 = vst [vmem:[#allocation53_spill] sm:$0xff] %v4295_v8 }
 0x331   :  { %1404 = vmatpush1.bf16.msra.mxu1 %v3906_v5  ;;  %v4303_v5 = vld [vmem:[#allocation7 + $0x210] ss:$24 sps:$4 sm:$0xff]  }
 0x332   :  { %1405 = vmatprep.subr.bf16.mxu1 %v5625_v21  ;;  %1521 = vmatpush1.bf16.msra.mxu0 %v4287_v18  ;;  %5677 = vst [vmem:[#allocation56_spill] sm:$0xff] %v4303_v5  ;;  %v4314_v21 = vld [vmem:[#allocation7 + $0x274] ss:$24 sps:$4 sm:$0xff]  }
 0x333   :  { %1522 = vmatprep.subr.bf16.mxu0 %v4290_v24  ;;  %5680 = vst [vmem:[#allocation59_spill] sm:$0xff] %v4314_v21 }
 0x335   :  { %1406 = vmatpush1.bf16.msra.mxu1 %v5626_v23  ;;  %v4319_v23 = vld [vmem:[#allocation7 + $0x270] ss:$24 sps:$4 sm:$0xff]  }
 0x336   :  { %1407 = vmatprep.subr.bf16.mxu1 %v5627_v25  ;;  %1523 = vmatpush1.bf16.msra.mxu0 %v4295_v8  ;;  %5681 = vst [vmem:[#allocation60_spill] sm:$0xff] %v4319_v23  ;;  %v4322_v25 = vld [vmem:[#allocation7 + $0x2a4] ss:$24 sps:$4 sm:$0xff]  }
 0x337   :  { %1524 = vmatprep.subr.bf16.mxu0 %v4298_v13  ;;  %5682 = vst [vmem:[#allocation61_spill] sm:$0xff] %v4322_v25 }
 0x339   :  { %1408 = vmatpush1.bf16.msra.mxu1 %v5628_v27  ;;  %v4327_v27 = vld [vmem:[#allocation7 + $0x2a0] ss:$24 sps:$4 sm:$0xff]  }
 0x33a   :  { %1409 = vmatprep.subr.bf16.mxu1 %v5629_v28  ;;  %1525 = vmatpush1.bf16.msra.mxu0 %v4303_v5  ;;  %5684 = vst [vmem:[#allocation62_spill] sm:$0xff] %v4327_v27  ;;  %v4330_v28 = vld [vmem:[#allocation7 + $0x2d4] ss:$24 sps:$4 sm:$0xff]  }
 0x33b   :  { %1526 = vmatprep.subr.bf16.mxu0 %v4306_v51  ;;  %5685 = vst [vmem:[#allocation33_spill] sm:$0xff] %v4330_v28 }
 0x33d   :  { %1410 = vmatpush1.bf16.msra.mxu1 %v5630_v30  ;;  %v4335_v30 = vld [vmem:[#allocation7 + $0x2d0] ss:$24 sps:$4 sm:$0xff]  }
 0x33e   :  { %1411 = vmatprep.subr.bf16.mxu1 %v3934_v7  ;;  %1527 = vmatpush1.bf16.msra.mxu0 %v4311_v47  ;;  %v5683_v7 = vld [vmem:[#allocation63_spill] sm:$0xff]  ;;  %5688 = vst [vmem:[#allocation15_spill] sm:$0xff] %v4335_v30 }
 0x33f   :  { %1528 = vmatprep.subr.bf16.mxu0 %v4314_v21 }
 0x341   :  { %1412 = vmatpush1.bf16.msra.mxu1 %v3938_v9  ;;  %v5686_v9 = vld [vmem:[#allocation64_spill] sm:$0xff] }
 0x342   :  { %1413 = vmatprep.subr.bf16.mxu1 %v3942_v12  ;;  %1529 = vmatpush1.bf16.msra.mxu0 %v4319_v23  ;;  %v5687_v12 = vld [vmem:[#allocation39_spill] sm:$0xff] }
 0x343   :  { %1530 = vmatprep.subr.bf16.mxu0 %v4322_v25 }
 0x345   :  { %1414 = vmatpush1.bf16.msra.mxu1 %v3946_v15  ;;  %v5690_v15 = vld [vmem:[#allocation41_spill] sm:$0xff] }
 0x346   :  { %1415 = vmatprep.subr.bf16.mxu1 %v5683_v7  ;;  %1531 = vmatpush1.bf16.msra.mxu0 %v4327_v27  ;;  %v4386_v7 = vld [vmem:[#allocation7 + $0x188] ss:$24 sps:$4 sm:$0xff]  }
 0x347   :  { %1532 = vmatprep.subr.bf16.mxu0 %v4330_v28  ;;  %5706 = vst [vmem:[#allocation31_spill] sm:$0xff] %v4386_v7 }
 0x349   :  { %1416 = vmatpush1.bf16.msra.mxu1 %v5686_v9  ;;  %v4389_v9 = vld [vmem:[#allocation7 + $0x1bc] ss:$24 sps:$4 sm:$0xff]  }
 0x34a   :  { %1543 = vmatprep.subr.bf16.mxu1 %v5687_v12  ;;  %1533 = vmatpush1.bf16.msra.mxu0 %v4335_v30  ;;  %5707 = vst [vmem:[#allocation32_spill] sm:$0xff] %v4389_v9 }
 0x34b   :  { %1584 = vmatprep.subr.bf16.mxu0 %v4338_v4 }
 0x34c   :  { %1418 = vmatmul.mubr.bf16.vlgmr.msra.gmra.mrb[16].mxu1 %v4223_v36  ;;  %v4383_v36 = vld [vmem:[#allocation7 + $0x18c] ss:$24 sps:$4 sm:$0xff]  }
 0x34d   :  { %1544 = vmatpush1.bf16.msra.mxu1 %v5690_v15  ;;  %5705 = vst [vmem:[#allocation30_spill] sm:$0xff] %v4383_v36 }
 0x34e   :  { %1545 = vmatprep.subr.bf16.mxu1 %v5691_v17 }
 0x351   :  { %1546 = vmatpush1.bf16.msra.mxu1 %v4344_v56 }
 0x352   :  { %1547 = vmatprep.subr.bf16.mxu1 %v4347_v46 }
 0x355   :  { %1548 = vmatpush1.bf16.msra.mxu1 %v4350_v62 }
 0x356   :  { %1549 = vmatprep.subr.bf16.mxu1 %v4353_v34 }
 0x359   :  { %1550 = vmatpush1.bf16.msra.mxu1 %v4356_v16 }
 0x35a   :  { %1551 = vmatprep.subr.bf16.mxu1 %v4359_v44  ;;  %v5723_v44 = vld [vmem:[#allocation66_spill] sm:$0xff] }
 0x35d   :  { %1552 = vmatpush1.bf16.msra.mxu1 %v4362_v54 }
 0x35e   :  { %1553 = vmatprep.subr.bf16.mxu1 %v4365_v42 }
 0x361   :  { %1554 = vmatpush1.bf16.msra.mxu1 %v4368_v58  ;;  %v5722_v58 = vld [vmem:[#allocation65_spill] sm:$0xff] }
 0x362   :  { %1555 = vmatprep.subr.bf16.mxu1 %v4371_v60 }
 0x365   :  { %1556 = vmatpush1.bf16.msra.mxu1 %v4374_v45  ;;  %v5721_v45 = vld [vmem:[#allocation45_spill] sm:$0xff] }
 0x366   :  { %1557 = vmatprep.subr.bf16.mxu1 %v4377_v50  ;;  %v4395_v50 = vld [vmem:[#allocation7 + $0x1ec] ss:$24 sps:$4 sm:$0xff]  }
 0x367   :  { %5709 = vst [vmem:[#allocation36_spill] sm:$0xff] %v4395_v50 }
 0x369   :  { %1558 = vmatpush1.bf16.msra.mxu1 %v4380_v0  ;;  %v4398_v0 = vld [vmem:[#allocation7 + $0x1e8] ss:$24 sps:$4 sm:$0xff]  }
 0x36a   :  { %1559 = vmatprep.subr.bf16.mxu1 %v4383_v36  ;;  %5710 = vst [vmem:[#allocation38_spill] sm:$0xff] %v4398_v0  ;;  %v4401_v36 = vld [vmem:[#allocation7 + $0x21c] ss:$24 sps:$4 sm:$0xff]  }
 0x36b   :  { %5711 = vst [vmem:[#allocation40_spill] sm:$0xff] %v4401_v36 }
 0x36d   :  { %1560 = vmatpush1.bf16.msra.mxu1 %v4386_v7  ;;  %v4404_v7 = vld [vmem:[#allocation7 + $0x218] ss:$24 sps:$4 sm:$0xff]  }
 0x36e   :  { %1561 = vmatprep.subr.bf16.mxu1 %v4389_v9  ;;  %5712 = vst [vmem:[#allocation42_spill] sm:$0xff] %v4404_v7  ;;  %v4407_v9 = vld [vmem:[#allocation7 + $0x24c] ss:$24 sps:$4 sm:$0xff]  }
 0x36f   :  { %5713 = vst [vmem:[#allocation44_spill] sm:$0xff] %v4407_v9 }
 0x371   :  { %1562 = vmatpush1.bf16.msra.mxu1 %v4392_v41  ;;  %v4410_v41 = vld [vmem:[#allocation7 + $0x248] ss:$24 sps:$4 sm:$0xff]  }
 0x372   :  { %1563 = vmatprep.subr.bf16.mxu1 %v4395_v50  ;;  %5714 = vst [vmem:[#allocation46_spill] sm:$0xff] %v4410_v41  ;;  %v4413_v50 = vld [vmem:[#allocation7 + $0x27c] ss:$24 sps:$4 sm:$0xff]  }
 0x373   :  { %5715 = vst [vmem:[#allocation48_spill] sm:$0xff] %v4413_v50 }
 0x375   :  { %1564 = vmatpush1.bf16.msra.mxu1 %v4398_v0  ;;  %v4416_v0 = vld [vmem:[#allocation7 + $0x278] ss:$24 sps:$4 sm:$0xff]  }
 0x376   :  { %1565 = vmatprep.subr.bf16.mxu1 %v4401_v36  ;;  %5716 = vst [vmem:[#allocation50_spill] sm:$0xff] %v4416_v0  ;;  %v4419_v36 = vld [vmem:[#allocation7 + $0x2ac] ss:$24 sps:$4 sm:$0xff]  }
 0x377   :  { %5717 = vst [vmem:[#allocation52_spill] sm:$0xff] %v4419_v36 }
 0x379   :  { %1566 = vmatpush1.bf16.msra.mxu1 %v4404_v7  ;;  %v4422_v7 = vld [vmem:[#allocation7 + $0x2a8] ss:$24 sps:$4 sm:$0xff]  }
 0x37a   :  { %1567 = vmatprep.subr.bf16.mxu1 %v4407_v9  ;;  %5718 = vst [vmem:[#allocation67_spill] sm:$0xff] %v4422_v7  ;;  %v4425_v9 = vld [vmem:[#allocation7 + $0x2dc] ss:$24 sps:$4 sm:$0xff]  }
 0x37b   :  { %5719 = vst [vmem:[#allocation68_spill] sm:$0xff] %v4425_v9 }
 0x37d   :  { %1568 = vmatpush1.bf16.msra.mxu1 %v4410_v41  ;;  %v5720_v41 = vld [vmem:[#allocation54_spill] sm:$0xff] }
 0x37e   :  { %1569 = vmatprep.subr.bf16.mxu1 %v4413_v50 }
 0x381   :  { %1570 = vmatpush1.bf16.msra.mxu1 %v4416_v0 }
 0x382   :  { %1571 = vmatprep.subr.bf16.mxu1 %v4419_v36 }
 0x385   :  { %1572 = vmatpush1.bf16.msra.mxu1 %v4422_v7 }
 0x386   :  { %1573 = vmatprep.subr.bf16.mxu1 %v4425_v9 }
 0x389   :  { %1574 = vmatpush1.bf16.msra.mxu1 %v5720_v41 }
 0x38a   :  { %1705 = vmatprep.subr.bf16.mxu1 %v5721_v45 }
 0x3df   :  { %v1337_v50 = vpop.f32.mrb[12].mxu1  ;;  %v1378_v60 = vpop.f32.mrb[24].mxu0 }
 0x3e0   :  { %v1338_v0 = vadd.f32 %v1337_v50, %v5722_v58  ;;  %v1339_v42 = vpop.f32.mrb[13].mxu1  ;;  %v1380_v54 = vpop.f32.mrb[25].mxu0 }
 0x3e1   :  { %v1340_v36 = vadd.f32 %v1339_v42, %v5723_v44  ;;  %v1341_v16 = vpop.f32.mrb[14].mxu1  ;;  %v1382_v34 = vpop.f32.mrb[26].mxu0 }
 0x3e2   :  { %v1427_v62 = vrot.slane %v1338_v0, 6  ;;  %v1342_v7 = vpop.f32.mrb[15].mxu1  ;;  %v1383_v46 = vpop.f32.mrb[27].mxu0  ;;  %v1381_v34 = vadd.f32 %v1380_v54, %v4040_v49  ;;  %v1379_v16 = vadd.f32 %v1378_v60, %v5669_v52 }
 0x3e3   :  { %v1437_v56 = vrot.slane %v1340_v36, 6 }
 0x3e4   :  { %v1429_v9 = vadd.f32 %v1427_v62, %v5667_v38  ;;  %v1460_v46 = vrot.slane %v1381_v34, 3  ;;  %v1447_v42 = vrot.slane %v1379_v16, 6  ;;  %v1455_v62 = vrot.slane %v4211_v40, 7 }
 0x3e5   :  { %v1439_v41 = vadd.f32 %v1437_v56, %v5668_v32 }
 0x3e6   :  { %v2818_v17 = vmul.f32 -1.442695, %v1429_v9  ;;  %v5724_v9 = vld [vmem:[#allocation70_spill] sm:$0xff] }
 0x3e7   :  { %v2819_v45 = vmul.f32 -1.442695, %v1439_v41  ;;  %v2484_v41 = vsel %vm2483_vm1, %v5724_v9, %v4211_v40 }
 0x3e8   :  { %3110 = vpow2.f32 %v2818_v17  ;;  %v1462_v17 = vadd.f32 %v1460_v46, %v4050_v6 }
 0x3e9   :  { %3112 = vpow2.f32 %v2819_v45 }
 0x3f2   :  { %v3111_v15 = vpop.eup %3110 }
 0x3f3   :  { %v3113_v50 = vpop.eup %3112  ;;  %v1433_v58 = vadd.f32 1.0, %v3111_v15  ;;  %v2820_v15 = vmul.f32 -1.442695, %v1462_v17 }
 0x3f4   :  { %v1443_v4 = vadd.f32 1.0, %v3113_v50 }
 0x3f5   :  { %3114 = vrcp.f32 %v1433_v58 }
 0x3f6   :  { %3116 = vrcp.f32 %v1443_v4 }
 0x3ff   :  { %v3115_v0 = vpop.eup %3114 }
 0x400   :  { %v3117_v56 = vpop.eup %3116  ;;  %v1449_v36 = vmul.f32 %v3115_v0, %v1447_v42 }
 0x401   :  { %v1457_v45 = vmul.f32 %v3117_v56, %v1455_v62  ;;  %v1452_v4 = vsub.f32 1.0, %v3117_v56 }
 0x402   :  { %v1450_v7 = vadd.f32 %v1449_v36, %v4048_v57 }
 0x404   :  { %3118 = vtanh.f32 %v1450_v7 }
 0x405   :  { %3120 = vpow2.f32 %v2820_v15 }
 0x40e   :  { %v3119_v58 = vpop.eup %3118 }
 0x40f   :  { %v1453_v54 = vmul.f32 %v3119_v58, %v1452_v4  ;;  %v3121_v50 = vpop.eup %3120 }
 0x410   :  { %v1466_v16 = vadd.f32 1.0, %v3121_v50 }
 0x411   :  { %v4439_v60 = vadd.f32 %v1457_v45, %v1453_v54 }
 0x412   :  { %3122 = vrcp.f32 %v1466_v16  ;;  %v1487_v16 = vrot.slane %v4218_v48, 1  ;;  %v4553_v48 = vld [vmem:[#allocation7 + $0x254] ss:$24 sps:$4 sm:$0xff]  }
 0x413   :  { %v4446_v34 = vsel %vm2485_vm2, %v2484_v41, %v4439_v60  ;;  %5729 = vst [vmem:[#allocation64_spill] sm:$0xff] %v4553_v48 }
 0x41c   :  { %v3123_v7 = vpop.eup %3122 }
 0x41f   :  { %v1419_v46 = vpop.f32.mrb[16].mxu1 }
 0x420   :  { %v1420_v42 = vadd.f32 %v1419_v46, %v4058_v20  ;;  %v1421_v0 = vpop.f32.mrb[17].mxu1 }
 0x421   :  { %v1422_v62 = vadd.f32 %v1421_v0, %v4060_v39  ;;  %v1423_v56 = vpop.f32.mrb[18].mxu1 }
 0x422   :  { %v1470_v36 = vrot.slane %v1420_v42, 3  ;;  %v1424_v17 = vpop.f32.mrb[19].mxu1 }
 0x423   :  { %v1480_v45 = vrot.slane %v1422_v62, 3 }
 0x424   :  { %v1472_v40 = vadd.f32 %v1470_v36, %v4066_v33  ;;  %v1494_v36 = vpack.c.bf16 %v4439_v60, %v4439_v60 }
 0x425   :  { %v1482_v15 = vmul.f32 %v3123_v7, %v1480_v45 }
 0x426   :  { %v2821_v4 = vmul.f32 -1.442695, %v1472_v40  ;;  %v4458_v7 = vrot.slane %v1494_v36, 1  ;;  %v4462_v40 = vld [vmem:[#allocation7 + $0x10] ss:$24 sps:$4 sm:$0xff]  }
 0x427   :  { %v1483_v9 = vadd.f32 %v1482_v15, %v4071_v43  ;;  %v4465_v15 = vld [vmem:[#allocation7 + $0x44] ss:$24 sps:$4 sm:$0xff]   ;;  %v4542_v36 = vld [vmem:[#allocation7 + $0x1f0] ss:$24 sps:$4 sm:$0xff]  }
 0x428   :  { %3124 = vpow2.f32 %v2821_v4  ;;  %v4470_v4 = vld [vmem:[#allocation7 + $0x40] ss:$24 sps:$4 sm:$0xff]   ;;  %5726 = vst [vmem:[#allocation35_spill] sm:$0xff] %v4542_v36 }
 0x432   :  { %v3125_v58 = vpop.eup %3124 }
 0x433   :  { %v1476_v54 = vadd.f32 1.0, %v3125_v58  ;;  %v4473_v58 = vld [vmem:[#allocation7 + $0x74] ss:$24 sps:$4 sm:$0xff]  }
 0x435   :  { %3126 = vrcp.f32 %v1476_v54  ;;  %v4478_v54 = vld [vmem:[#allocation7 + $0x70] ss:$24 sps:$4 sm:$0xff]  }
 0x436   :  { %3128 = vtanh.f32 %v1483_v9  ;;  %v4481_v9 = vld [vmem:[#allocation7 + $0xa4] ss:$24 sps:$4 sm:$0xff]  }
 0x43f   :  { %v3127_v41 = vpop.eup %3126 }
 0x440   :  { %v1485_v50 = vsub.f32 1.0, %v3127_v41  ;;  %v3129_v46 = vpop.eup %3128  ;;  %v1489_v0 = vmul.f32 %v3127_v41, %v1487_v16  ;;  %v4513_v41 = vld [vmem:[#allocation7 + $0x164] ss:$24 sps:$4 sm:$0xff]   ;;  %v4521_v16 = vld [vmem:[#allocation7 + $0x194] ss:$24 sps:$4 sm:$0xff]  }
 0x442   :  { %v1486_v42 = vmul.f32 %v3129_v46, %v1485_v50  ;;  %v4518_v50 = vld [vmem:[#allocation7 + $0x160] ss:$24 sps:$4 sm:$0xff]   ;;  %v4526_v46 = vld [vmem:[#allocation7 + $0x190] ss:$24 sps:$4 sm:$0xff]  }
 0x444   :  { %v4453_v62 = vadd.f32 %v1489_v0, %v1486_v42  ;;  %v4529_v42 = vld [vmem:[#allocation7 + $0x1c4] ss:$24 sps:$4 sm:$0xff]   ;;  %v4534_v0 = vld [vmem:[#allocation7 + $0x1c0] ss:$24 sps:$4 sm:$0xff]  }
 0x446   :  { %5725 = vst [vmem:[#allocation69_spill] sm:$0xff] %v4453_v62  ;;  %v1492_v56 = vrot.slane %v4453_v62, 3 }
 0x448   :  { %v1495_v17 = vpack.c.bf16 %v1492_v56, %v1492_v56  ;;  %v4537_v56 = vld [vmem:[#allocation7 + $0x1f4] ss:$24 sps:$4 sm:$0xff]  }
 0x44a   :  { %v1499_v45 = vrot.slane %v1495_v17, 1  ;;  %v4545_v17 = vld [vmem:[#allocation7 + $0x224] ss:$24 sps:$4 sm:$0xff]  }
 0x44b   :  { %5727 = vst [vmem:[#allocation37_spill] sm:$0xff] %v4545_v17 }
 0x44c   :  { %1534 = vmatprep.mubr.bf16.mxu0 %v1499_v45  ;;  %1575 = vmatprep.mubr.bf16.mxu1 %v1499_v45 }
 0x44d   :  { %1535 = vmatmul.mubr.bf16.vlgmr.msra.gmra.mrb[28].mxu0 %v4458_v7  ;;  %1576 = vmatmul.mubr.bf16.vlgmr.msra.gmra.mrb[20].mxu1 %v4458_v7 }
 0x44e   :  { %1585 = vmatpush1.bf16.msra.mxu0 %v4462_v40  ;;  %1616 = vmatprep.mubr.bf16.mxu0 %v1499_v45  ;;  %v4550_v45 = vld [vmem:[#allocation7 + $0x220] ss:$24 sps:$4 sm:$0xff]  }
 0x44f   :  { %1586 = vmatprep.subr.bf16.mxu0 %v4465_v15  ;;  %1706 = vmatpush1.bf16.msra.mxu1 %v4085_v29  ;;  %v4486_v29 = vld [vmem:[#allocation7 + $0xa0] ss:$24 sps:$4 sm:$0xff]   ;;  %5728 = vst [vmem:[#allocation63_spill] sm:$0xff] %v4550_v45 }
 0x450   :  { %1707 = vmatprep.subr.bf16.mxu1 %v4088_v11  ;;  %v4489_v11 = vld [vmem:[#allocation7 + $0xd4] ss:$24 sps:$4 sm:$0xff]  }
 0x452   :  { %1587 = vmatpush1.bf16.msra.mxu0 %v4470_v4 }
 0x453   :  { %1588 = vmatprep.subr.bf16.mxu0 %v4473_v58  ;;  %1708 = vmatpush1.bf16.msra.mxu1 %v4093_v31  ;;  %v4494_v31 = vld [vmem:[#allocation7 + $0xd0] ss:$24 sps:$4 sm:$0xff]  }
 0x454   :  { %1709 = vmatprep.subr.bf16.mxu1 %v4096_v37  ;;  %v4497_v37 = vld [vmem:[#allocation7 + $0x104] ss:$24 sps:$4 sm:$0xff]  }
 0x456   :  { %1589 = vmatpush1.bf16.msra.mxu0 %v4478_v54 }
 0x457   :  { %1590 = vmatprep.subr.bf16.mxu0 %v4481_v9  ;;  %1710 = vmatpush1.bf16.msra.mxu1 %v5671_v3  ;;  %v4502_v3 = vld [vmem:[#allocation7 + $0x100] ss:$24 sps:$4 sm:$0xff]  }
 0x458   :  { %1711 = vmatprep.subr.bf16.mxu1 %v5672_v19  ;;  %v4505_v19 = vld [vmem:[#allocation7 + $0x134] ss:$24 sps:$4 sm:$0xff]  }
 0x45a   :  { %1591 = vmatpush1.bf16.msra.mxu0 %v4486_v29 }
 0x45b   :  { %1592 = vmatprep.subr.bf16.mxu0 %v4489_v11  ;;  %1712 = vmatpush1.bf16.msra.mxu1 %v4109_v53  ;;  %v4510_v53 = vld [vmem:[#allocation7 + $0x130] ss:$24 sps:$4 sm:$0xff]  }
 0x45c   :  { %1713 = vmatprep.subr.bf16.mxu1 %v4242_v26 }
 0x45e   :  { %1593 = vmatpush1.bf16.msra.mxu0 %v4494_v31 }
 0x45f   :  { %1594 = vmatprep.subr.bf16.mxu0 %v4497_v37  ;;  %1714 = vmatpush1.bf16.msra.mxu1 %v4247_v55 }
 0x460   :  { %1715 = vmatprep.subr.bf16.mxu1 %v4250_v2 }
 0x462   :  { %1595 = vmatpush1.bf16.msra.mxu0 %v4502_v3 }
 0x463   :  { %1596 = vmatprep.subr.bf16.mxu0 %v4505_v19  ;;  %1716 = vmatpush1.bf16.msra.mxu1 %v4255_v35 }
 0x464   :  { %1717 = vmatprep.subr.bf16.mxu1 %v4258_v59 }
 0x466   :  { %1597 = vmatpush1.bf16.msra.mxu0 %v4510_v53 }
 0x467   :  { %1598 = vmatprep.subr.bf16.mxu0 %v4513_v41  ;;  %1718 = vmatpush1.bf16.msra.mxu1 %v4263_v61 }
 0x468   :  { %1719 = vmatprep.subr.bf16.mxu1 %v4266_v22 }
 0x46a   :  { %1599 = vmatpush1.bf16.msra.mxu0 %v4518_v50 }
 0x46b   :  { %1600 = vmatprep.subr.bf16.mxu0 %v4521_v16  ;;  %1720 = vmatpush1.bf16.msra.mxu1 %v4271_v63 }
 0x46c   :  { %1721 = vmatprep.subr.bf16.mxu1 %v4274_v10 }
 0x46e   :  { %1601 = vmatpush1.bf16.msra.mxu0 %v4526_v46 }
 0x46f   :  { %1602 = vmatprep.subr.bf16.mxu0 %v4529_v42  ;;  %1722 = vmatpush1.bf16.msra.mxu1 %v4279_v1 }
 0x470   :  { %1723 = vmatprep.subr.bf16.mxu1 %v4282_v14 }
 0x472   :  { %1603 = vmatpush1.bf16.msra.mxu0 %v4534_v0 }
 0x473   :  { %1604 = vmatprep.subr.bf16.mxu0 %v4537_v56  ;;  %1724 = vmatpush1.bf16.msra.mxu1 %v4287_v18 }
 0x474   :  { %1725 = vmatprep.subr.bf16.mxu1 %v4290_v24 }
 0x476   :  { %1605 = vmatpush1.bf16.msra.mxu0 %v4542_v36  ;;  %v4558_v36 = vld [vmem:[#allocation7 + $0x250] ss:$24 sps:$4 sm:$0xff]  }
 0x477   :  { %1606 = vmatprep.subr.bf16.mxu0 %v4545_v17  ;;  %1726 = vmatpush1.bf16.msra.mxu1 %v4295_v8  ;;  %5730 = vst [vmem:[#allocation39_spill] sm:$0xff] %v4558_v36  ;;  %v4561_v17 = vld [vmem:[#allocation7 + $0x284] ss:$24 sps:$4 sm:$0xff]  }
 0x478   :  { %1727 = vmatprep.subr.bf16.mxu1 %v4298_v13  ;;  %5731 = vst [vmem:[#allocation54_spill] sm:$0xff] %v4561_v17 }
 0x47a   :  { %1607 = vmatpush1.bf16.msra.mxu0 %v4550_v45  ;;  %v4566_v45 = vld [vmem:[#allocation7 + $0x280] ss:$24 sps:$4 sm:$0xff]  }
 0x47b   :  { %1608 = vmatprep.subr.bf16.mxu0 %v4553_v48  ;;  %1728 = vmatpush1.bf16.msra.mxu1 %v4303_v5  ;;  %5732 = vst [vmem:[#allocation66_spill] sm:$0xff] %v4566_v45  ;;  %v4569_v48 = vld [vmem:[#allocation7 + $0x2b4] ss:$24 sps:$4 sm:$0xff]  }
 0x47c   :  { %1729 = vmatprep.subr.bf16.mxu1 %v4306_v51  ;;  %5733 = vst [vmem:[#allocation70_spill] sm:$0xff] %v4569_v48 }
 0x47e   :  { %1609 = vmatpush1.bf16.msra.mxu0 %v4558_v36  ;;  %v4574_v36 = vld [vmem:[#allocation7 + $0x2b0] ss:$24 sps:$4 sm:$0xff]  }
 0x47f   :  { %1610 = vmatprep.subr.bf16.mxu0 %v4561_v17  ;;  %1730 = vmatpush1.bf16.msra.mxu1 %v4311_v47  ;;  %5734 = vst [vmem:[#allocation72_spill] sm:$0xff] %v4574_v36  ;;  %v4577_v17 = vld [vmem:[#allocation7 + $0x2e4] ss:$24 sps:$4 sm:$0xff]  }
 0x480   :  { %1731 = vmatprep.subr.bf16.mxu1 %v4314_v21  ;;  %5735 = vst [vmem:[#allocation73_spill] sm:$0xff] %v4577_v17 }
 0x482   :  { %1611 = vmatpush1.bf16.msra.mxu0 %v4566_v45  ;;  %v4582_v45 = vld [vmem:[#allocation7 + $0x2e0] ss:$24 sps:$4 sm:$0xff]  }
 0x483   :  { %1612 = vmatprep.subr.bf16.mxu0 %v4569_v48  ;;  %1732 = vmatpush1.bf16.msra.mxu1 %v4319_v23  ;;  %5736 = vst [vmem:[#allocation74_spill] sm:$0xff] %v4582_v45  ;;  %v5739_v23 = vld [vmem:[#allocation43_spill] sm:$0xff]  ;;  %v5743_v48 = vld [vmem:[#allocation20_spill] sm:$0xff] }
 0x484   :  { %1733 = vmatprep.subr.bf16.mxu1 %v4322_v25  ;;  %v5737_v25 = vld [vmem:[#allocation16_spill] sm:$0xff] }
 0x486   :  { %1613 = vmatpush1.bf16.msra.mxu0 %v4574_v36  ;;  %v5738_v36 = vld [vmem:[#allocation41_spill] sm:$0xff] }
 0x487   :  { %1614 = vmatprep.subr.bf16.mxu0 %v4577_v17  ;;  %1734 = vmatpush1.bf16.msra.mxu1 %v4327_v27  ;;  %v5740_v17 = vld [vmem:[#allocation17_spill] sm:$0xff]  ;;  %v5741_v27 = vld [vmem:[#allocation18_spill] sm:$0xff] }
 0x488   :  { %1735 = vmatprep.subr.bf16.mxu1 %v4330_v28  ;;  %v5742_v28 = vld [vmem:[#allocation19_spill] sm:$0xff] }
 0x48a   :  { %1615 = vmatpush1.bf16.msra.mxu0 %v4582_v45  ;;  %v5744_v45 = vld [vmem:[#allocation21_spill] sm:$0xff] }
 0x48b   :  { %1746 = vmatprep.subr.bf16.mxu0 %v5687_v12  ;;  %1736 = vmatpush1.bf16.msra.mxu1 %v4335_v30  ;;  %v5745_v12 = vld [vmem:[#allocation22_spill] sm:$0xff]  ;;  %v5746_v30 = vld [vmem:[#allocation23_spill] sm:$0xff] }
 0x48c   :  { %1787 = vmatprep.subr.bf16.mxu1 %v5737_v25  ;;  %v5747_v25 = vld [vmem:[#allocation24_spill] sm:$0xff] }
 0x48d   :  { %1617 = vmatmul.mubr.bf16.vlgmr.msra.gmra.mrb[32].mxu0 %v4458_v7  ;;  %v5748_v7 = vld [vmem:[#allocation25_spill] sm:$0xff] }
 0x48e   :  { %1747 = vmatpush1.bf16.msra.mxu0 %v5738_v36  ;;  %v5749_v36 = vld [vmem:[#allocation26_spill] sm:$0xff] }
 0x48f   :  { %1748 = vmatprep.subr.bf16.mxu0 %v5739_v23  ;;  %v5750_v23 = vld [vmem:[#allocation27_spill] sm:$0xff] }
 0x492   :  { %1749 = vmatpush1.bf16.msra.mxu0 %v5740_v17  ;;  %v5751_v17 = vld [vmem:[#allocation28_spill] sm:$0xff] }
 0x493   :  { %1750 = vmatprep.subr.bf16.mxu0 %v5741_v27  ;;  %v5752_v27 = vld [vmem:[#allocation29_spill] sm:$0xff] }
 0x496   :  { %1751 = vmatpush1.bf16.msra.mxu0 %v5742_v28  ;;  %v5753_v28 = vld [vmem:[#allocation30_spill] sm:$0xff] }
 0x497   :  { %1752 = vmatprep.subr.bf16.mxu0 %v5743_v48  ;;  %v5754_v48 = vld [vmem:[#allocation31_spill] sm:$0xff] }
 0x49a   :  { %1753 = vmatpush1.bf16.msra.mxu0 %v5744_v45  ;;  %v5755_v45 = vld [vmem:[#allocation32_spill] sm:$0xff] }
 0x49b   :  { %1754 = vmatprep.subr.bf16.mxu0 %v5745_v12  ;;  %v5756_v12 = vld [vmem:[#allocation34_spill] sm:$0xff] }
 0x49e   :  { %1755 = vmatpush1.bf16.msra.mxu0 %v5746_v30  ;;  %v5757_v30 = vld [vmem:[#allocation36_spill] sm:$0xff] }
 0x49f   :  { %1756 = vmatprep.subr.bf16.mxu0 %v5747_v25  ;;  %v5758_v25 = vld [vmem:[#allocation38_spill] sm:$0xff] }
 0x4a2   :  { %1757 = vmatpush1.bf16.msra.mxu0 %v5748_v7  ;;  %v5759_v7 = vld [vmem:[#allocation40_spill] sm:$0xff] }
 0x4a3   :  { %1758 = vmatprep.subr.bf16.mxu0 %v5749_v36  ;;  %v5760_v36 = vld [vmem:[#allocation42_spill] sm:$0xff] }
 0x4a6   :  { %1759 = vmatpush1.bf16.msra.mxu0 %v5750_v23  ;;  %v5761_v23 = vld [vmem:[#allocation44_spill] sm:$0xff] }
 0x4a7   :  { %1760 = vmatprep.subr.bf16.mxu0 %v5751_v17  ;;  %v5762_v17 = vld [vmem:[#allocation46_spill] sm:$0xff] }
 0x4aa   :  { %1761 = vmatpush1.bf16.msra.mxu0 %v5752_v27  ;;  %v5763_v27 = vld [vmem:[#allocation48_spill] sm:$0xff] }
 0x4ab   :  { %1762 = vmatprep.subr.bf16.mxu0 %v5753_v28  ;;  %v5764_v28 = vld [vmem:[#allocation50_spill] sm:$0xff] }
 0x4ae   :  { %1763 = vmatpush1.bf16.msra.mxu0 %v5754_v48  ;;  %v5765_v48 = vld [vmem:[#allocation52_spill] sm:$0xff] }
 0x4af   :  { %1764 = vmatprep.subr.bf16.mxu0 %v5755_v45  ;;  %v5766_v45 = vld [vmem:[#allocation67_spill] sm:$0xff] }
 0x4b2   :  { %1765 = vmatpush1.bf16.msra.mxu0 %v5756_v12  ;;  %v5767_v12 = vld [vmem:[#allocation68_spill] sm:$0xff] }
 0x4b3   :  { %1766 = vmatprep.subr.bf16.mxu0 %v5757_v30  ;;  %v4619_v30 = vld [vmem:[#allocation7 + $0x2d8] ss:$24 sps:$4 sm:$0xff]  }
 0x4b4   :  { %5768 = vst [vmem:[#allocation41_spill] sm:$0xff] %v4619_v30 }
 0x4b6   :  { %1767 = vmatpush1.bf16.msra.mxu0 %v5758_v25  ;;  %v5770_v25 = vld [vmem:[#allocation65_spill] sm:$0xff] }
 0x4b7   :  { %1768 = vmatprep.subr.bf16.mxu0 %v5759_v7  ;;  %v5769_v7 = vld [vmem:[#allocation45_spill] sm:$0xff] }
 0x4ba   :  { %1769 = vmatpush1.bf16.msra.mxu0 %v5760_v36 }
 0x4bb   :  { %1770 = vmatprep.subr.bf16.mxu0 %v5761_v23 }
 0x4be   :  { %1771 = vmatpush1.bf16.msra.mxu0 %v5762_v17 }
 0x4bf   :  { %1772 = vmatprep.subr.bf16.mxu0 %v5763_v27 }
 0x4c2   :  { %1773 = vmatpush1.bf16.msra.mxu0 %v5764_v28 }
 0x4c3   :  { %1774 = vmatprep.subr.bf16.mxu0 %v5765_v48 }
 0x4c6   :  { %1775 = vmatpush1.bf16.msra.mxu0 %v5766_v45 }
 0x4c7   :  { %1776 = vmatprep.subr.bf16.mxu0 %v5767_v12 }
 0x4ca   :  { %1777 = vmatpush1.bf16.msra.mxu0 %v4619_v30 }
 0x4cb   :  { %1902 = vmatprep.subr.bf16.mxu0 %v5769_v7 }
 0x520   :  { %v1536_v36 = vpop.f32.mrb[28].mxu0  ;;  %v1577_v23 = vpop.f32.mrb[20].mxu1 }
 0x521   :  { %v1537_v17 = vadd.f32 %v1536_v36, %v5770_v25  ;;  %v1538_v21 = vpop.f32.mrb[29].mxu0  ;;  %v1579_v27 = vpop.f32.mrb[21].mxu1 }
 0x522   :  { %v1539_v28 = vadd.f32 %v1538_v21, %v5723_v44  ;;  %v1540_v47 = vpop.f32.mrb[30].mxu0  ;;  %v1581_v48 = vpop.f32.mrb[22].mxu1 }
 0x523   :  { %v1626_v51 = vrot.slane %v1537_v17, 5  ;;  %v1541_v45 = vpop.f32.mrb[31].mxu0  ;;  %v1582_v5 = vpop.f32.mrb[23].mxu1  ;;  %v1580_v48 = vadd.f32 %v1579_v27, %v4040_v49  ;;  %v1578_v47 = vadd.f32 %v1577_v23, %v5669_v52 }
 0x524   :  { %v1636_v12 = vrot.slane %v1539_v28, 5 }
 0x525   :  { %v1628_v13 = vadd.f32 %v1626_v51, %v5667_v38  ;;  %v1659_v5 = vrot.slane %v1580_v48, 4  ;;  %v1646_v21 = vrot.slane %v1578_v47, 5  ;;  %v1654_v51 = vrot.slane %v4439_v60, 7 }
 0x526   :  { %v1638_v30 = vadd.f32 %v1636_v12, %v5668_v32 }
 0x527   :  { %v2822_v8 = vmul.f32 -1.442695, %v1628_v13 }
 0x528   :  { %v2823_v7 = vmul.f32 -1.442695, %v1638_v30 }
 0x529   :  { %3130 = vpow2.f32 %v2822_v8  ;;  %v1661_v8 = vadd.f32 %v1659_v5, %v4050_v6 }
 0x52a   :  { %3132 = vpow2.f32 %v2823_v7 }
 0x533   :  { %v3131_v24 = vpop.eup %3130 }
 0x534   :  { %v3133_v36 = vpop.eup %3132  ;;  %v1632_v25 = vadd.f32 1.0, %v3131_v24  ;;  %v2824_v24 = vmul.f32 -1.442695, %v1661_v8 }
 0x535   :  { %v1642_v18 = vadd.f32 1.0, %v3133_v36 }
 0x536   :  { %3134 = vrcp.f32 %v1632_v25 }
 0x537   :  { %3136 = vrcp.f32 %v1642_v18 }
 0x540   :  { %v3135_v28 = vpop.eup %3134 }
 0x541   :  { %v3137_v17 = vpop.eup %3136  ;;  %v1648_v13 = vmul.f32 %v3135_v28, %v1646_v21 }
 0x542   :  { %v1656_v30 = vmul.f32 %v3137_v17, %v1654_v51  ;;  %v1651_v18 = vsub.f32 1.0, %v3137_v17 }
 0x543   :  { %v1649_v45 = vadd.f32 %v1648_v13, %v4048_v57 }
 0x545   :  { %3138 = vtanh.f32 %v1649_v45 }
 0x546   :  { %3140 = vpow2.f32 %v2824_v24 }
 0x54f   :  { %v3139_v25 = vpop.eup %3138 }
 0x550   :  { %v1652_v27 = vmul.f32 %v3139_v25, %v1651_v18  ;;  %v3141_v23 = vpop.eup %3140 }
 0x551   :  { %v1665_v7 = vadd.f32 1.0, %v3141_v23  ;;  %v1686_v23 = vrot.slane %v4453_v62, 1  ;;  %v5807_v62 = vld [vmem:[#allocation24_spill] sm:$0xff] }
 0x552   :  { %v4632_v12 = vadd.f32 %v1656_v30, %v1652_v27 }
 0x553   :  { %3142 = vrcp.f32 %v1665_v7 }
 0x554   :  { %v4637_v60 = vsel %vm2487_vm3, %v4446_v34, %v4632_v12 }
 0x55d   :  { %v3143_v13 = vpop.eup %3142 }
 0x560   :  { %v1618_v36 = vpop.f32.mrb[32].mxu0 }
 0x561   :  { %v1619_v48 = vadd.f32 %v1618_v36, %v4058_v20  ;;  %v1620_v47 = vpop.f32.mrb[33].mxu0 }
 0x562   :  { %v1621_v5 = vadd.f32 %v1620_v47, %v4060_v39  ;;  %v1622_v21 = vpop.f32.mrb[34].mxu0 }
 0x563   :  { %v1669_v28 = vrot.slane %v1619_v48, 4  ;;  %v1623_v51 = vpop.f32.mrb[35].mxu0 }
 0x564   :  { %v1679_v17 = vrot.slane %v1621_v5, 4  ;;  %v1693_v5 = vpack.c.bf16 %v4632_v12, %v4632_v12 }
 0x565   :  { %v1671_v8 = vadd.f32 %v1669_v28, %v4066_v33 }
 0x566   :  { %v1681_v30 = vmul.f32 %v3143_v13, %v1679_v17  ;;  %v1696_v51 = vshrl.u32 %v1693_v5, 16  ;;  %v5787_v5 = vld [vmem:[#allocation70_spill] sm:$0xff] }
 0x567   :  { %v2825_v45 = vmul.f32 -1.442695, %v1671_v8 }
 0x568   :  { %v1682_v18 = vadd.f32 %v1681_v30, %v4071_v43  ;;  %v4653_v8 = vrot.slane %v1696_v51, 1  ;;  %v4659_v30 = vld [vmem:[#allocation7] ss:$24 sps:$4 sm:$0xff]  }
 0x569   :  { %3144 = vpow2.f32 %v2825_v45  ;;  %v4662_v45 = vld [vmem:[#allocation7 + $0x34] ss:$24 sps:$4 sm:$0xff]   ;;  %v5789_v51 = vld [vmem:[#allocation61_spill] sm:$0xff] }
 0x573   :  { %v3145_v34 = vpop.eup %3144 }
 0x574   :  { %v1675_v24 = vadd.f32 1.0, %v3145_v34  ;;  %v4667_v34 = vld [vmem:[#allocation7 + $0x30] ss:$24 sps:$4 sm:$0xff]  }
 0x576   :  { %3146 = vrcp.f32 %v1675_v24  ;;  %v4670_v24 = vld [vmem:[#allocation7 + $0x64] ss:$24 sps:$4 sm:$0xff]  }
 0x577   :  { %3148 = vtanh.f32 %v1682_v18  ;;  %v4675_v18 = vld [vmem:[#allocation7 + $0x60] ss:$24 sps:$4 sm:$0xff]  }
 0x580   :  { %v3147_v25 = vpop.eup %3146 }
 0x581   :  { %v1684_v27 = vsub.f32 1.0, %v3147_v25  ;;  %v3149_v7 = vpop.eup %3148  ;;  %v1688_v48 = vmul.f32 %v3147_v25, %v1686_v23  ;;  %v4678_v25 = vld [vmem:[#allocation7 + $0x94] ss:$24 sps:$4 sm:$0xff]   ;;  %v5783_v23 = vld [vmem:[#allocation54_spill] sm:$0xff] }
 0x583   :  { %v1685_v36 = vmul.f32 %v3149_v7, %v1684_v27  ;;  %v4683_v27 = vld [vmem:[#allocation7 + $0x90] ss:$24 sps:$4 sm:$0xff]   ;;  %v5784_v7 = vld [vmem:[#allocation58_spill] sm:$0xff] }
 0x585   :  { %v4644_v47 = vadd.f32 %v1688_v48, %v1685_v36  ;;  %v5785_v36 = vld [vmem:[#allocation59_spill] sm:$0xff]  ;;  %v5786_v48 = vld [vmem:[#allocation66_spill] sm:$0xff] }
 0x587   :  { %5771 = vst [vmem:[#allocation43_spill] sm:$0xff] %v4644_v47  ;;  %v4649_v21 = vrot.slane %v4644_v47, 1  ;;  %v5808_v47 = vld [vmem:[#allocation25_spill] sm:$0xff] }
 0x589   :  { %v1694_v28 = vpack.c.bf16 %v4649_v21, %v4649_v21 }
 0x58b   :  { %v1700_v17 = vshrl.u32 %v1694_v28, 16  ;;  %v5788_v28 = vld [vmem:[#allocation60_spill] sm:$0xff] }
 0x58d   :  { %v1702_v13 = vrot.slane %v1700_v17, 1  ;;  %v5790_v17 = vld [vmem:[#allocation72_spill] sm:$0xff] }
 0x58f   :  { %1737 = vmatprep.mubr.bf16.mxu1 %v1702_v13  ;;  %1778 = vmatprep.mubr.bf16.mxu0 %v1702_v13 }
 0x590   :  { %1738 = vmatmul.mubr.bf16.vlgmr.msra.gmra.mrb[24].mxu1 %v4653_v8  ;;  %1779 = vmatmul.mubr.bf16.vlgmr.msra.gmra.mrb[36].mxu0 %v4653_v8 }
 0x591   :  { %1788 = vmatpush1.bf16.msra.mxu1 %v4462_v40  ;;  %1819 = vmatprep.mubr.bf16.mxu1 %v1702_v13  ;;  %v5791_v13 = vld [vmem:[#allocation73_spill] sm:$0xff] }
 0x592   :  { %1789 = vmatprep.subr.bf16.mxu1 %v4465_v15  ;;  %1903 = vmatpush1.bf16.msra.mxu0 %v4659_v30 }
 0x593   :  { %1904 = vmatprep.subr.bf16.mxu0 %v4662_v45 }
 0x595   :  { %1790 = vmatpush1.bf16.msra.mxu1 %v4470_v4 }
 0x596   :  { %1791 = vmatprep.subr.bf16.mxu1 %v4473_v58  ;;  %1905 = vmatpush1.bf16.msra.mxu0 %v4667_v34 }
 0x597   :  { %1906 = vmatprep.subr.bf16.mxu0 %v4670_v24 }
 0x599   :  { %1792 = vmatpush1.bf16.msra.mxu1 %v4478_v54 }
 0x59a   :  { %1793 = vmatprep.subr.bf16.mxu1 %v4481_v9  ;;  %1907 = vmatpush1.bf16.msra.mxu0 %v4675_v18 }
 0x59b   :  { %1908 = vmatprep.subr.bf16.mxu0 %v4678_v25 }
 0x59d   :  { %1794 = vmatpush1.bf16.msra.mxu1 %v4486_v29 }
 0x59e   :  { %1795 = vmatprep.subr.bf16.mxu1 %v4489_v11  ;;  %1909 = vmatpush1.bf16.msra.mxu0 %v4683_v27 }
 0x59f   :  { %1910 = vmatprep.subr.bf16.mxu0 %v4242_v26  ;;  %v5772_v26 = vld [vmem:[#allocation49_spill] sm:$0xff] }
 0x5a1   :  { %1796 = vmatpush1.bf16.msra.mxu1 %v4494_v31 }
 0x5a2   :  { %1797 = vmatprep.subr.bf16.mxu1 %v4497_v37  ;;  %1911 = vmatpush1.bf16.msra.mxu0 %v4247_v55  ;;  %v5773_v55 = vld [vmem:[#allocation51_spill] sm:$0xff] }
 0x5a3   :  { %1912 = vmatprep.subr.bf16.mxu0 %v4250_v2  ;;  %v5774_v2 = vld [vmem:[#allocation35_spill] sm:$0xff] }
 0x5a5   :  { %1798 = vmatpush1.bf16.msra.mxu1 %v4502_v3 }
 0x5a6   :  { %1799 = vmatprep.subr.bf16.mxu1 %v4505_v19  ;;  %1913 = vmatpush1.bf16.msra.mxu0 %v4255_v35  ;;  %v5775_v35 = vld [vmem:[#allocation37_spill] sm:$0xff] }
 0x5a7   :  { %1914 = vmatprep.subr.bf16.mxu0 %v4258_v59  ;;  %v5776_v59 = vld [vmem:[#allocation53_spill] sm:$0xff] }
 0x5a9   :  { %1800 = vmatpush1.bf16.msra.mxu1 %v4510_v53 }
 0x5aa   :  { %1801 = vmatprep.subr.bf16.mxu1 %v4513_v41  ;;  %1915 = vmatpush1.bf16.msra.mxu0 %v4263_v61  ;;  %v5777_v61 = vld [vmem:[#allocation55_spill] sm:$0xff] }
 0x5ab   :  { %1916 = vmatprep.subr.bf16.mxu0 %v4266_v22  ;;  %v5778_v22 = vld [vmem:[#allocation63_spill] sm:$0xff] }
 0x5ad   :  { %1802 = vmatpush1.bf16.msra.mxu1 %v4518_v50 }
 0x5ae   :  { %1803 = vmatprep.subr.bf16.mxu1 %v4521_v16  ;;  %1917 = vmatpush1.bf16.msra.mxu0 %v4271_v63  ;;  %v5779_v63 = vld [vmem:[#allocation64_spill] sm:$0xff] }
 0x5af   :  { %1918 = vmatprep.subr.bf16.mxu0 %v4274_v10  ;;  %v5780_v10 = vld [vmem:[#allocation56_spill] sm:$0xff] }
 0x5b1   :  { %1804 = vmatpush1.bf16.msra.mxu1 %v4526_v46 }
 0x5b2   :  { %1805 = vmatprep.subr.bf16.mxu1 %v4529_v42  ;;  %1919 = vmatpush1.bf16.msra.mxu0 %v4279_v1  ;;  %v5781_v1 = vld [vmem:[#allocation57_spill] sm:$0xff] }
 0x5b3   :  { %1920 = vmatprep.subr.bf16.mxu0 %v4282_v14  ;;  %v5782_v14 = vld [vmem:[#allocation39_spill] sm:$0xff] }
 0x5b5   :  { %1806 = vmatpush1.bf16.msra.mxu1 %v4534_v0 }
 0x5b6   :  { %1807 = vmatprep.subr.bf16.mxu1 %v4537_v56  ;;  %1921 = vmatpush1.bf16.msra.mxu0 %v5772_v26  ;;  %v5792_v26 = vld [vmem:[#allocation62_spill] sm:$0xff] }
 0x5b7   :  { %1922 = vmatprep.subr.bf16.mxu0 %v5773_v55  ;;  %v5793_v55 = vld [vmem:[#allocation33_spill] sm:$0xff] }
 0x5b9   :  { %1808 = vmatpush1.bf16.msra.mxu1 %v5774_v2 }
 0x5ba   :  { %1809 = vmatprep.subr.bf16.mxu1 %v5775_v35  ;;  %1923 = vmatpush1.bf16.msra.mxu0 %v5776_v59  ;;  %v5794_v59 = vld [vmem:[#allocation74_spill] sm:$0xff] }
 0x5bb   :  { %1924 = vmatprep.subr.bf16.mxu0 %v5777_v61  ;;  %v4732_v61 = vld [vmem:[#allocation7 + $0xc] ss:$24 sps:$4 sm:$0xff]  }
 0x5bc   :  { %5795 = vst [vmem:[#allocation45_spill] sm:$0xff] %v4732_v61 }
 0x5bd   :  { %1810 = vmatpush1.bf16.msra.mxu1 %v5778_v22 }
 0x5be   :  { %1811 = vmatprep.subr.bf16.mxu1 %v5779_v63  ;;  %1925 = vmatpush1.bf16.msra.mxu0 %v5780_v10  ;;  %v5796_v10 = vld [vmem:[#allocation15_spill] sm:$0xff] }
 0x5bf   :  { %1926 = vmatprep.subr.bf16.mxu0 %v5781_v1  ;;  %v5797_v1 = vld [vmem:[#allocation16_spill] sm:$0xff] }
 0x5c1   :  { %1812 = vmatpush1.bf16.msra.mxu1 %v5782_v14 }
 0x5c2   :  { %1813 = vmatprep.subr.bf16.mxu1 %v5783_v23  ;;  %1927 = vmatpush1.bf16.msra.mxu0 %v5784_v7  ;;  %v4738_v7 = vld [vmem:[#allocation7 + $0x8] ss:$24 sps:$4 sm:$0xff]  }
 0x5c3   :  { %1928 = vmatprep.subr.bf16.mxu0 %v5785_v36  ;;  %5798 = vst [vmem:[#allocation49_spill] sm:$0xff] %v4738_v7  ;;  %v4741_v36 = vld [vmem:[#allocation7 + $0x3c] ss:$24 sps:$4 sm:$0xff]  }
 0x5c4   :  { %5799 = vst [vmem:[#allocation51_spill] sm:$0xff] %v4741_v36 }
 0x5c5   :  { %1814 = vmatpush1.bf16.msra.mxu1 %v5786_v48 }
 0x5c6   :  { %1815 = vmatprep.subr.bf16.mxu1 %v5787_v5  ;;  %1929 = vmatpush1.bf16.msra.mxu0 %v5788_v28  ;;  %v5800_v28 = vld [vmem:[#allocation17_spill] sm:$0xff] }
 0x5c7   :  { %1930 = vmatprep.subr.bf16.mxu0 %v5789_v51  ;;  %v5801_v51 = vld [vmem:[#allocation18_spill] sm:$0xff] }
 0x5c9   :  { %1816 = vmatpush1.bf16.msra.mxu1 %v5790_v17 }
 0x5ca   :  { %1817 = vmatprep.subr.bf16.mxu1 %v5791_v13  ;;  %1931 = vmatpush1.bf16.msra.mxu0 %v5792_v26  ;;  %v5802_v26 = vld [vmem:[#allocation19_spill] sm:$0xff] }
 0x5cb   :  { %1932 = vmatprep.subr.bf16.mxu0 %v5793_v55  ;;  %v5803_v55 = vld [vmem:[#allocation20_spill] sm:$0xff] }
 0x5cd   :  { %1818 = vmatpush1.bf16.msra.mxu1 %v5794_v59 }
 0x5ce   :  { %1943 = vmatprep.subr.bf16.mxu1 %v4732_v61  ;;  %1933 = vmatpush1.bf16.msra.mxu0 %v5796_v10  ;;  %v5804_v10 = vld [vmem:[#allocation21_spill] sm:$0xff] }
 0x5cf   :  { %1984 = vmatprep.subr.bf16.mxu0 %v5797_v1  ;;  %v5805_v1 = vld [vmem:[#allocation22_spill] sm:$0xff] }
 0x5d0   :  { %1820 = vmatmul.mubr.bf16.vlgmr.msra.gmra.mrb[28].mxu1 %v4653_v8  ;;  %v5806_v8 = vld [vmem:[#allocation23_spill] sm:$0xff] }
 0x5d1   :  { %1944 = vmatpush1.bf16.msra.mxu1 %v4738_v7  ;;  %v5809_v7 = vld [vmem:[#allocation26_spill] sm:$0xff] }
 0x5d2   :  { %1945 = vmatprep.subr.bf16.mxu1 %v4741_v36  ;;  %v5810_v36 = vld [vmem:[#allocation27_spill] sm:$0xff] }
 0x5d5   :  { %1946 = vmatpush1.bf16.msra.mxu1 %v5800_v28  ;;  %v5811_v28 = vld [vmem:[#allocation28_spill] sm:$0xff] }
 0x5d6   :  { %1947 = vmatprep.subr.bf16.mxu1 %v5801_v51  ;;  %v5812_v51 = vld [vmem:[#allocation29_spill] sm:$0xff] }
 0x5d9   :  { %1948 = vmatpush1.bf16.msra.mxu1 %v5802_v26  ;;  %v5813_v26 = vld [vmem:[#allocation30_spill] sm:$0xff] }
 0x5da   :  { %1949 = vmatprep.subr.bf16.mxu1 %v5803_v55  ;;  %v5814_v55 = vld [vmem:[#allocation31_spill] sm:$0xff] }
 0x5dd   :  { %1950 = vmatpush1.bf16.msra.mxu1 %v5804_v10  ;;  %v5815_v10 = vld [vmem:[#allocation32_spill] sm:$0xff] }
 0x5de   :  { %1951 = vmatprep.subr.bf16.mxu1 %v5805_v1  ;;  %v5816_v1 = vld [vmem:[#allocation34_spill] sm:$0xff] }
 0x5e1   :  { %1952 = vmatpush1.bf16.msra.mxu1 %v5806_v8  ;;  %v5817_v8 = vld [vmem:[#allocation36_spill] sm:$0xff] }
 0x5e2   :  { %1953 = vmatprep.subr.bf16.mxu1 %v5807_v62  ;;  %v5818_v62 = vld [vmem:[#allocation38_spill] sm:$0xff] }
 0x5e5   :  { %1954 = vmatpush1.bf16.msra.mxu1 %v5808_v47  ;;  %v5819_v47 = vld [vmem:[#allocation40_spill] sm:$0xff] }
 0x5e6   :  { %1955 = vmatprep.subr.bf16.mxu1 %v5809_v7  ;;  %v5820_v7 = vld [vmem:[#allocation42_spill] sm:$0xff] }
 0x5e9   :  { %1956 = vmatpush1.bf16.msra.mxu1 %v5810_v36  ;;  %v5821_v36 = vld [vmem:[#allocation44_spill] sm:$0xff] }
 0x5ea   :  { %1957 = vmatprep.subr.bf16.mxu1 %v5811_v28  ;;  %v5822_v28 = vld [vmem:[#allocation46_spill] sm:$0xff] }
 0x5ed   :  { %1958 = vmatpush1.bf16.msra.mxu1 %v5812_v51  ;;  %v5823_v51 = vld [vmem:[#allocation48_spill] sm:$0xff] }
 0x5ee   :  { %1959 = vmatprep.subr.bf16.mxu1 %v5813_v26  ;;  %v5824_v26 = vld [vmem:[#allocation50_spill] sm:$0xff] }
 0x5f1   :  { %1960 = vmatpush1.bf16.msra.mxu1 %v5814_v55  ;;  %v5825_v55 = vld [vmem:[#allocation52_spill] sm:$0xff] }
 0x5f2   :  { %1961 = vmatprep.subr.bf16.mxu1 %v5815_v10  ;;  %v5826_v10 = vld [vmem:[#allocation67_spill] sm:$0xff] }
 0x5f5   :  { %1962 = vmatpush1.bf16.msra.mxu1 %v5816_v1  ;;  %v5827_v1 = vld [vmem:[#allocation68_spill] sm:$0xff] }
 0x5f6   :  { %1963 = vmatprep.subr.bf16.mxu1 %v5817_v8  ;;  %v5828_v8 = vld [vmem:[#allocation41_spill] sm:$0xff] }
 0x5f9   :  { %1964 = vmatpush1.bf16.msra.mxu1 %v5818_v62  ;;  %v4773_v62 = vld [vmem:[#allocation7 + $0x4] ss:$24 sps:$4 sm:$0xff]  }
 0x5fa   :  { %1965 = vmatprep.subr.bf16.mxu1 %v5819_v47  ;;  %5829 = vst [vmem:[#allocation35_spill] sm:$0xff] %v4773_v62 }
 0x5fd   :  { %1966 = vmatpush1.bf16.msra.mxu1 %v5820_v7 }
 0x5fe   :  { %1967 = vmatprep.subr.bf16.mxu1 %v5821_v36  ;;  %v5830_v36 = vld [vmem:[#allocation65_spill] sm:$0xff] }
 0x601   :  { %1968 = vmatpush1.bf16.msra.mxu1 %v5822_v28 }
 0x602   :  { %1969 = vmatprep.subr.bf16.mxu1 %v5823_v51 }
 0x605   :  { %1970 = vmatpush1.bf16.msra.mxu1 %v5824_v26 }
 0x606   :  { %1971 = vmatprep.subr.bf16.mxu1 %v5825_v55 }
 0x609   :  { %1972 = vmatpush1.bf16.msra.mxu1 %v5826_v10 }
 0x60a   :  { %1973 = vmatprep.subr.bf16.mxu1 %v5827_v1 }
 0x60d   :  { %1974 = vmatpush1.bf16.msra.mxu1 %v5828_v8 }
 0x60e   :  { %2105 = vmatprep.subr.bf16.mxu1 %v4773_v62 }
 0x663   :  { %v1739_v47 = vpop.f32.mrb[24].mxu1  ;;  %v1780_v7 = vpop.f32.mrb[36].mxu0 }
 0x664   :  { %v1740_v28 = vadd.f32 %v1739_v47, %v5830_v36  ;;  %v1741_v61 = vpop.f32.mrb[25].mxu1  ;;  %v1782_v51 = vpop.f32.mrb[37].mxu0 }
 0x665   :  { %v1742_v26 = vadd.f32 %v1741_v61, %v5723_v44  ;;  %v1743_v59 = vpop.f32.mrb[26].mxu1  ;;  %v1784_v55 = vpop.f32.mrb[38].mxu0  ;;  %v1781_v61 = vadd.f32 %v1780_v7, %v5669_v52 }
 0x666   :  { %v1829_v13 = vrot.slane %v1740_v28, 4  ;;  %v1744_v10 = vpop.f32.mrb[27].mxu1  ;;  %v1785_v17 = vpop.f32.mrb[39].mxu0  ;;  %v1783_v59 = vadd.f32 %v1782_v51, %v4040_v49 }
 0x667   :  { %v1839_v1 = vrot.slane %v1742_v26, 4  ;;  %v1849_v28 = vrot.slane %v1781_v61, 4 }
 0x668   :  { %v1831_v8 = vadd.f32 %v1829_v13, %v5667_v38  ;;  %v1862_v17 = vrot.slane %v1783_v59, 5  ;;  %v1857_v13 = vrot.slane %v4632_v12, 7 }
 0x669   :  { %v1841_v5 = vadd.f32 %v1839_v1, %v5668_v32 }
 0x66a   :  { %v2826_v48 = vmul.f32 -1.442695, %v1831_v8 }
 0x66b   :  { %v2827_v62 = vmul.f32 -1.442695, %v1841_v5 }
 0x66c   :  { %3150 = vpow2.f32 %v2826_v48  ;;  %v1864_v48 = vadd.f32 %v1862_v17, %v4050_v6 }
 0x66d   :  { %3152 = vpow2.f32 %v2827_v62 }
 0x676   :  { %v3151_v23 = vpop.eup %3150 }
 0x677   :  { %v3153_v47 = vpop.eup %3152  ;;  %v1835_v36 = vadd.f32 1.0, %v3151_v23  ;;  %v2828_v23 = vmul.f32 -1.442695, %v1864_v48 }
 0x678   :  { %v1845_v14 = vadd.f32 1.0, %v3153_v47 }
 0x679   :  { %3154 = vrcp.f32 %v1835_v36 }
 0x67a   :  { %3156 = vrcp.f32 %v1845_v14 }
 0x683   :  { %v3155_v26 = vpop.eup %3154 }
 0x684   :  { %v3157_v55 = vpop.eup %3156  ;;  %v1851_v8 = vmul.f32 %v3155_v26, %v1849_v28 }
 0x685   :  { %v1859_v5 = vmul.f32 %v3157_v55, %v1857_v13  ;;  %v1854_v14 = vsub.f32 1.0, %v3157_v55 }
 0x686   :  { %v1852_v62 = vadd.f32 %v1851_v8, %v4048_v57 }
 0x688   :  { %3158 = vtanh.f32 %v1852_v62 }
 0x689   :  { %3160 = vpow2.f32 %v2828_v23 }
 0x692   :  { %v3159_v36 = vpop.eup %3158 }
 0x693   :  { %v1855_v51 = vmul.f32 %v3159_v36, %v1854_v14  ;;  %v3161_v10 = vpop.eup %3160 }
 0x694   :  { %v1868_v1 = vadd.f32 1.0, %v3161_v10 }
 0x695   :  { %v4785_v7 = vadd.f32 %v1859_v5, %v1855_v51 }
 0x696   :  { %3162 = vrcp.f32 %v1868_v1 }
 0x697   :  { %v4790_v12 = vsel %vm2489_vm4, %v4637_v60, %v4785_v7 }
 0x6a0   :  { %v3163_v8 = vpop.eup %3162 }
 0x6a3   :  { %v1821_v47 = vpop.f32.mrb[28].mxu1 }
 0x6a4   :  { %v1822_v59 = vadd.f32 %v1821_v47, %v4058_v20  ;;  %v1823_v61 = vpop.f32.mrb[29].mxu1 }
 0x6a5   :  { %v1824_v17 = vadd.f32 %v1823_v61, %v4060_v39  ;;  %v1825_v28 = vpop.f32.mrb[30].mxu1 }
 0x6a6   :  { %v1872_v26 = vrot.slane %v1822_v59, 5  ;;  %v1826_v13 = vpop.f32.mrb[31].mxu1 }
 0x6a7   :  { %v1882_v55 = vrot.slane %v1824_v17, 5  ;;  %v1894_v17 = vpack.c.bf16 %v4785_v7, %v4785_v7 }
 0x6a8   :  { %v1874_v48 = vadd.f32 %v1872_v26, %v4066_v33 }
 0x6a9   :  { %v1884_v5 = vmul.f32 %v3163_v8, %v1882_v55  ;;  %v4802_v13 = vrot.slane %v1894_v17, 2  ;;  %v5836_v55 = vld [vmem:[#allocation72_spill] sm:$0xff]  ;;  %v5837_v8 = vld [vmem:[#allocation73_spill] sm:$0xff] }
 0x6aa   :  { %v2829_v62 = vmul.f32 -1.442695, %v1874_v48  ;;  %v4906_v48 = vld [vmem:[#allocation7 + $0x2a0] ss:$24 sps:$4 sm:$0xff]  }
 0x6ab   :  { %v1885_v14 = vadd.f32 %v1884_v5, %v4071_v43  ;;  %v4909_v5 = vld [vmem:[#allocation7 + $0x2d4] ss:$24 sps:$4 sm:$0xff]   ;;  %v4935_v17 = vld [vmem:[#allocation7 + $0x98] ss:$24 sps:$4 sm:$0xff]  }
 0x6ac   :  { %3164 = vpow2.f32 %v2829_v62  ;;  %v5838_v62 = vld [vmem:[#allocation74_spill] sm:$0xff]  ;;  %5848 = vst [vmem:[#allocation58_spill] sm:$0xff] %v4935_v17 }
 0x6b6   :  { %v3165_v60 = vpop.eup %3164 }
 0x6b7   :  { %v1878_v23 = vadd.f32 1.0, %v3165_v60  ;;  %v5839_v60 = vld [vmem:[#allocation45_spill] sm:$0xff] }
 0x6b9   :  { %3166 = vrcp.f32 %v1878_v23  ;;  %v4914_v23 = vld [vmem:[#allocation7 + $0x2d0] ss:$24 sps:$4 sm:$0xff]  }
 0x6ba   :  { %3168 = vtanh.f32 %v1885_v14  ;;  %5840 = vst [vmem:[#allocation53_spill] sm:$0xff] %v4914_v23  ;;  %v4917_v14 = vld [vmem:[#allocation7 + $0x14] ss:$24 sps:$4 sm:$0xff]  }
 0x6bb   :  { %5841 = vst [vmem:[#allocation55_spill] sm:$0xff] %v4917_v14 }
 0x6c3   :  { %v3167_v36 = vpop.eup %3166 }
 0x6c4   :  { %v1887_v51 = vsub.f32 1.0, %v3167_v36  ;;  %v3169_v10 = vpop.eup %3168  ;;  %v1889_v47 = vmul.f32 %v3167_v36, %v4649_v21  ;;  %v4893_v21 = vld [vmem:[#allocation7 + $0x274] ss:$24 sps:$4 sm:$0xff]   ;;  %v5842_v36 = vld [vmem:[#allocation49_spill] sm:$0xff] }
 0x6c6   :  { %v1888_v1 = vmul.f32 %v3169_v10, %v1887_v51  ;;  %v5843_v51 = vld [vmem:[#allocation51_spill] sm:$0xff]  ;;  %v4923_v10 = vld [vmem:[#allocation7 + $0x38] ss:$24 sps:$4 sm:$0xff]  }
 0x6c7   :  { %5844 = vst [vmem:[#allocation63_spill] sm:$0xff] %v4923_v10 }
 0x6c8   :  { %v4797_v59 = vadd.f32 %v1889_v47, %v1888_v1  ;;  %v4926_v1 = vld [vmem:[#allocation7 + $0x6c] ss:$24 sps:$4 sm:$0xff]   ;;  %v4929_v47 = vld [vmem:[#allocation7 + $0x68] ss:$24 sps:$4 sm:$0xff]  }
 0x6c9   :  { %5845 = vst [vmem:[#allocation64_spill] sm:$0xff] %v4926_v1  ;;  %5846 = vst [vmem:[#allocation56_spill] sm:$0xff] %v4929_v47 }
 0x6ca   :  { %5831 = vst [vmem:[#allocation37_spill] sm:$0xff] %v4797_v59  ;;  %v1892_v61 = vrot.slane %v4797_v59, 7 }
 0x6cc   :  { %v1895_v28 = vpack.c.bf16 %v1892_v61, %v1892_v61  ;;  %v4932_v61 = vld [vmem:[#allocation7 + $0x9c] ss:$24 sps:$4 sm:$0xff]  }
 0x6cd   :  { %5847 = vst [vmem:[#allocation57_spill] sm:$0xff] %v4932_v61 }
 0x6ce   :  { %v1899_v26 = vrot.slane %v1895_v28, 2  ;;  %v4938_v28 = vld [vmem:[#allocation7 + $0xcc] ss:$24 sps:$4 sm:$0xff]  }
 0x6cf   :  { %5849 = vst [vmem:[#allocation59_spill] sm:$0xff] %v4938_v28 }
 0x6d0   :  { %1934 = vmatprep.mubr.bf16.mxu0 %v1899_v26  ;;  %1975 = vmatprep.mubr.bf16.mxu1 %v1899_v26 }
 0x6d1   :  { %1935 = vmatmul.mubr.bf16.vlgmr.msra.gmra.mrb[40].mxu0 %v4802_v13  ;;  %1976 = vmatmul.mubr.bf16.vlgmr.msra.gmra.mrb[32].mxu1 %v4802_v13 }
 0x6d2   :  { %1985 = vmatpush1.bf16.msra.mxu0 %v4462_v40  ;;  %2016 = vmatprep.mubr.bf16.mxu0 %v1899_v26  ;;  %v4821_v40 = vld [vmem:[#allocation7 + $0xc4] ss:$24 sps:$4 sm:$0xff]   ;;  %v4941_v26 = vld [vmem:[#allocation7 + $0xc8] ss:$24 sps:$4 sm:$0xff]  }
 0x6d3   :  { %1986 = vmatprep.subr.bf16.mxu0 %v4465_v15  ;;  %2106 = vmatpush1.bf16.msra.mxu1 %v4659_v30  ;;  %v4826_v15 = vld [vmem:[#allocation7 + $0xc0] ss:$24 sps:$4 sm:$0xff]   ;;  %5850 = vst [vmem:[#allocation60_spill] sm:$0xff] %v4941_v26 }
 0x6d4   :  { %2107 = vmatprep.subr.bf16.mxu1 %v4662_v45 }
 0x6d6   :  { %1987 = vmatpush1.bf16.msra.mxu0 %v4470_v4  ;;  %v4829_v4 = vld [vmem:[#allocation7 + $0xf4] ss:$24 sps:$4 sm:$0xff]  }
 0x6d7   :  { %1988 = vmatprep.subr.bf16.mxu0 %v4473_v58  ;;  %2108 = vmatpush1.bf16.msra.mxu1 %v4667_v34  ;;  %v4834_v58 = vld [vmem:[#allocation7 + $0xf0] ss:$24 sps:$4 sm:$0xff]  }
 0x6d8   :  { %2109 = vmatprep.subr.bf16.mxu1 %v4670_v24 }
 0x6da   :  { %1989 = vmatpush1.bf16.msra.mxu0 %v4478_v54  ;;  %v4837_v54 = vld [vmem:[#allocation7 + $0x124] ss:$24 sps:$4 sm:$0xff]  }
 0x6db   :  { %1990 = vmatprep.subr.bf16.mxu0 %v4481_v9  ;;  %2110 = vmatpush1.bf16.msra.mxu1 %v4675_v18  ;;  %v4842_v9 = vld [vmem:[#allocation7 + $0x120] ss:$24 sps:$4 sm:$0xff]  }
 0x6dc   :  { %2111 = vmatprep.subr.bf16.mxu1 %v4678_v25 }
 0x6de   :  { %1991 = vmatpush1.bf16.msra.mxu0 %v4486_v29  ;;  %v4845_v29 = vld [vmem:[#allocation7 + $0x154] ss:$24 sps:$4 sm:$0xff]  }
 0x6df   :  { %1992 = vmatprep.subr.bf16.mxu0 %v4489_v11  ;;  %2112 = vmatpush1.bf16.msra.mxu1 %v4683_v27  ;;  %v4850_v11 = vld [vmem:[#allocation7 + $0x150] ss:$24 sps:$4 sm:$0xff]  }
 0x6e0   :  { %2113 = vmatprep.subr.bf16.mxu1 %v4821_v40 }
 0x6e2   :  { %1993 = vmatpush1.bf16.msra.mxu0 %v4494_v31  ;;  %v4853_v31 = vld [vmem:[#allocation7 + $0x184] ss:$24 sps:$4 sm:$0xff]  }
 0x6e3   :  { %1994 = vmatprep.subr.bf16.mxu0 %v4497_v37  ;;  %2114 = vmatpush1.bf16.msra.mxu1 %v4826_v15  ;;  %v4858_v37 = vld [vmem:[#allocation7 + $0x180] ss:$24 sps:$4 sm:$0xff]  }
 0x6e4   :  { %2115 = vmatprep.subr.bf16.mxu1 %v4829_v4 }
 0x6e6   :  { %1995 = vmatpush1.bf16.msra.mxu0 %v4502_v3  ;;  %v4861_v3 = vld [vmem:[#allocation7 + $0x1b4] ss:$24 sps:$4 sm:$0xff]  }
 0x6e7   :  { %1996 = vmatprep.subr.bf16.mxu0 %v4505_v19  ;;  %2116 = vmatpush1.bf16.msra.mxu1 %v4834_v58  ;;  %v4866_v19 = vld [vmem:[#allocation7 + $0x1b0] ss:$24 sps:$4 sm:$0xff]  }
 0x6e8   :  { %2117 = vmatprep.subr.bf16.mxu1 %v4837_v54 }
 0x6ea   :  { %1997 = vmatpush1.bf16.msra.mxu0 %v4510_v53  ;;  %v4869_v53 = vld [vmem:[#allocation7 + $0x1e4] ss:$24 sps:$4 sm:$0xff]  }
 0x6eb   :  { %1998 = vmatprep.subr.bf16.mxu0 %v4513_v41  ;;  %2118 = vmatpush1.bf16.msra.mxu1 %v4842_v9  ;;  %v4874_v41 = vld [vmem:[#allocation7 + $0x1e0] ss:$24 sps:$4 sm:$0xff]  }
 0x6ec   :  { %2119 = vmatprep.subr.bf16.mxu1 %v4845_v29 }
 0x6ee   :  { %1999 = vmatpush1.bf16.msra.mxu0 %v4518_v50  ;;  %v4877_v50 = vld [vmem:[#allocation7 + $0x214] ss:$24 sps:$4 sm:$0xff]  }
 0x6ef   :  { %2000 = vmatprep.subr.bf16.mxu0 %v4521_v16  ;;  %2120 = vmatpush1.bf16.msra.mxu1 %v4850_v11  ;;  %v4882_v16 = vld [vmem:[#allocation7 + $0x210] ss:$24 sps:$4 sm:$0xff]  }
 0x6f0   :  { %2121 = vmatprep.subr.bf16.mxu1 %v4853_v31 }
 0x6f2   :  { %2001 = vmatpush1.bf16.msra.mxu0 %v4526_v46  ;;  %v4885_v46 = vld [vmem:[#allocation7 + $0x244] ss:$24 sps:$4 sm:$0xff]  }
 0x6f3   :  { %2002 = vmatprep.subr.bf16.mxu0 %v4529_v42  ;;  %2122 = vmatpush1.bf16.msra.mxu1 %v4858_v37  ;;  %v5832_v42 = vld [vmem:[#allocation39_spill] sm:$0xff] }
 0x6f4   :  { %2123 = vmatprep.subr.bf16.mxu1 %v4861_v3 }
 0x6f6   :  { %2003 = vmatpush1.bf16.msra.mxu0 %v4534_v0  ;;  %v5833_v0 = vld [vmem:[#allocation54_spill] sm:$0xff] }
 0x6f7   :  { %2004 = vmatprep.subr.bf16.mxu0 %v4537_v56  ;;  %2124 = vmatpush1.bf16.msra.mxu1 %v4866_v19  ;;  %v4890_v56 = vld [vmem:[#allocation7 + $0x240] ss:$24 sps:$4 sm:$0xff]  }
 0x6f8   :  { %2125 = vmatprep.subr.bf16.mxu1 %v4869_v53 }
 0x6fa   :  { %2005 = vmatpush1.bf16.msra.mxu0 %v5774_v2  ;;  %v5834_v2 = vld [vmem:[#allocation66_spill] sm:$0xff] }
 0x6fb   :  { %2006 = vmatprep.subr.bf16.mxu0 %v5775_v35  ;;  %2126 = vmatpush1.bf16.msra.mxu1 %v4874_v41  ;;  %v5835_v35 = vld [vmem:[#allocation70_spill] sm:$0xff] }
 0x6fc   :  { %2127 = vmatprep.subr.bf16.mxu1 %v4877_v50 }
 0x6fe   :  { %2007 = vmatpush1.bf16.msra.mxu0 %v5778_v22  ;;  %v4898_v22 = vld [vmem:[#allocation7 + $0x270] ss:$24 sps:$4 sm:$0xff]  }
 0x6ff   :  { %2008 = vmatprep.subr.bf16.mxu0 %v5779_v63  ;;  %2128 = vmatpush1.bf16.msra.mxu1 %v4882_v16  ;;  %v4901_v63 = vld [vmem:[#allocation7 + $0x2a4] ss:$24 sps:$4 sm:$0xff]  }
 0x700   :  { %2129 = vmatprep.subr.bf16.mxu1 %v4885_v46 }
 0x702   :  { %2009 = vmatpush1.bf16.msra.mxu0 %v5832_v42  ;;  %v4947_v42 = vld [vmem:[#allocation7 + $0xf8] ss:$24 sps:$4 sm:$0xff]  }
 0x703   :  { %2010 = vmatprep.subr.bf16.mxu0 %v5833_v0  ;;  %2130 = vmatpush1.bf16.msra.mxu1 %v4890_v56  ;;  %5852 = vst [vmem:[#allocation62_spill] sm:$0xff] %v4947_v42  ;;  %v4950_v0 = vld [vmem:[#allocation7 + $0x12c] ss:$24 sps:$4 sm:$0xff]  }
 0x704   :  { %2131 = vmatprep.subr.bf16.mxu1 %v4893_v21  ;;  %5853 = vst [vmem:[#allocation33_spill] sm:$0xff] %v4950_v0 }
 0x706   :  { %2011 = vmatpush1.bf16.msra.mxu0 %v5834_v2  ;;  %v4953_v2 = vld [vmem:[#allocation7 + $0x128] ss:$24 sps:$4 sm:$0xff]  }
 0x707   :  { %2012 = vmatprep.subr.bf16.mxu0 %v5835_v35  ;;  %2132 = vmatpush1.bf16.msra.mxu1 %v4898_v22  ;;  %5854 = vst [vmem:[#allocation15_spill] sm:$0xff] %v4953_v2  ;;  %v4956_v35 = vld [vmem:[#allocation7 + $0x15c] ss:$24 sps:$4 sm:$0xff]  }
 0x708   :  { %2133 = vmatprep.subr.bf16.mxu1 %v4901_v63  ;;  %5855 = vst [vmem:[#allocation16_spill] sm:$0xff] %v4956_v35 }
 0x70a   :  { %2013 = vmatpush1.bf16.msra.mxu0 %v5836_v55  ;;  %v4959_v55 = vld [vmem:[#allocation7 + $0x158] ss:$24 sps:$4 sm:$0xff]  }
 0x70b   :  { %2014 = vmatprep.subr.bf16.mxu0 %v5837_v8  ;;  %2134 = vmatpush1.bf16.msra.mxu1 %v4906_v48  ;;  %5856 = vst [vmem:[#allocation17_spill] sm:$0xff] %v4959_v55  ;;  %v4962_v8 = vld [vmem:[#allocation7 + $0x18c] ss:$24 sps:$4 sm:$0xff]  }
 0x70c   :  { %2135 = vmatprep.subr.bf16.mxu1 %v4909_v5  ;;  %5857 = vst [vmem:[#allocation18_spill] sm:$0xff] %v4962_v8 }
 0x70e   :  { %2015 = vmatpush1.bf16.msra.mxu0 %v5838_v62  ;;  %v4965_v62 = vld [vmem:[#allocation7 + $0x188] ss:$24 sps:$4 sm:$0xff]  }
 0x70f   :  { %2146 = vmatprep.subr.bf16.mxu0 %v5839_v60  ;;  %2136 = vmatpush1.bf16.msra.mxu1 %v4914_v23  ;;  %5858 = vst [vmem:[#allocation19_spill] sm:$0xff] %v4965_v62 }
 0x710   :  { %2187 = vmatprep.subr.bf16.mxu1 %v4917_v14 }
 0x711   :  { %2017 = vmatmul.mubr.bf16.vlgmr.msra.gmra.mrb[44].mxu0 %v4802_v13  ;;  %v4944_v13 = vld [vmem:[#allocation7 + $0xfc] ss:$24 sps:$4 sm:$0xff]  }
 0x712   :  { %2147 = vmatpush1.bf16.msra.mxu0 %v5842_v36  ;;  %5851 = vst [vmem:[#allocation61_spill] sm:$0xff] %v4944_v13 }
 0x713   :  { %2148 = vmatprep.subr.bf16.mxu0 %v5843_v51 }
 0x716   :  { %2149 = vmatpush1.bf16.msra.mxu0 %v4923_v10 }
 0x717   :  { %2150 = vmatprep.subr.bf16.mxu0 %v4926_v1 }
 0x71a   :  { %2151 = vmatpush1.bf16.msra.mxu0 %v4929_v47 }
 0x71b   :  { %2152 = vmatprep.subr.bf16.mxu0 %v4932_v61 }
 0x71e   :  { %2153 = vmatpush1.bf16.msra.mxu0 %v4935_v17 }
 0x71f   :  { %2154 = vmatprep.subr.bf16.mxu0 %v4938_v28 }
 0x722   :  { %2155 = vmatpush1.bf16.msra.mxu0 %v4941_v26  ;;  %v5874_v26 = vld [vmem:[#allocation65_spill] sm:$0xff] }
 0x723   :  { %2156 = vmatprep.subr.bf16.mxu0 %v4944_v13 }
 0x726   :  { %2157 = vmatpush1.bf16.msra.mxu0 %v4947_v42  ;;  %v5873_v42 = vld [vmem:[#allocation35_spill] sm:$0xff] }
 0x727   :  { %2158 = vmatprep.subr.bf16.mxu0 %v4950_v0  ;;  %v4968_v0 = vld [vmem:[#allocation7 + $0x1bc] ss:$24 sps:$4 sm:$0xff]  }
 0x728   :  { %5859 = vst [vmem:[#allocation20_spill] sm:$0xff] %v4968_v0 }
 0x72a   :  { %2159 = vmatpush1.bf16.msra.mxu0 %v4953_v2  ;;  %v4971_v2 = vld [vmem:[#allocation7 + $0x1b8] ss:$24 sps:$4 sm:$0xff]  }
 0x72b   :  { %2160 = vmatprep.subr.bf16.mxu0 %v4956_v35  ;;  %5860 = vst [vmem:[#allocation21_spill] sm:$0xff] %v4971_v2  ;;  %v4974_v35 = vld [vmem:[#allocation7 + $0x1ec] ss:$24 sps:$4 sm:$0xff]  }
 0x72c   :  { %5861 = vst [vmem:[#allocation22_spill] sm:$0xff] %v4974_v35 }
 0x72e   :  { %2161 = vmatpush1.bf16.msra.mxu0 %v4959_v55  ;;  %v4977_v55 = vld [vmem:[#allocation7 + $0x1e8] ss:$24 sps:$4 sm:$0xff]  }
 0x72f   :  { %2162 = vmatprep.subr.bf16.mxu0 %v4962_v8  ;;  %5862 = vst [vmem:[#allocation23_spill] sm:$0xff] %v4977_v55  ;;  %v4980_v8 = vld [vmem:[#allocation7 + $0x21c] ss:$24 sps:$4 sm:$0xff]  }
 0x730   :  { %5863 = vst [vmem:[#allocation24_spill] sm:$0xff] %v4980_v8 }
 0x732   :  { %2163 = vmatpush1.bf16.msra.mxu0 %v4965_v62  ;;  %v4983_v62 = vld [vmem:[#allocation7 + $0x218] ss:$24 sps:$4 sm:$0xff]  }
 0x733   :  { %2164 = vmatprep.subr.bf16.mxu0 %v4968_v0  ;;  %5864 = vst [vmem:[#allocation25_spill] sm:$0xff] %v4983_v62  ;;  %v4986_v0 = vld [vmem:[#allocation7 + $0x24c] ss:$24 sps:$4 sm:$0xff]  }
 0x734   :  { %5865 = vst [vmem:[#allocation26_spill] sm:$0xff] %v4986_v0 }
 0x736   :  { %2165 = vmatpush1.bf16.msra.mxu0 %v4971_v2  ;;  %v4989_v2 = vld [vmem:[#allocation7 + $0x248] ss:$24 sps:$4 sm:$0xff]  }
 0x737   :  { %2166 = vmatprep.subr.bf16.mxu0 %v4974_v35  ;;  %5866 = vst [vmem:[#allocation27_spill] sm:$0xff] %v4989_v2  ;;  %v4992_v35 = vld [vmem:[#allocation7 + $0x27c] ss:$24 sps:$4 sm:$0xff]  }
 0x738   :  { %5867 = vst [vmem:[#allocation28_spill] sm:$0xff] %v4992_v35 }
 0x73a   :  { %2167 = vmatpush1.bf16.msra.mxu0 %v4977_v55  ;;  %v4995_v55 = vld [vmem:[#allocation7 + $0x278] ss:$24 sps:$4 sm:$0xff]  }
 0x73b   :  { %2168 = vmatprep.subr.bf16.mxu0 %v4980_v8  ;;  %5868 = vst [vmem:[#allocation29_spill] sm:$0xff] %v4995_v55  ;;  %v4998_v8 = vld [vmem:[#allocation7 + $0x2ac] ss:$24 sps:$4 sm:$0xff]  }
 0x73c   :  { %5869 = vst [vmem:[#allocation30_spill] sm:$0xff] %v4998_v8 }
 0x73e   :  { %2169 = vmatpush1.bf16.msra.mxu0 %v4983_v62  ;;  %v5001_v62 = vld [vmem:[#allocation7 + $0x2a8] ss:$24 sps:$4 sm:$0xff]  }
 0x73f   :  { %2170 = vmatprep.subr.bf16.mxu0 %v4986_v0  ;;  %5870 = vst [vmem:[#allocation31_spill] sm:$0xff] %v5001_v62  ;;  %v5004_v0 = vld [vmem:[#allocation7 + $0x2dc] ss:$24 sps:$4 sm:$0xff]  }
 0x740   :  { %5871 = vst [vmem:[#allocation32_spill] sm:$0xff] %v5004_v0 }
 0x742   :  { %2171 = vmatpush1.bf16.msra.mxu0 %v4989_v2  ;;  %v5872_v2 = vld [vmem:[#allocation41_spill] sm:$0xff] }
 0x743   :  { %2172 = vmatprep.subr.bf16.mxu0 %v4992_v35 }
 0x746   :  { %2173 = vmatpush1.bf16.msra.mxu0 %v4995_v55 }
 0x747   :  { %2174 = vmatprep.subr.bf16.mxu0 %v4998_v8 }
 0x74a   :  { %2175 = vmatpush1.bf16.msra.mxu0 %v5001_v62 }
 0x74b   :  { %2176 = vmatprep.subr.bf16.mxu0 %v5004_v0 }
 0x74e   :  { %2177 = vmatpush1.bf16.msra.mxu0 %v5872_v2 }
 0x74f   :  { %2304 = vmatprep.subr.bf16.mxu0 %v5873_v42 }
 0x7a4   :  { %v1936_v35 = vpop.f32.mrb[40].mxu0  ;;  %v1977_v13 = vpop.f32.mrb[32].mxu1 }
 0x7a5   :  { %v1937_v55 = vadd.f32 %v1936_v35, %v5874_v26  ;;  %v1938_v28 = vpop.f32.mrb[41].mxu0  ;;  %v1979_v17 = vpop.f32.mrb[33].mxu1 }
 0x7a6   :  { %v1939_v8 = vadd.f32 %v1938_v28, %v5723_v44  ;;  %v1940_v61 = vpop.f32.mrb[42].mxu0  ;;  %v1981_v47 = vpop.f32.mrb[34].mxu1 }
 0x7a7   :  { %v2026_v1 = vrot.slane %v1937_v55, 3  ;;  %v1941_v62 = vpop.f32.mrb[43].mxu0  ;;  %v1982_v10 = vpop.f32.mrb[35].mxu1  ;;  %v1980_v47 = vadd.f32 %v1979_v17, %v4040_v49  ;;  %v1978_v61 = vadd.f32 %v1977_v13, %v5669_v52 }
 0x7a8   :  { %v2036_v51 = vrot.slane %v1939_v8, 3 }
 0x7a9   :  { %v2028_v0 = vadd.f32 %v2026_v1, %v5667_v38  ;;  %v2059_v10 = vrot.slane %v1980_v47, 6  ;;  %v2046_v28 = vrot.slane %v1978_v61, 3  ;;  %v2054_v1 = vrot.slane %v4785_v7, 7 }
 0x7aa   :  { %v2038_v2 = vadd.f32 %v2036_v51, %v5668_v32 }
 0x7ab   :  { %v2830_v36 = vmul.f32 -1.442695, %v2028_v0 }
 0x7ac   :  { %v2831_v42 = vmul.f32 -1.442695, %v2038_v2 }
 0x7ad   :  { %3170 = vpow2.f32 %v2830_v36  ;;  %v2061_v36 = vadd.f32 %v2059_v10, %v4050_v6 }
 0x7ae   :  { %3172 = vpow2.f32 %v2831_v42 }
 0x7b7   :  { %v3171_v14 = vpop.eup %3170 }
 0x7b8   :  { %v3173_v35 = vpop.eup %3172  ;;  %v2032_v26 = vadd.f32 1.0, %v3171_v14  ;;  %v2832_v14 = vmul.f32 -1.442695, %v2061_v36 }
 0x7b9   :  { %v2042_v23 = vadd.f32 1.0, %v3173_v35 }
 0x7ba   :  { %3174 = vrcp.f32 %v2032_v26 }
 0x7bb   :  { %3176 = vrcp.f32 %v2042_v23 }
 0x7c4   :  { %v3175_v55 = vpop.eup %3174 }
 0x7c5   :  { %v3177_v51 = vpop.eup %3176  ;;  %v2048_v0 = vmul.f32 %v3175_v55, %v2046_v28 }
 0x7c6   :  { %v2056_v8 = vmul.f32 %v3177_v51, %v2054_v1  ;;  %v2051_v23 = vsub.f32 1.0, %v3177_v51 }
 0x7c7   :  { %v2049_v62 = vadd.f32 %v2048_v0, %v4048_v57 }
 0x7c9   :  { %3178 = vtanh.f32 %v2049_v62 }
 0x7ca   :  { %3180 = vpow2.f32 %v2832_v14 }
 0x7d3   :  { %v3179_v26 = vpop.eup %3178 }
 0x7d4   :  { %v2052_v17 = vmul.f32 %v3179_v26, %v2051_v23  ;;  %v3181_v2 = vpop.eup %3180 }
 0x7d5   :  { %v2065_v42 = vadd.f32 1.0, %v3181_v2  ;;  %v2086_v2 = vrot.slane %v4797_v59, 1 }
 0x7d6   :  { %v5018_v13 = vadd.f32 %v2056_v8, %v2052_v17 }
 0x7d7   :  { %3182 = vrcp.f32 %v2065_v42 }
 0x7d8   :  { %v5023_v7 = vsel %vm2491_vm5, %v4790_v12, %v5018_v13 }
 0x7e1   :  { %v3183_v0 = vpop.eup %3182 }
 0x7e4   :  { %v2018_v35 = vpop.f32.mrb[44].mxu0 }
 0x7e5   :  { %v2019_v47 = vadd.f32 %v2018_v35, %v4058_v20  ;;  %v2020_v61 = vpop.f32.mrb[45].mxu0 }
 0x7e6   :  { %v2021_v10 = vadd.f32 %v2020_v61, %v4060_v39  ;;  %v2022_v28 = vpop.f32.mrb[46].mxu0 }
 0x7e7   :  { %v2069_v55 = vrot.slane %v2019_v47, 6  ;;  %v2023_v1 = vpop.f32.mrb[47].mxu0 }
 0x7e8   :  { %v2079_v51 = vrot.slane %v2021_v10, 6  ;;  %v2093_v10 = vpack.c.bf16 %v5018_v13, %v5018_v13 }
 0x7e9   :  { %v2071_v36 = vadd.f32 %v2069_v55, %v4066_v33 }
 0x7ea   :  { %v2081_v8 = vmul.f32 %v3183_v0, %v2079_v51  ;;  %v2096_v1 = vshrl.u32 %v2093_v10, 16  ;;  %v5886_v10 = vld [vmem:[#allocation61_spill] sm:$0xff] }
 0x7eb   :  { %v2833_v62 = vmul.f32 -1.442695, %v2071_v36 }
 0x7ec   :  { %v2082_v23 = vadd.f32 %v2081_v8, %v4071_v43  ;;  %v5035_v36 = vrot.slane %v2096_v1, 2  ;;  %v5039_v8 = vld [vmem:[#allocation7 + $0x10] ss:$24 sps:$4 sm:$0xff]  }
 0x7ed   :  { %3184 = vpow2.f32 %v2833_v62  ;;  %v5042_v62 = vld [vmem:[#allocation7 + $0x44] ss:$24 sps:$4 sm:$0xff]   ;;  %v5889_v1 = vld [vmem:[#allocation15_spill] sm:$0xff] }
 0x7f7   :  { %v3185_v12 = vpop.eup %3184 }
 0x7f8   :  { %v2075_v14 = vadd.f32 1.0, %v3185_v12  ;;  %v5047_v12 = vld [vmem:[#allocation7 + $0x40] ss:$24 sps:$4 sm:$0xff]  }
 0x7fa   :  { %3186 = vrcp.f32 %v2075_v14  ;;  %v5050_v14 = vld [vmem:[#allocation7 + $0x74] ss:$24 sps:$4 sm:$0xff]  }
 0x7fb   :  { %3188 = vtanh.f32 %v2082_v23  ;;  %v5055_v23 = vld [vmem:[#allocation7 + $0x70] ss:$24 sps:$4 sm:$0xff]  }
 0x804   :  { %v3187_v26 = vpop.eup %3186 }
 0x805   :  { %v2084_v17 = vsub.f32 1.0, %v3187_v26  ;;  %v3189_v42 = vpop.eup %3188  ;;  %v2088_v47 = vmul.f32 %v3187_v26, %v2086_v2  ;;  %v5058_v26 = vld [vmem:[#allocation7 + $0xa4] ss:$24 sps:$4 sm:$0xff]   ;;  %v5879_v2 = vld [vmem:[#allocation63_spill] sm:$0xff] }
 0x807   :  { %v2085_v35 = vmul.f32 %v3189_v42, %v2084_v17  ;;  %v5878_v17 = vld [vmem:[#allocation51_spill] sm:$0xff]  ;;  %v5882_v42 = vld [vmem:[#allocation57_spill] sm:$0xff] }
 0x809   :  { %v5030_v61 = vadd.f32 %v2088_v47, %v2085_v35  ;;  %v5883_v35 = vld [vmem:[#allocation58_spill] sm:$0xff]  ;;  %v5885_v47 = vld [vmem:[#allocation60_spill] sm:$0xff] }
 0x80b   :  { %v2091_v28 = vrot.slane %v5030_v61, 5 }
 0x80d   :  { %v2094_v55 = vpack.c.bf16 %v2091_v28, %v2091_v28  ;;  %v5887_v28 = vld [vmem:[#allocation62_spill] sm:$0xff] }
 0x80f   :  { %v2100_v51 = vshrl.u32 %v2094_v55, 16  ;;  %v5888_v55 = vld [vmem:[#allocation33_spill] sm:$0xff] }
 0x811   :  { %v2102_v0 = vrot.slane %v2100_v51, 2  ;;  %v5890_v51 = vld [vmem:[#allocation16_spill] sm:$0xff] }
 0x813   :  { %2137 = vmatprep.mubr.bf16.mxu1 %v2102_v0  ;;  %2178 = vmatprep.mubr.bf16.mxu0 %v2102_v0 }
 0x814   :  { %2138 = vmatmul.mubr.bf16.vlgmr.msra.gmra.mrb[36].mxu1 %v5035_v36  ;;  %2179 = vmatmul.mubr.bf16.vlgmr.msra.gmra.mrb[48].mxu0 %v5035_v36 }
 0x815   :  { %2188 = vmatpush1.bf16.msra.mxu1 %v5039_v8  ;;  %2219 = vmatprep.mubr.bf16.mxu1 %v2102_v0  ;;  %v5891_v0 = vld [vmem:[#allocation17_spill] sm:$0xff] }
 0x816   :  { %2189 = vmatprep.subr.bf16.mxu1 %v5042_v62  ;;  %2305 = vmatpush1.bf16.msra.mxu0 %v4659_v30  ;;  %v5063_v30 = vld [vmem:[#allocation7 + $0xa0] ss:$24 sps:$4 sm:$0xff]  }
 0x817   :  { %2306 = vmatprep.subr.bf16.mxu0 %v4662_v45  ;;  %v5066_v45 = vld [vmem:[#allocation7 + $0xd4] ss:$24 sps:$4 sm:$0xff]  }
 0x819   :  { %2190 = vmatpush1.bf16.msra.mxu1 %v5047_v12 }
 0x81a   :  { %2191 = vmatprep.subr.bf16.mxu1 %v5050_v14  ;;  %2307 = vmatpush1.bf16.msra.mxu0 %v4667_v34  ;;  %v5071_v34 = vld [vmem:[#allocation7 + $0xd0] ss:$24 sps:$4 sm:$0xff]  }
 0x81b   :  { %2308 = vmatprep.subr.bf16.mxu0 %v4670_v24  ;;  %v5074_v24 = vld [vmem:[#allocation7 + $0x104] ss:$24 sps:$4 sm:$0xff]  }
 0x81d   :  { %2192 = vmatpush1.bf16.msra.mxu1 %v5055_v23 }
 0x81e   :  { %2193 = vmatprep.subr.bf16.mxu1 %v5058_v26  ;;  %2309 = vmatpush1.bf16.msra.mxu0 %v4675_v18  ;;  %v5079_v18 = vld [vmem:[#allocation7 + $0x100] ss:$24 sps:$4 sm:$0xff]  }
 0x81f   :  { %2310 = vmatprep.subr.bf16.mxu0 %v4678_v25  ;;  %v5082_v25 = vld [vmem:[#allocation7 + $0x134] ss:$24 sps:$4 sm:$0xff]  }
 0x821   :  { %2194 = vmatpush1.bf16.msra.mxu1 %v5063_v30 }
 0x822   :  { %2195 = vmatprep.subr.bf16.mxu1 %v5066_v45  ;;  %2311 = vmatpush1.bf16.msra.mxu0 %v4683_v27  ;;  %v5087_v27 = vld [vmem:[#allocation7 + $0x130] ss:$24 sps:$4 sm:$0xff]  }
 0x823   :  { %2312 = vmatprep.subr.bf16.mxu0 %v4821_v40  ;;  %v5090_v40 = vld [vmem:[#allocation7 + $0x164] ss:$24 sps:$4 sm:$0xff]  }
 0x825   :  { %2196 = vmatpush1.bf16.msra.mxu1 %v5071_v34 }
 0x826   :  { %2197 = vmatprep.subr.bf16.mxu1 %v5074_v24  ;;  %2313 = vmatpush1.bf16.msra.mxu0 %v4826_v15  ;;  %v5095_v15 = vld [vmem:[#allocation7 + $0x160] ss:$24 sps:$4 sm:$0xff]  }
 0x827   :  { %2314 = vmatprep.subr.bf16.mxu0 %v4829_v4  ;;  %v5098_v4 = vld [vmem:[#allocation7 + $0x194] ss:$24 sps:$4 sm:$0xff]  }
 0x829   :  { %2198 = vmatpush1.bf16.msra.mxu1 %v5079_v18 }
 0x82a   :  { %2199 = vmatprep.subr.bf16.mxu1 %v5082_v25  ;;  %2315 = vmatpush1.bf16.msra.mxu0 %v4834_v58  ;;  %v5103_v58 = vld [vmem:[#allocation7 + $0x190] ss:$24 sps:$4 sm:$0xff]  }
 0x82b   :  { %2316 = vmatprep.subr.bf16.mxu0 %v4837_v54  ;;  %v5106_v54 = vld [vmem:[#allocation7 + $0x1c4] ss:$24 sps:$4 sm:$0xff]  }
 0x82d   :  { %2200 = vmatpush1.bf16.msra.mxu1 %v5087_v27 }
 0x82e   :  { %2201 = vmatprep.subr.bf16.mxu1 %v5090_v40  ;;  %2317 = vmatpush1.bf16.msra.mxu0 %v4842_v9  ;;  %v5111_v9 = vld [vmem:[#allocation7 + $0x1c0] ss:$24 sps:$4 sm:$0xff]  }
 0x82f   :  { %2318 = vmatprep.subr.bf16.mxu0 %v4845_v29  ;;  %v5114_v29 = vld [vmem:[#allocation7 + $0x1f4] ss:$24 sps:$4 sm:$0xff]  }
 0x831   :  { %2202 = vmatpush1.bf16.msra.mxu1 %v5095_v15 }
 0x832   :  { %2203 = vmatprep.subr.bf16.mxu1 %v5098_v4  ;;  %2319 = vmatpush1.bf16.msra.mxu0 %v4850_v11  ;;  %v5119_v11 = vld [vmem:[#allocation7 + $0x1f0] ss:$24 sps:$4 sm:$0xff]  }
 0x833   :  { %2320 = vmatprep.subr.bf16.mxu0 %v4853_v31  ;;  %v5122_v31 = vld [vmem:[#allocation7 + $0x224] ss:$24 sps:$4 sm:$0xff]  }
 0x835   :  { %2204 = vmatpush1.bf16.msra.mxu1 %v5103_v58 }
 0x836   :  { %2205 = vmatprep.subr.bf16.mxu1 %v5106_v54  ;;  %2321 = vmatpush1.bf16.msra.mxu0 %v4858_v37  ;;  %v5127_v37 = vld [vmem:[#allocation7 + $0x220] ss:$24 sps:$4 sm:$0xff]  }
 0x837   :  { %2322 = vmatprep.subr.bf16.mxu0 %v4861_v3  ;;  %v5130_v3 = vld [vmem:[#allocation7 + $0x254] ss:$24 sps:$4 sm:$0xff]  }
 0x839   :  { %2206 = vmatpush1.bf16.msra.mxu1 %v5111_v9 }
 0x83a   :  { %2207 = vmatprep.subr.bf16.mxu1 %v5114_v29  ;;  %2323 = vmatpush1.bf16.msra.mxu0 %v4866_v19  ;;  %v5135_v19 = vld [vmem:[#allocation7 + $0x250] ss:$24 sps:$4 sm:$0xff]  }
 0x83b   :  { %2324 = vmatprep.subr.bf16.mxu0 %v4869_v53  ;;  %v5138_v53 = vld [vmem:[#allocation7 + $0x284] ss:$24 sps:$4 sm:$0xff]  }
 0x83d   :  { %2208 = vmatpush1.bf16.msra.mxu1 %v5119_v11 }
 0x83e   :  { %2209 = vmatprep.subr.bf16.mxu1 %v5122_v31  ;;  %2325 = vmatpush1.bf16.msra.mxu0 %v4874_v41  ;;  %v5143_v41 = vld [vmem:[#allocation7 + $0x280] ss:$24 sps:$4 sm:$0xff]  }
 0x83f   :  { %2326 = vmatprep.subr.bf16.mxu0 %v4877_v50  ;;  %v5146_v50 = vld [vmem:[#allocation7 + $0x2b4] ss:$24 sps:$4 sm:$0xff]  }
 0x841   :  { %2210 = vmatpush1.bf16.msra.mxu1 %v5127_v37 }
 0x842   :  { %2211 = vmatprep.subr.bf16.mxu1 %v5130_v3  ;;  %2327 = vmatpush1.bf16.msra.mxu0 %v4882_v16  ;;  %v5151_v16 = vld [vmem:[#allocation7 + $0x2b0] ss:$24 sps:$4 sm:$0xff]  }
 0x843   :  { %2328 = vmatprep.subr.bf16.mxu0 %v4885_v46  ;;  %v5154_v46 = vld [vmem:[#allocation7 + $0x2e4] ss:$24 sps:$4 sm:$0xff]  }
 0x845   :  { %2212 = vmatpush1.bf16.msra.mxu1 %v5135_v19 }
 0x846   :  { %2213 = vmatprep.subr.bf16.mxu1 %v5138_v53  ;;  %2329 = vmatpush1.bf16.msra.mxu0 %v4890_v56  ;;  %v5159_v56 = vld [vmem:[#allocation7 + $0x2e0] ss:$24 sps:$4 sm:$0xff]  }
 0x847   :  { %2330 = vmatprep.subr.bf16.mxu0 %v4893_v21  ;;  %v5875_v21 = vld [vmem:[#allocation53_spill] sm:$0xff] }
 0x849   :  { %2214 = vmatpush1.bf16.msra.mxu1 %v5143_v41 }
 0x84a   :  { %2215 = vmatprep.subr.bf16.mxu1 %v5146_v50  ;;  %2331 = vmatpush1.bf16.msra.mxu0 %v4898_v22  ;;  %v5876_v22 = vld [vmem:[#allocation55_spill] sm:$0xff] }
 0x84b   :  { %2332 = vmatprep.subr.bf16.mxu0 %v4901_v63  ;;  %v5877_v63 = vld [vmem:[#allocation49_spill] sm:$0xff] }
 0x84d   :  { %2216 = vmatpush1.bf16.msra.mxu1 %v5151_v16 }
 0x84e   :  { %2217 = vmatprep.subr.bf16.mxu1 %v5154_v46  ;;  %2333 = vmatpush1.bf16.msra.mxu0 %v4906_v48  ;;  %v5880_v48 = vld [vmem:[#allocation64_spill] sm:$0xff] }
 0x84f   :  { %2334 = vmatprep.subr.bf16.mxu0 %v4909_v5  ;;  %v5881_v5 = vld [vmem:[#allocation56_spill] sm:$0xff] }
 0x851   :  { %2218 = vmatpush1.bf16.msra.mxu1 %v5159_v56 }
 0x852   :  { %2345 = vmatprep.subr.bf16.mxu1 %v5839_v60  ;;  %2335 = vmatpush1.bf16.msra.mxu0 %v5875_v21  ;;  %v5884_v60 = vld [vmem:[#allocation59_spill] sm:$0xff] }
 0x853   :  { %2386 = vmatprep.subr.bf16.mxu0 %v5876_v22  ;;  %v5893_v21 = vld [vmem:[#allocation19_spill] sm:$0xff]  ;;  %v5894_v22 = vld [vmem:[#allocation20_spill] sm:$0xff] }
 0x854   :  { %2220 = vmatmul.mubr.bf16.vlgmr.msra.gmra.mrb[40].mxu1 %v5035_v36  ;;  %v5892_v36 = vld [vmem:[#allocation18_spill] sm:$0xff] }
 0x855   :  { %2346 = vmatpush1.bf16.msra.mxu1 %v5877_v63  ;;  %v5895_v63 = vld [vmem:[#allocation21_spill] sm:$0xff] }
 0x856   :  { %2347 = vmatprep.subr.bf16.mxu1 %v5878_v17  ;;  %v5896_v17 = vld [vmem:[#allocation22_spill] sm:$0xff] }
 0x859   :  { %2348 = vmatpush1.bf16.msra.mxu1 %v5879_v2  ;;  %v5897_v2 = vld [vmem:[#allocation23_spill] sm:$0xff] }
 0x85a   :  { %2349 = vmatprep.subr.bf16.mxu1 %v5880_v48  ;;  %v5898_v48 = vld [vmem:[#allocation24_spill] sm:$0xff] }
 0x85d   :  { %2350 = vmatpush1.bf16.msra.mxu1 %v5881_v5  ;;  %v5899_v5 = vld [vmem:[#allocation25_spill] sm:$0xff] }
 0x85e   :  { %2351 = vmatprep.subr.bf16.mxu1 %v5882_v42  ;;  %v5900_v42 = vld [vmem:[#allocation26_spill] sm:$0xff] }
 0x861   :  { %2352 = vmatpush1.bf16.msra.mxu1 %v5883_v35  ;;  %v5901_v35 = vld [vmem:[#allocation27_spill] sm:$0xff] }
 0x862   :  { %2353 = vmatprep.subr.bf16.mxu1 %v5884_v60  ;;  %v5902_v60 = vld [vmem:[#allocation28_spill] sm:$0xff] }
 0x865   :  { %2354 = vmatpush1.bf16.msra.mxu1 %v5885_v47  ;;  %v5903_v47 = vld [vmem:[#allocation29_spill] sm:$0xff] }
 0x866   :  { %2355 = vmatprep.subr.bf16.mxu1 %v5886_v10  ;;  %v5904_v10 = vld [vmem:[#allocation30_spill] sm:$0xff] }
 0x869   :  { %2356 = vmatpush1.bf16.msra.mxu1 %v5887_v28  ;;  %v5905_v28 = vld [vmem:[#allocation31_spill] sm:$0xff] }
 0x86a   :  { %2357 = vmatprep.subr.bf16.mxu1 %v5888_v55  ;;  %v5906_v55 = vld [vmem:[#allocation32_spill] sm:$0xff] }
 0x86d   :  { %2358 = vmatpush1.bf16.msra.mxu1 %v5889_v1  ;;  %v3421_v1 = vld [vmem:[#allocation7 + $0x2d8] ss:$24 sps:$4 sm:$0xff]  }
 0x86e   :  { %2359 = vmatprep.subr.bf16.mxu1 %v5890_v51 }
 0x871   :  { %2360 = vmatpush1.bf16.msra.mxu1 %v5891_v0 }
 0x872   :  { %2361 = vmatprep.subr.bf16.mxu1 %v5892_v36  ;;  %v5907_v36 = vld [vmem:[#allocation65_spill] sm:$0xff] }
 0x875   :  { %2362 = vmatpush1.bf16.msra.mxu1 %v5893_v21 }
 0x876   :  { %2363 = vmatprep.subr.bf16.mxu1 %v5894_v22 }
 0x879   :  { %2364 = vmatpush1.bf16.msra.mxu1 %v5895_v63 }
 0x87a   :  { %2365 = vmatprep.subr.bf16.mxu1 %v5896_v17 }
 0x87d   :  { %2366 = vmatpush1.bf16.msra.mxu1 %v5897_v2 }
 0x87e   :  { %2367 = vmatprep.subr.bf16.mxu1 %v5898_v48 }
 0x881   :  { %2368 = vmatpush1.bf16.msra.mxu1 %v5899_v5 }
 0x882   :  { %2369 = vmatprep.subr.bf16.mxu1 %v5900_v42 }
 0x885   :  { %2370 = vmatpush1.bf16.msra.mxu1 %v5901_v35 }
 0x886   :  { %2371 = vmatprep.subr.bf16.mxu1 %v5902_v60 }
 0x889   :  { %2372 = vmatpush1.bf16.msra.mxu1 %v5903_v47 }
 0x88a   :  { %2373 = vmatprep.subr.bf16.mxu1 %v5904_v10 }
 0x88d   :  { %2374 = vmatpush1.bf16.msra.mxu1 %v5905_v28 }
 0x88e   :  { %2375 = vmatprep.subr.bf16.mxu1 %v5906_v55 }
 0x891   :  { %2376 = vmatpush1.bf16.msra.mxu1 %v3421_v1 }
 0x8e7   :  { %v2139_v51 = vpop.f32.mrb[36].mxu1  ;;  %v2180_v0 = vpop.f32.mrb[48].mxu0 }
 0x8e8   :  { %v2140_v21 = vadd.f32 %v2139_v51, %v5907_v36  ;;  %v2141_v22 = vpop.f32.mrb[37].mxu1  ;;  %v2182_v63 = vpop.f32.mrb[49].mxu0 }
 0x8e9   :  { %v2142_v17 = vadd.f32 %v2141_v22, %v5723_v44  ;;  %v2143_v2 = vpop.f32.mrb[38].mxu1  ;;  %v2184_v48 = vpop.f32.mrb[50].mxu0  ;;  %v2183_v22 = vadd.f32 %v2182_v63, %v4040_v49 }
 0x8ea   :  { %v2229_v5 = vrot.slane %v2140_v21, 2  ;;  %v2144_v42 = vpop.f32.mrb[39].mxu1  ;;  %v2185_v35 = vpop.f32.mrb[51].mxu0  ;;  %v2181_v21 = vadd.f32 %v2180_v0, %v5669_v52 }
 0x8eb   :  { %v2239_v60 = vrot.slane %v2142_v17, 2  ;;  %v2262_v2 = vrot.slane %v2183_v22, 7 }
 0x8ec   :  { %v2231_v47 = vadd.f32 %v2229_v5, %v5667_v38  ;;  %v2249_v17 = vrot.slane %v2181_v21, 2  ;;  %v2257_v5 = vrot.slane %v5018_v13, 7 }
 0x8ed   :  { %v2241_v10 = vadd.f32 %v2239_v60, %v5668_v32  ;;  %v2264_v60 = vadd.f32 %v2262_v2, %v4050_v6 }
 0x8ee   :  { %v2834_v28 = vmul.f32 -1.442695, %v2231_v47 }
 0x8ef   :  { %v2835_v55 = vmul.f32 -1.442695, %v2241_v10 }
 0x8f0   :  { %3190 = vpow2.f32 %v2834_v28  ;;  %v2836_v28 = vmul.f32 -1.442695, %v2264_v60 }
 0x8f1   :  { %3192 = vpow2.f32 %v2835_v55 }
 0x8fa   :  { %v3191_v1 = vpop.eup %3190 }
 0x8fb   :  { %v3193_v51 = vpop.eup %3192  ;;  %v2235_v59 = vadd.f32 1.0, %v3191_v1 }
 0x8fc   :  { %v2245_v36 = vadd.f32 1.0, %v3193_v51 }
 0x8fd   :  { %3194 = vrcp.f32 %v2235_v59 }
 0x8fe   :  { %3196 = vrcp.f32 %v2245_v36 }
 0x907   :  { %v3195_v48 = vpop.eup %3194 }
 0x908   :  { %v3197_v42 = vpop.eup %3196  ;;  %v2251_v35 = vmul.f32 %v3195_v48, %v2249_v17 }
 0x909   :  { %v2259_v47 = vmul.f32 %v3197_v42, %v2257_v5  ;;  %v2254_v59 = vsub.f32 1.0, %v3197_v42 }
 0x90a   :  { %v2252_v10 = vadd.f32 %v2251_v35, %v4048_v57 }
 0x90c   :  { %3198 = vtanh.f32 %v2252_v10 }
 0x90d   :  { %3200 = vpow2.f32 %v2836_v28 }
 0x916   :  { %v3199_v36 = vpop.eup %3198 }
 0x917   :  { %v2255_v63 = vmul.f32 %v3199_v36, %v2254_v59  ;;  %v3201_v55 = vpop.eup %3200 }
 0x918   :  { %v2268_v1 = vadd.f32 1.0, %v3201_v55  ;;  %v2289_v55 = vrot.slane %v5030_v61, 1 }
 0x919   :  { %v5205_v0 = vadd.f32 %v2259_v47, %v2255_v63 }
 0x91a   :  { %3202 = vrcp.f32 %v2268_v1 }
 0x91b   :  { %v5210_v13 = vsel %vm2493_vm6, %v5023_v7, %v5205_v0 }
 0x924   :  { %v3203_v35 = vpop.eup %3202 }
 0x927   :  { %v2221_v51 = vpop.f32.mrb[40].mxu1 }
 0x928   :  { %v2222_v22 = vadd.f32 %v2221_v51, %v4058_v20  ;;  %v2223_v21 = vpop.f32.mrb[41].mxu1 }
 0x929   :  { %v2224_v2 = vadd.f32 %v2223_v21, %v4060_v39  ;;  %v2225_v17 = vpop.f32.mrb[42].mxu1 }
 0x92a   :  { %v2272_v48 = vrot.slane %v2222_v22, 7  ;;  %v2226_v5 = vpop.f32.mrb[43].mxu1  ;;  %v2296_v17 = vpack.c.bf16 %v5205_v0, %v5205_v0 }
 0x92b   :  { %v2282_v42 = vrot.slane %v2224_v2, 7 }
 0x92c   :  { %v2274_v60 = vadd.f32 %v2272_v48, %v4066_v33 }
 0x92d   :  { %v2284_v47 = vmul.f32 %v3203_v35, %v2282_v42  ;;  %v2300_v42 = vrot.slane %v2296_v17, 3 }
 0x92e   :  { %v2837_v10 = vmul.f32 -1.442695, %v2274_v60 }
 0x92f   :  { %v2285_v59 = vadd.f32 %v2284_v47, %v4071_v43 }
 0x930   :  { %3204 = vpow2.f32 %v2837_v10 }
 0x93a   :  { %v3205_v7 = vpop.eup %3204 }
 0x93b   :  { %v2278_v28 = vadd.f32 1.0, %v3205_v7 }
 0x93d   :  { %3206 = vrcp.f32 %v2278_v28 }
 0x93e   :  { %3208 = vtanh.f32 %v2285_v59 }
 0x947   :  { %v3207_v36 = vpop.eup %3206 }
 0x948   :  { %v2287_v63 = vsub.f32 1.0, %v3207_v36  ;;  %v3209_v1 = vpop.eup %3208  ;;  %v2291_v22 = vmul.f32 %v3207_v36, %v2289_v55 }
 0x94a   :  { %v2288_v51 = vmul.f32 %v3209_v1, %v2287_v63 }
 0x94c   :  { %v5217_v21 = vadd.f32 %v2291_v22, %v2288_v51 }
 0x94e   :  { %v2294_v2 = vrot.slane %v5217_v21, 3 }
 0x950   :  { %v2297_v48 = vpack.c.bf16 %v2294_v2, %v2294_v2 }
 0x952   :  { %v2301_v5 = vrot.slane %v2297_v48, 3 }
 0x954   :  { %2336 = vmatprep.mubr.bf16.mxu0 %v2301_v5  ;;  %2377 = vmatprep.mubr.bf16.mxu1 %v2301_v5 }
 0x955   :  { %2337 = vmatmul.mubr.bf16.vlgmr.msra.gmra.mrb[52].mxu0 %v2300_v42  ;;  %2378 = vmatmul.mubr.bf16.vlgmr.msra.gmra.mrb[44].mxu1 %v2300_v42 }
 0x956   :  { %2387 = vmatpush1.bf16.msra.mxu0 %v5039_v8  ;;  %2418 = vmatprep.mubr.bf16.mxu0 %v2301_v5  ;;  %v3054_v8 = vld [vmem:[#allocation8 + $0x40] sm:$0xff]  }
 0x957   :  { %2388 = vmatprep.subr.bf16.mxu0 %v5042_v62  ;;  %v3055_v62 = vld [vmem:[#allocation8] sm:$0xff]   ;;  %2859 = vmatprep.subr.bf16.mxu1 %v3054_v8 }
 0x958   :  { %2860 = vmatpush3.bf16.msra.mxu1 %v3055_v62 }
 0x95a   :  { %2389 = vmatpush1.bf16.msra.mxu0 %v5047_v12  ;;  %v3056_v12 = vld [vmem:[#allocation8 + $0x48] sm:$0xff]  }
 0x95b   :  { %2390 = vmatprep.subr.bf16.mxu0 %v5050_v14  ;;  %v3057_v14 = vld [vmem:[#allocation8 + $0x8] sm:$0xff]   ;;  %2861 = vmatprep.subr.bf16.mxu1 %v3056_v12 }
 0x95c   :  { %2862 = vmatpush3.bf16.msra.mxu1 %v3057_v14 }
 0x95e   :  { %2391 = vmatpush1.bf16.msra.mxu0 %v5055_v23  ;;  %v3058_v23 = vld [vmem:[#allocation8 + $0x50] sm:$0xff]  }
 0x95f   :  { %2392 = vmatprep.subr.bf16.mxu0 %v5058_v26  ;;  %v3059_v26 = vld [vmem:[#allocation8 + $0x10] sm:$0xff]   ;;  %2863 = vmatprep.subr.bf16.mxu1 %v3058_v23 }
 0x960   :  { %2864 = vmatpush3.bf16.msra.mxu1 %v3059_v26 }
 0x962   :  { %2393 = vmatpush1.bf16.msra.mxu0 %v5063_v30  ;;  %v3060_v30 = vld [vmem:[#allocation8 + $0x58] sm:$0xff]  }
 0x963   :  { %2394 = vmatprep.subr.bf16.mxu0 %v5066_v45  ;;  %v3061_v45 = vld [vmem:[#allocation8 + $0x18] sm:$0xff]   ;;  %2865 = vmatprep.subr.bf16.mxu1 %v3060_v30 }
 0x964   :  { %2866 = vmatpush3.bf16.msra.mxu1 %v3061_v45 }
 0x966   :  { %2395 = vmatpush1.bf16.msra.mxu0 %v5071_v34  ;;  %v3062_v34 = vld [vmem:[#allocation8 + $0x60] sm:$0xff]  }
 0x967   :  { %2396 = vmatprep.subr.bf16.mxu0 %v5074_v24  ;;  %v3063_v24 = vld [vmem:[#allocation8 + $0x20] sm:$0xff]   ;;  %2867 = vmatprep.subr.bf16.mxu1 %v3062_v34 }
 0x968   :  { %2868 = vmatpush3.bf16.msra.mxu1 %v3063_v24 }
 0x96a   :  { %2397 = vmatpush1.bf16.msra.mxu0 %v5079_v18  ;;  %v3064_v18 = vld [vmem:[#allocation8 + $0x68] sm:$0xff]  }
 0x96b   :  { %2398 = vmatprep.subr.bf16.mxu0 %v5082_v25  ;;  %v3065_v25 = vld [vmem:[#allocation8 + $0x28] sm:$0xff]   ;;  %2869 = vmatprep.subr.bf16.mxu1 %v3064_v18 }
 0x96c   :  { %2870 = vmatpush3.bf16.msra.mxu1 %v3065_v25 }
 0x96e   :  { %2399 = vmatpush1.bf16.msra.mxu0 %v5087_v27  ;;  %v3066_v27 = vld [vmem:[#allocation8 + $0x70] sm:$0xff]  }
 0x96f   :  { %2400 = vmatprep.subr.bf16.mxu0 %v5090_v40  ;;  %v3067_v40 = vld [vmem:[#allocation8 + $0x30] sm:$0xff]   ;;  %2871 = vmatprep.subr.bf16.mxu1 %v3066_v27 }
 0x970   :  { %2872 = vmatpush3.bf16.msra.mxu1 %v3067_v40 }
 0x972   :  { %2401 = vmatpush1.bf16.msra.mxu0 %v5095_v15  ;;  %v3068_v15 = vld [vmem:[#allocation8 + $0x78] sm:$0xff]  }
 0x973   :  { %2402 = vmatprep.subr.bf16.mxu0 %v5098_v4  ;;  %v3069_v4 = vld [vmem:[#allocation8 + $0x38] sm:$0xff]   ;;  %2873 = vmatprep.subr.bf16.mxu1 %v3068_v15 }
 0x974   :  { %2874 = vmatpush3.bf16.msra.mxu1 %v3069_v4 }
 0x976   :  { %2403 = vmatpush1.bf16.msra.mxu0 %v5103_v58 }
 0x977   :  { %2404 = vmatprep.subr.bf16.mxu0 %v5106_v54 }
 0x97a   :  { %2405 = vmatpush1.bf16.msra.mxu0 %v5111_v9  ;;  %v5908_v9 = vld [vmem:[#allocation65_spill] sm:$0xff] }
 0x97b   :  { %2406 = vmatprep.subr.bf16.mxu0 %v5114_v29 }
 0x97e   :  { %2407 = vmatpush1.bf16.msra.mxu0 %v5119_v11 }
 0x97f   :  { %2408 = vmatprep.subr.bf16.mxu0 %v5122_v31 }
 0x982   :  { %2409 = vmatpush1.bf16.msra.mxu0 %v5127_v37 }
 0x983   :  { %2410 = vmatprep.subr.bf16.mxu0 %v5130_v3 }
 0x986   :  { %2411 = vmatpush1.bf16.msra.mxu0 %v5135_v19 }
 0x987   :  { %2412 = vmatprep.subr.bf16.mxu0 %v5138_v53 }
 0x98a   :  { %2413 = vmatpush1.bf16.msra.mxu0 %v5143_v41 }
 0x98b   :  { %2414 = vmatprep.subr.bf16.mxu0 %v5146_v50 }
 0x98e   :  { %2415 = vmatpush1.bf16.msra.mxu0 %v5151_v16 }
 0x98f   :  { %2416 = vmatprep.subr.bf16.mxu0 %v5154_v46 }
 0x992   :  { %2417 = vmatpush1.bf16.msra.mxu0 %v5159_v56 }
 0x995   :  { %2419 = vmatmul.mubr.bf16.vlgmr.msra.gmra.mrb[56].mxu0 %v2300_v42 }
 0xa28   :  { %v2338_v58 = vpop.f32.mrb[52].mxu0  ;;  %v2379_v54 = vpop.f32.mrb[44].mxu1 }
 0xa29   :  { %v2339_v29 = vadd.f32 %v2338_v58, %v5908_v9  ;;  %v2340_v11 = vpop.f32.mrb[53].mxu0  ;;  %v2381_v31 = vpop.f32.mrb[45].mxu1  ;;  %v5909_v58 = vld [vmem:[#allocation37_spill] sm:$0xff] }
 0xa2a   :  { %v2341_v37 = vadd.f32 %v2340_v11, %v5723_v44  ;;  %v2342_v3 = vpop.f32.mrb[54].mxu0  ;;  %v2383_v19 = vpop.f32.mrb[46].mxu1  ;;  %v2380_v44 = vadd.f32 %v2379_v54, %v5669_v52  ;;  %v2382_v59 = vadd.f32 %v2381_v31, %v4040_v49  ;;  %v5912_v31 = vld [vmem:[#allocation47_spill] sm:$0xff] }
 0xa2b   :  { %v2428_v53 = vrot.slane %v2339_v29, 1  ;;  %v2343_v41 = vpop.f32.mrb[55].mxu0  ;;  %v2384_v50 = vpop.f32.mrb[47].mxu1  ;;  %v5911_v29 = vld [vmem:[#allocation69_spill] sm:$0xff]  ;;  %v5913_v3 = vld [vmem:[#allocation71_spill] sm:$0xff] }
 0xa2c   :  { %v2438_v16 = vrot.slane %v2341_v37, 1  ;;  %v2448_v36 = vrot.slane %v2380_v44, 1  ;;  %v2842_v41 = vld [vmem:[%s5304_s6] ss:$0 sm:$0xff] }
 0xa2d   :  { %v2430_v46 = vadd.f32 %v2428_v53, %v5667_v38  ;;  %v2460_v38 = vadd.f32 %v2382_v59, %v4050_v6 }
 0xa2e   :  { %v2440_v56 = vadd.f32 %v2438_v16, %v5668_v32  ;;  %v2456_v32 = vrot.slane %v5205_v0, 7 }
 0xa2f   :  { %v2838_v35 = vmul.f32 -1.442695, %v2430_v46  ;;  %v2840_v2 = vmul.f32 -1.442695, %v2460_v38 }
 0xa30   :  { %v2839_v60 = vmul.f32 -1.442695, %v2440_v56 }
 0xa31   :  { %3210 = vpow2.f32 %v2838_v35 }
 0xa32   :  { %3212 = vpow2.f32 %v2839_v60 }
 0xa3b   :  { %v3211_v47 = vpop.eup %3210 }
 0xa3c   :  { %v3213_v10 = vpop.eup %3212  ;;  %v2434_v7 = vadd.f32 1.0, %v3211_v47 }
 0xa3d   :  { %v2444_v28 = vadd.f32 1.0, %v3213_v10 }
 0xa3e   :  { %3214 = vrcp.f32 %v2434_v7 }
 0xa3f   :  { %3216 = vrcp.f32 %v2444_v28 }
 0xa48   :  { %v3215_v63 = vpop.eup %3214 }
 0xa49   :  { %v3217_v55 = vpop.eup %3216  ;;  %v2450_v1 = vmul.f32 %v3215_v63, %v2448_v36 }
 0xa4a   :  { %v2458_v51 = vmul.f32 %v3217_v55, %v2456_v32  ;;  %v2453_v17 = vsub.f32 1.0, %v3217_v55 }
 0xa4b   :  { %v2451_v22 = vadd.f32 %v2450_v1, %v4048_v57 }
 0xa4d   :  { %3218 = vtanh.f32 %v2451_v22 }
 0xa4e   :  { %3220 = vpow2.f32 %v2840_v2 }
 0xa57   :  { %v3219_v48 = vpop.eup %3218 }
 0xa58   :  { %v2454_v5 = vmul.f32 %v3219_v48, %v2453_v17  ;;  %v3221_v52 = vpop.eup %3220 }
 0xa59   :  { %v2464_v6 = vadd.f32 1.0, %v3221_v52 }
 0xa5a   :  { %v2459_v49 = vadd.f32 %v2458_v51, %v2454_v5 }
 0xa5b   :  { %3222 = vrcp.f32 %v2464_v6 }
 0xa5c   :  { %v2496_v42 = vsel %vm2495_vm7, %v5210_v13, %v2459_v49 }
 0xa65   :  { %v3223_v14 = vpop.eup %3222 }
 0xa68   :  { %v2420_v0 = vpop.f32.mrb[56].mxu0 }
 0xa69   :  { %v2421_v8 = vadd.f32 %v2420_v0, %v4058_v20  ;;  %v2422_v62 = vpop.f32.mrb[57].mxu0  ;;  %v2479_v20 = vrot.slane %v5217_v21, 1 }
 0xa6a   :  { %v2423_v57 = vadd.f32 %v2422_v62, %v4060_v39  ;;  %v2424_v12 = vpop.f32.mrb[58].mxu0 }
 0xa6b   :  { %v2467_v23 = vadd.f32 %v2421_v8, %v4066_v33  ;;  %v2425_v26 = vpop.f32.mrb[59].mxu0 }
 0xa6c   :  { %v2474_v30 = vmul.f32 %v3223_v14, %v2423_v57 }
 0xa6d   :  { %v2841_v45 = vmul.f32 -1.442695, %v2467_v23 }
 0xa6e   :  { %v2475_v13 = vadd.f32 %v2474_v30, %v4071_v43  ;;  %v5910_v43 = vld [vmem:[#allocation43_spill] sm:$0xff] }
 0xa6f   :  { %3224 = vpow2.f32 %v2841_v45 }
 0xa79   :  { %v3225_v34 = vpop.eup %3224 }
 0xa7a   :  { %v2471_v24 = vadd.f32 1.0, %v3225_v34 }
 0xa7c   :  { %3226 = vrcp.f32 %v2471_v24 }
 0xa7d   :  { %3228 = vtanh.f32 %v2475_v13 }
 0xa86   :  { %v3227_v18 = vpop.eup %3226 }
 0xa87   :  { %v2477_v25 = vsub.f32 1.0, %v3227_v18  ;;  %v3229_v27 = vpop.eup %3228  ;;  %v2481_v39 = vmul.f32 %v3227_v18, %v2479_v20 }
 0xa89   :  { %v2478_v40 = vmul.f32 %v3229_v27, %v2477_v25 }
 0xa8b   :  { %v2482_v15 = vadd.f32 %v2481_v39, %v2478_v40 }
 0xa8d   :  { %v2497_v33 = vsel %vm2483_vm1, %v2482_v15, %v5217_v21  ;;  %v2504_v21 = vpack.c.bf16 %v2496_v42, %v2496_v42 }
 0xa8e   :  { %v2498_v4 = vsel %vm2485_vm2, %v2497_v33, %v5030_v61 }
 0xa8f   :  { %v2499_v54 = vsel %vm2487_vm3, %v2498_v4, %v5909_v58 }
 0xa90   :  { %v2500_v9 = vsel %vm2489_vm4, %v2499_v54, %v5910_v43 }
 0xa91   :  { %v2501_v11 = vsel %vm2491_vm5, %v2500_v9, %v5911_v29 }
 0xa92   :  { %v2502_v37 = vsel %vm2493_vm6, %v2501_v11, %v5912_v31 }
 0xa93   :  { %v2503_v19 = vsel %vm2495_vm7, %v2502_v37, %v5913_v3 }
 0xa94   :  { %v2505_v53 = vpack.c.bf16 %v2503_v19, %v2503_v19 }
 0xa96   :  { %2673 = vmatprep.mubr.bf16.mxu1 %v2505_v53 }
 0xa97   :  { %2674 = vmatmul.mubr.bf16.vlgmr.msra.gmra.mrb[48].mxu1 %v2504_v21 }
 0xb6a   :  { %v2875_v61 = vpop.f32.mrb[48].mxu1 }
 0xb6b   :  { %v2876_v50 = vpop.f32.mrb[49].mxu1 }
 0xb6c   :  { %v2877_v16 = vadd.f32 %v2876_v50, %v2875_v61  ;;  %v2878_v46 = vpop.f32.mrb[50].mxu1 }
 0xb6d   :  { %v2879_v56 = vpop.f32.mrb[51].mxu1 }
 0xb6e   :  { %v2676_v35 = vadd.f32 %v2877_v16, %v2842_v41 }
 0xb70   :  { %2681 = vst [vmem:[#allocation10] sm:$0xff] %v2676_v35 }
 0xb71   :  { %3521 = shalt.err (!%p3518_p8)
}
 0xb72   :  { %s3522_s6 = scalar_lea.hbm %s5305_s7, 128 }
 0xb73   :  { %p3523_p9 = scmp.ne.s32.totalorder %s5305_s7, %s3522_s6  ;;  %p3526_p10 = scmp.lt.u32.totalorder %s3522_s6, %s5305_s7 }
 0xb75   :  { %p3528_p11 = pnand %p3526_p10, %p3523_p9 }
 0xb77   :  { %3531 = shalt.err (!%p3528_p11)
}
 0xb78   :  { %2691 = dma.vmem_to_hbm [thread:$0]  %s2689_s30, 128, %s5305_s7, [#allocation4]  }
 0xb79   :  { %3538 = dma.done.wait [#allocation4], 128  }
 0xb7a   :  { %3539 = vsyncadd [#allocation4], 4294967168 }
 0xb7b   :  { %2695 = vsyncpa [#allocation3], 1 }
 0xb7c   :  { %2696 = vsyncpa [#allocation6], 1 }
 0xb7d   :  { %2697 = vsyncpa [#allocation9], 1 }
 0xb7e   :  { %2698 = vsyncpa [#allocation4], 1 }

</bundles_post_ra>
